<compile_context>
chip_gen: v5e
topology: v5e:2x2
jax: 0.10.0
libtpu: 0.0.40
codegen_flags: <defaults>
</compile_context>

<pallas_src>
import math

import jax
import jax.numpy as jnp
from jax.experimental import pallas as pl
from jax.experimental.pallas import tpu as pltpu


def _make_pe_kernel(num_pos_feats):
    """Pallas kernel producing the sine position buffer in channel-major
    (2F, H*W) layout (lane-dense last dim).

    Inputs (all VMEM, precomputed in the wrapper):
      inv_dim_t : (F, 1)  f32   1 / dim_t
      phase     : (F, 1)  f32   0, pi/2, 0, pi/2, ...  (cos = sin(x + pi/2))
      y_row     : (1, HW) f32   normalized row index + 1 per flattened pixel
      x_row     : (1, HW) f32   normalized col index + 1 per flattened pixel
    """
    F = num_pos_feats

    def kernel(inv_dim_t_ref, phase_ref, y_row_ref, x_row_ref, out_ref):
        inv_dim_t = inv_dim_t_ref[...]   # (F, 1)  lane-broadcast
        phase = phase_ref[...]           # (F, 1)  lane-broadcast
        # (1, HW) * (F, 1) -> (F, HW); one mul + one add + one EUP sin per elem.
        out_ref[:F, :] = jnp.sin(y_row_ref[...] * inv_dim_t + phase)  # pos_y
        out_ref[F:, :] = jnp.sin(x_row_ref[...] * inv_dim_t + phase)  # pos_x

    return kernel


class PositionEmbeddingSinePallas:
    """JAX/Pallas port of PositionEmbeddingSine. Buffer generation (angle
    build + sin/cos interleave) runs in a single lane-dense Pallas kernel."""

    def __init__(self, num_pos_feats=64, temperature=10000, normalize=False,
                 scale=None, maxH=30, maxW=30):
        self.num_pos_feats = num_pos_feats
        self.temperature = temperature
        self.normalize = normalize
        if scale is not None and normalize is False:
            raise ValueError("normalize should be True if scale is passed")
        if scale is None:
            scale = 2 * math.pi
        self.scale = scale
        self.maxH = maxH
        self.maxW = maxW
        self.pe = self._gen_pos_buffer()   # (1, 2*num_pos_feats, maxH, maxW)

    def _gen_pos_buffer(self):
        H, W, F = self.maxH, self.maxW, self.num_pos_feats
        HW = H * W
        eps = 1e-6

        # --- wrapper-side (init-time) precompute, hoisted out of the kernel ---
        # cumsum of an all-ones map is (index + 1); the normalizing cumsum-last
        # entry is H (resp. W), so normalization is a constant f32 div+mul that
        # mirrors the reference ordering.
        idx = jnp.arange(HW, dtype=jnp.int32)
        y_row = ((idx // W) + 1).astype(jnp.float32)
        x_row = ((idx % W) + 1).astype(jnp.float32)
        if self.normalize:
            y_row = y_row / (float(H) + eps) * self.scale
            x_row = x_row / (float(W) + eps) * self.scale
        y_row = y_row.reshape(1, HW)
        x_row = x_row.reshape(1, HW)

        dim_idx = jnp.arange(F, dtype=jnp.float32)
        # torch float `//` == floor division
        dim_t = (self.temperature ** (2.0 * jnp.floor(dim_idx / 2.0) / F)).astype(jnp.float32)
        inv_dim_t = (1.0 / dim_t).reshape(F, 1)   # exact reciprocal, done once

        # parity phase for cos(x) = sin(x + pi/2) fold (one EUP sin per elem)
        phase = ((jnp.arange(F, dtype=jnp.int32) % 2).astype(jnp.float32)
                 * (math.pi / 2.0)).reshape(F, 1)

        kernel = _make_pe_kernel(F)
        vmem = pl.BlockSpec(memory_space=pltpu.MemorySpace.VMEM)
        pos_flat = pl.pallas_call(
            kernel,
            out_shape=jax.ShapeDtypeStruct((2 * F, HW), jnp.float32),
            in_specs=[vmem, vmem, vmem, vmem],
            out_specs=vmem,
        )(inv_dim_t, phase, y_row, x_row)

        # channel-major (2F, H*W) -> NCHW is a free reshape (no transpose)
        return pos_flat.reshape(1, 2 * F, H, W)

    def forward(self):
        # PyTorch's `self.pe.repeat((1, 1, 1, 1))` is a semantic no-op copy;
        # return the cached buffer directly (values identical).
        return self.pe


def _reference_pe(num_pos_feats, temperature, normalize, scale, H, W):
    """Pure-JAX transcription of the PyTorch _gen_pos_buffer for validation."""
    eyes = jnp.ones((1, H, W), jnp.float32)
    y_embed = jnp.cumsum(eyes, axis=1)
    x_embed = jnp.cumsum(eyes, axis=2)
    if normalize:
        eps = 1e-6
        y_embed = y_embed / (y_embed[:, -1:, :] + eps) * scale
        x_embed = x_embed / (x_embed[:, :, -1:] + eps) * scale
    dim_idx = jnp.arange(num_pos_feats, dtype=jnp.float32)
    dim_t = temperature ** (2.0 * jnp.floor(dim_idx / 2.0) / num_pos_feats)
    pos_x = x_embed[:, :, :, None] / dim_t
    pos_y = y_embed[:, :, :, None] / dim_t
    pos_x = jnp.stack((jnp.sin(pos_x[..., 0::2]), jnp.cos(pos_x[..., 1::2])),
                      axis=4).reshape(1, H, W, num_pos_feats)
    pos_y = jnp.stack((jnp.sin(pos_y[..., 0::2]), jnp.cos(pos_y[..., 1::2])),
                      axis=4).reshape(1, H, W, num_pos_feats)
    pos = jnp.concatenate((pos_y, pos_x), axis=3).transpose(0, 3, 1, 2)
    return pos


if __name__ == "__main__":
    # The module's forward takes no tensor inputs; its "input" is the built-in
    # ones buffer, which is deterministic. PRNGKey(0) is constructed for
    # reproducibility discipline but no random data is needed.
    _ = jax.random.PRNGKey(0)

    num_pos_feats, maxH, maxW = 32, 16, 16   # small shapes; output (1, 64, 16, 16)

    # --- normalize=False path ---
    module = PositionEmbeddingSinePallas(
        num_pos_feats=num_pos_feats, temperature=10000,
        normalize=False, scale=None, maxH=maxH, maxW=maxW)
    out = jax.block_until_ready(module.forward())
    ref = _reference_pe(num_pos_feats, 10000, False, 2 * math.pi, maxH, maxW)
    assert out.shape == (1, 2 * num_pos_feats, maxH, maxW), out.shape
    assert jnp.allclose(out, ref, atol=1e-5, rtol=1e-5), \
        float(jnp.max(jnp.abs(out - ref)))

    # --- normalize=True path ---
    module_n = PositionEmbeddingSinePallas(
        num_pos_feats=num_pos_feats, temperature=10000,
        normalize=True, scale=None, maxH=maxH, maxW=maxW)
    out_n = jax.block_until_ready(module_n.forward())
    ref_n = _reference_pe(num_pos_feats, 10000, True, 2 * math.pi, maxH, maxW)
    assert out_n.shape == (1, 2 * num_pos_feats, maxH, maxW), out_n.shape
    assert jnp.allclose(out_n, ref_n, atol=1e-5, rtol=1e-5), \
        float(jnp.max(jnp.abs(out_n - ref_n)))

    # --- module-default shapes (F=64, 30x30) as an extra shape sanity check ---
    module_d = PositionEmbeddingSinePallas()
    out_d = jax.block_until_ready(module_d.forward())
    ref_d = _reference_pe(64, 10000, False, 2 * math.pi, 30, 30)
    assert out_d.shape == (1, 128, 30, 30), out_d.shape
    assert jnp.allclose(out_d, ref_d, atol=1e-5, rtol=1e-5), \
        float(jnp.max(jnp.abs(out_d - ref_d)))

    print("KERNEL_OK")
</pallas_src>

<mosaic_0001>
module attributes {stable_mosaic.version = 11 : i64} {
  func.func @kernel(%arg0: memref<32x1xf32, #tpu.memory_space<vmem>>, %arg1: memref<32x1xf32, #tpu.memory_space<vmem>>, %arg2: memref<1x256xf32, #tpu.memory_space<vmem>>, %arg3: memref<1x256xf32, #tpu.memory_space<vmem>>, %arg4: memref<64x256xf32, #tpu.memory_space<vmem>>) attributes {dimension_semantics = [], scalar_prefetch = 0 : i64, scratch_operands = 0 : i64, tpu.core_type = #tpu.core_type<tc>} {
    %c0 = arith.constant 0 : index
    %c0_0 = arith.constant 0 : index
    %0 = vector.load %arg0[%c0, %c0_0] : memref<32x1xf32, #tpu.memory_space<vmem>>, vector<32x1xf32>
    %c0_1 = arith.constant 0 : index
    %c0_2 = arith.constant 0 : index
    %1 = vector.load %arg1[%c0_1, %c0_2] : memref<32x1xf32, #tpu.memory_space<vmem>>, vector<32x1xf32>
    %c0_3 = arith.constant 0 : index
    %c0_4 = arith.constant 0 : index
    %2 = vector.load %arg2[%c0_3, %c0_4] : memref<1x256xf32, #tpu.memory_space<vmem>>, vector<1x256xf32>
    %3 = vector.broadcast %2 : vector<1x256xf32> to vector<32x256xf32>
    %4 = vector.broadcast %0 : vector<32x1xf32> to vector<32x256xf32>
    %5 = arith.mulf %3, %4 : vector<32x256xf32>
    %6 = vector.broadcast %1 : vector<32x1xf32> to vector<32x256xf32>
    %7 = arith.addf %5, %6 : vector<32x256xf32>
    %8 = math.sin %7 : vector<32x256xf32>
    %c0_5 = arith.constant 0 : index
    %c0_6 = arith.constant 0 : index
    %9 = vector.load %arg4[%c0_5, %c0_6] : memref<64x256xf32, #tpu.memory_space<vmem>>, vector<32x256xf32>
    tpu.vector_store %arg4[%c0_5, %c0_6], %8 {strides = array<i32>} : memref<64x256xf32, #tpu.memory_space<vmem>>, vector<32x256xf32>,
    %c0_7 = arith.constant 0 : index
    %c0_8 = arith.constant 0 : index
    %10 = vector.load %arg3[%c0_7, %c0_8] : memref<1x256xf32, #tpu.memory_space<vmem>>, vector<1x256xf32>
    %11 = vector.broadcast %10 : vector<1x256xf32> to vector<32x256xf32>
    %12 = vector.broadcast %0 : vector<32x1xf32> to vector<32x256xf32>
    %13 = arith.mulf %11, %12 : vector<32x256xf32>
    %14 = vector.broadcast %1 : vector<32x1xf32> to vector<32x256xf32>
    %15 = arith.addf %13, %14 : vector<32x256xf32>
    %16 = math.sin %15 : vector<32x256xf32>
    %c32 = arith.constant 32 : index
    %c0_9 = arith.constant 0 : index
    %17 = vector.load %arg4[%c32, %c0_9] : memref<64x256xf32, #tpu.memory_space<vmem>>, vector<32x256xf32>
    tpu.vector_store %arg4[%c32, %c0_9], %16 {strides = array<i32>} : memref<64x256xf32, #tpu.memory_space<vmem>>, vector<32x256xf32>,
    return
  }
}

</mosaic_0001>

<bundles_post_ra>
// kernel: tpu_custom_call.1
= control target key start
LH: loop header
LB: loop body
LE: loop exit
PB: predicated region body
PF: predicated region fallthrough
CT: control target
= control target key end

     0   :  { %v2711_v2 = vmov 0   ;;  %s4637_s0 = inlined_call_operand.vmem [shape: f32[32,1], index: 0, kind: input, shape index: {}]   ;;  %s4638_s1 = inlined_call_operand.vmem [shape: f32[32,1], index: 1, kind: input, shape index: {}]   ;;  %s4639_s2 = inlined_call_operand.vmem [shape: f32[1,256], index: 2, kind: input, shape index: {}]   ;;  %s4640_s3 = inlined_call_operand.vmem [shape: f32[1,256], index: 3, kind: input, shape index: {}]   ;;  %s4641_s4 = inlined_call_operand.hbm [shape: f32[64,256], index: 4, kind: output, shape index: {}]  }
   0x1   :  { %v20_v0 = vld [vmem:[%s4637_s0 + $0x10] sm:$0xff]  ;;  %v18_v1 = vld [vmem:[%s4637_s0] sm:$0xff]  ;;  %2683 = vset.pattern.permute.xlu1 %v2711_v2  ;;  %2682 = vset.pattern.permute.xlu0 %v2711_v2 }
   0x2   :  { %44 = vperm.xlu1 %2683, %v20_v0   ;;  %34 = vperm.xlu0 %2682, %v18_v1   ;;  %v22_v3 = vld [vmem:[%s4638_s1] sm:$0xff] }
   0x3   :  { %9 = vsyncpa [#allocation3], 0  ;;  %2684 = vset.pattern.permute.xlu2 %v2711_v2  ;;  %v21_v4 = vld [vmem:[%s4637_s0 + $0x18] sm:$0xff]  ;;  %v19_v5 = vld [vmem:[%s4637_s0 + $0x8] sm:$0xff]  ;;  %v2712_v45 = vmov 683565275  }
   0x4   :  { %62 = vperm.xlu2 %2684, %v22_v3   ;;  %v23_v6 = vld [vmem:[%s4638_s1 + $0x8] sm:$0xff]  ;;  %v25_v7 = vld [vmem:[%s4638_s1 + $0x18] sm:$0xff]  ;;  %v24_v8 = vld [vmem:[%s4638_s1 + $0x10] sm:$0xff]  ;;  %v2713_v47 = vmov 2475754826   ;;  %s2612_s9 = sshll.u32 %s4641_s4, 4  ;;  %s2613_s9 = int_to_ptr.hbm [resolvable:$true] %s2612_s9 }
   0x5   :  { %v26_v9 = vld [vmem:[%s4639_s2] sm:$0x3]  ;;  %v2714_v51 = vmov 2131351028   ;;  %v2715_v54 = vmov 2102212464  }
   0x6   :  { %v2776_v10 = vperm.slane %v26_v9, 0  ;;  %v2778_v11 = vperm.slane %v26_v9, 1  ;;  %v2716_v57 = vmov 920167782   ;;  %v2717_v60 = vmov 1326507024  }
   0x7   :  { %s2718_s2 = smov [#allocation2]   ;;  %s2719_s10 = smov 256  }
   0x8   :  { %s2720_s11 = smov 16  }
   0xa   :  { %49 = vperm.xlu1 %2683, %v21_v4   ;;  %39 = vperm.xlu0 %2682, %v19_v5  }
   0xc   :  { %67 = vperm.xlu2 %2684, %v23_v6  }
  0x12   :  { %77 = vperm.xlu1 %2683, %v25_v7   ;;  %72 = vperm.xlu0 %2682, %v24_v8  }
  0x5e   :  { %v2786_v15 = vpop.permute.xlu2 %62 }
  0x66   :  { %v2808_v37 = vpop.permute.xlu2 %67 }
  0x74   :  { %v2780_v12 = vpop.permute.xlu0 %34 }
  0x75   :  { %v52_v13 = vmul.f32 %v2780_v12, %v2776_v10  ;;  %v53_v14 = vmul.f32 %v2780_v12, %v2778_v11 }
  0x77   :  { %v2789_v16 = vadd.f32 %v2786_v15, %v52_v13  ;;  %v2792_v17 = vadd.f32 %v2786_v15, %v53_v14 }
  0x79   :  { %v88_v18 = vand.u32 2147483647, %v2789_v16  ;;  %v91_v19 = vand.u32 2139095040, %v2789_v16  ;;  %v243_v20 = vand.u32 2147483647, %v2792_v17  ;;  %v246_v21 = vand.u32 2139095040, %v2792_v17 }
  0x7b   :  { %v92_v22 = vshrl.u32 %v91_v19, 23  ;;  %v95_v23 = vand.u32 8388607, %v88_v18  ;;  %v247_v24 = vshrl.u32 %v246_v21, 23  ;;  %v250_v29 = vand.u32 8388607, %v243_v20 }
  0x7c   :  { %v2800_v25 = vpop.permute.xlu0 %39 }
  0x7d   :  { %v2624_v26 = vadd.s32 4294967169, %v92_v22  ;;  %v96_v27 = vor.u32 8388608, %v95_v23  ;;  %v2627_v28 = vadd.s32 4294967169, %v247_v24  ;;  %v54_v32 = vmul.f32 %v2800_v25, %v2776_v10 }
  0x7e   :  { %v251_v34 = vor.u32 8388608, %v250_v29 }
  0x7f   :  { %v98_v30 = vadd.s32 1, %v2624_v26  ;;  %v253_v31 = vadd.s32 1, %v2627_v28  ;;  %v2806_v33 = vshll.u32 %v96_v27, 8  ;;  %v2811_v39 = vadd.f32 %v2808_v37, %v54_v32 }
  0x80   :  { %v2818_v43 = vshll.u32 %v251_v34, 8 }
  0x81   :  { %vm99_vm0 = vcmp.gt.s32.totalorder %v98_v30, 0  ;;  %vm254_vm1 = vcmp.gt.s32.totalorder %v253_v31, 0  ;;  %v2814_v41 = vand.u32 65535, %v2806_v33  ;;  %v138_v49 = vshrl.u32 %v2806_v33, 16 }
  0x82   :  { %v100_v35 = vsel %vm99_vm0, %v98_v30, 0  ;;  %v255_v36 = vsel %vm254_vm1, %v253_v31, 0 }
  0x83   :  { %v102_v38 = vand.u32 31, %v100_v35  ;;  %v2816_v42 = vand.u32 31, %v255_v36  ;;  %v2820_v44 = vshrl.u32 %v100_v35, 5  ;;  %v2865_v35 = vshrl.u32 %v255_v36, 5 }
  0x85   :  { %v103_v40 = vsub.s32 32, %v102_v38  ;;  %v105_v46 = vshll.u32 %v2712_v45, %v102_v38  ;;  %v108_v48 = vshll.u32 %v2713_v47, %v102_v38  ;;  %v111_v53 = vshll.u32 %v2714_v51, %v102_v38 }
  0x86   :  { %v114_v56 = vshll.u32 %v2715_v54, %v102_v38  ;;  %v117_v59 = vshll.u32 %v2716_v57, %v102_v38  ;;  %v2834_v1 = vsub.s32 32, %v2816_v42  ;;  %vm120_vm2 = vcmp.lt.s32.totalorder %v2820_v44, 1 }
  0x87   :  { %v106_v50 = vshrl.u32 %v2713_v47, %v103_v40  ;;  %v109_v52 = vshrl.u32 %v2714_v51, %v103_v40  ;;  %v112_v55 = vshrl.u32 %v2715_v54, %v103_v40  ;;  %v115_v58 = vshrl.u32 %v2716_v57, %v103_v40 }
  0x88   :  { %v118_v61 = vshrl.u32 %v2717_v60, %v103_v40  ;;  %vm121_vm3 = vcmp.lt.s32.totalorder %v2820_v44, 2  ;;  %v104_v5 = vshrl.u32 %v2712_v45, %v103_v40  ;;  %vm123_vm4 = vcmp.lt.s32.totalorder %v2820_v44, 4 }
  0x89   :  { %v107_v62 = vor.u32 %v106_v50, %v105_v46  ;;  %v110_v63 = vor.u32 %v109_v52, %v108_v48  ;;  %v113_v0 = vor.u32 %v112_v55, %v111_v53  ;;  %v116_v3 = vor.u32 %v115_v58, %v114_v56 }
  0x8a   :  { %v119_v4 = vor.u32 %v118_v61, %v117_v59  ;;  %vm122_vm5 = vcmp.lt.s32.totalorder %v2820_v44, 3  ;;  %v260_v13 = vshll.u32 %v2712_v45, %v2816_v42  ;;  %v261_v22 = vshrl.u32 %v2713_v47, %v2834_v1 }
  0x8b   :  { %v128_v6 = vsel %vm120_vm2, %v107_v62, %v110_v63  ;;  %v132_v7 = vsel %vm120_vm2, %v110_v63, %v113_v0  ;;  %v129_v8 = vsel %vm123_vm4, %v116_v3, 920167782  ;;  %v125_v14 = vsel %vm123_vm4, %v113_v0, 2102212464 }
  0x8c   :  { %v133_v9 = vsel %vm123_vm4, %v119_v4, 1326507024  ;;  %v130_v19 = vsel %vm122_vm5, %v113_v0, %v129_v8  ;;  %v263_v26 = vshll.u32 %v2713_v47, %v2816_v42  ;;  %v264_v27 = vshrl.u32 %v2714_v51, %v2834_v1 }
  0x8d   :  { %v134_v21 = vsel %vm122_vm5, %v116_v3, %v133_v9  ;;  %v131_v23 = vsel %vm121_vm3, %v128_v6, %v130_v19  ;;  %v124_v32 = vsel %vm120_vm2, %v104_v5, %v107_v62  ;;  %v126_v34 = vsel %vm122_vm5, %v110_v63, %v125_v14 }
  0x8e   :  { %v135_v24 = vsel %vm121_vm3, %v132_v7, %v134_v21  ;;  %v161_v30 = vand.u32 65535, %v131_v23  ;;  %v162_v31 = vshrl.u32 %v131_v23, 16  ;;  %v2867_v38 = vor.u32 %v261_v22, %v260_v13 }
  0x8f   :  { %v139_v28 = vand.u32 65535, %v135_v24  ;;  %v140_v29 = vshrl.u32 %v135_v24, 16  ;;  %v2870_v48 = vor.u32 %v264_v27, %v263_v26  ;;  %v267_v50 = vshrl.u32 %v2715_v54, %v2834_v1 }
  0x90   :  { %v164_v53 = vmul.u32 %v162_v31, %v2814_v41  ;;  %v165_v55 = vmul.u32 %v161_v30, %v138_v49  ;;  %v266_v56 = vshll.u32 %v2714_v51, %v2816_v42  ;;  %v163_v59 = vmul.u32 %v161_v30, %v2814_v41 }
  0x91   :  { %v142_v40 = vmul.u32 %v140_v29, %v2814_v41  ;;  %v143_v46 = vmul.u32 %v139_v28, %v138_v49  ;;  %v141_v52 = vmul.u32 %v139_v28, %v2814_v41  ;;  %v144_v36 = vmul.u32 %v140_v29, %v138_v49 }
  0x92   :  { %v166_v61 = vmul.u32 %v162_v31, %v138_v49  ;;  %v167_v3 = vshll.u32 %v164_v53, 16  ;;  %v169_v5 = vshll.u32 %v165_v55, 16  ;;  %v268_v6 = vor.u32 %v267_v50, %v266_v56 }
  0x93   :  { %v145_v58 = vshll.u32 %v142_v40, 16  ;;  %v146_v62 = vshrl.u32 %v142_v40, 16  ;;  %v147_v63 = vshll.u32 %v143_v46, 16  ;;  %v148_v0 = vshrl.u32 %v143_v46, 16 }
  0x94   :  { %vm171_vm7 = vc.u32 %v163_v59, %v167_v3  ;;  %v173_v8 = vadd.s32 %v167_v3, %v163_v59  ;;  %v270_v9 = vshrl.u32 %v2716_v57, %v2834_v1  ;;  %v269_v49 = vshll.u32 %v2715_v54, %v2816_v42 }
  0x95   :  { %vm149_vm6 = vc.u32 %v141_v52, %v145_v58  ;;  %v151_v4 = vadd.s32 %v145_v58, %v141_v52  ;;  %v172_v41 = vsel %vm171_vm7, 1, %v2711_v2  ;;  %v272_v21 = vshll.u32 %v2716_v57, %v2816_v42 }
  0x96   :  { %v150_v7 = vsel %vm149_vm6, 1, %v2711_v2  ;;  %v174_v19 = vadd.s32 %v172_v41, %v166_v61  ;;  %vm175_vm9 = vc.u32 %v173_v8, %v169_v5  ;;  %v271_v24 = vor.u32 %v270_v9, %v269_v49 }
  0x97   :  { %v152_v13 = vadd.s32 %v150_v7, %v144_v36  ;;  %vm153_vm8 = vc.u32 %v151_v4, %v147_v63  ;;  %v176_v23 = vsel %vm175_vm9, 1, %v2711_v2  ;;  %v273_v26 = vshrl.u32 %v2717_v60, %v2834_v1 }
  0x98   :  { %v154_v14 = vsel %vm153_vm8, 1, %v2711_v2  ;;  %v168_v27 = vshrl.u32 %v164_v53, 16  ;;  %v170_v28 = vshrl.u32 %v165_v55, 16  ;;  %v2891_v29 = vadd.s32 %v173_v8, %v169_v5 }
  0x99   :  { %v156_v22 = vadd.s32 %v154_v14, %v152_v13  ;;  %v178_v30 = vadd.s32 %v176_v23, %v174_v19  ;;  %v274_v40 = vor.u32 %v273_v26, %v272_v21  ;;  %vm275_vm10 = vcmp.lt.s32.totalorder %v2865_v35, 1 }
  0x9a   :  { %vm278_vm11 = vcmp.lt.s32.totalorder %v2865_v35, 4  ;;  %vm277_vm12 = vcmp.lt.s32.totalorder %v2865_v35, 3  ;;  %v283_v42 = vsel %vm275_vm10, %v2867_v38, %v2870_v48  ;;  %vm276_vm13 = vcmp.lt.s32.totalorder %v2865_v35, 2 }
  0x9b   :  { %v157_v31 = vadd.s32 %v156_v22, %v146_v62  ;;  %v179_v46 = vadd.s32 %v178_v30, %v168_v27  ;;  %v284_v50 = vsel %vm278_vm11, %v271_v24, 920167782  ;;  %v287_v55 = vsel %vm275_vm10, %v2870_v48, %v268_v6 }
  0x9c   :  { %v285_v53 = vsel %vm277_vm12, %v268_v6, %v284_v50  ;;  %v127_v56 = vsel %vm121_vm3, %v124_v32, %v126_v34  ;;  %v288_v59 = vsel %vm278_vm11, %v274_v40, 1326507024  ;;  %v292_v62 = vand.u32 65535, %v2818_v43 }
  0x9d   :  { %v2902_v52 = vadd.s32 %v157_v31, %v148_v0  ;;  %v180_v36 = vadd.s32 %v179_v46, %v170_v28  ;;  %v286_v58 = vsel %vm276_vm13, %v283_v42, %v285_v53  ;;  %v289_v61 = vsel %vm277_vm12, %v271_v24, %v288_v59 }
  0x9e   :  { %v316_v63 = vand.u32 65535, %v286_v58  ;;  %v290_v44 = vsel %vm276_vm13, %v287_v55, %v289_v61  ;;  %v293_v32 = vshrl.u32 %v2818_v43, 16  ;;  %v317_v34 = vshrl.u32 %v286_v58, 16 }
  0x9f   :  { %vm183_vm14 = vc.u32 %v2902_v52, %v2891_v29  ;;  %v184_v0 = vadd.s32 1, %v180_v36  ;;  %v181_v3 = vmul.u32 %v2806_v33, %v127_v56  ;;  %v294_v4 = vand.u32 65535, %v290_v44 }
  0xa0   :  { %v295_v5 = vshrl.u32 %v290_v44, 16  ;;  %v319_v8 = vmul.u32 %v317_v34, %v292_v62  ;;  %v320_v9 = vmul.u32 %v316_v63, %v293_v32  ;;  %v401_v13 = vand.u32 2139095040, %v2811_v39 }
  0xa1   :  { %v185_v7 = vsel %vm183_vm14, %v184_v0, %v180_v36  ;;  %v259_v49 = vshrl.u32 %v2712_v45, %v2834_v1  ;;  %v298_v19 = vmul.u32 %v294_v4, %v293_v32  ;;  %v280_v21 = vsel %vm278_vm11, %v268_v6, 2102212464 }
  0xa2   :  { %v186_v41 = vadd.s32 %v185_v7, %v181_v3  ;;  %v297_v14 = vmul.u32 %v295_v5, %v292_v62  ;;  %v318_v22 = vmul.u32 %v316_v63, %v292_v62  ;;  %v321_v23 = vmul.u32 %v317_v34, %v293_v32 }
  0xa3   :  { %v322_v24 = vshll.u32 %v319_v8, 16  ;;  %v296_v26 = vmul.u32 %v294_v4, %v292_v62  ;;  %v299_v27 = vmul.u32 %v295_v5, %v293_v32  ;;  %v302_v30 = vshll.u32 %v298_v19, 16 }
  0xa4   :  { %v187_v33 = vadd.s32 536870912, %v186_v41  ;;  %v300_v28 = vshll.u32 %v297_v14, 16  ;;  %v324_v31 = vshll.u32 %v320_v9, 16  ;;  %v398_v6 = vand.u32 2147483647, %v2811_v39 }
  0xa5   :  { %vm326_vm15 = vc.u32 %v318_v22, %v322_v24  ;;  %v328_v40 = vadd.s32 %v322_v24, %v318_v22  ;;  %v279_v56 = vsel %vm275_vm10, %v259_v49, %v2867_v38  ;;  %v281_v58 = vsel %vm277_vm12, %v2870_v48, %v280_v21 }
  0xa6   :  { %v188_v46 = vshrl.u32 %v187_v33, 30  ;;  %vm304_vm0 = vc.u32 %v296_v26, %v300_v28  ;;  %v306_v42 = vadd.s32 %v300_v28, %v296_v26  ;;  %v327_v1 = vsel %vm326_vm15, 1, %v2711_v2 }
  0xa7   :  { %v305_v50 = vsel %vm304_vm0, 1, %v2711_v2  ;;  %v329_v53 = vadd.s32 %v327_v1, %v321_v23  ;;  %vm330_vm1 = vc.u32 %v328_v40, %v324_v31  ;;  %v402_v62 = vshrl.u32 %v401_v13, 23 }
  0xa8   :  { %v189_v55 = vshll.u32 %v188_v46, 30  ;;  %v307_v36 = vadd.s32 %v305_v50, %v299_v27  ;;  %vm308_vm2 = vc.u32 %v306_v42, %v302_v30  ;;  %v331_v61 = vsel %vm330_vm1, 1, %v2711_v2 }
  0xa9   :  { %v309_v59 = vsel %vm308_vm2, 1, %v2711_v2  ;;  %v301_v0 = vshrl.u32 %v297_v14, 16  ;;  %v333_v32 = vadd.s32 %v331_v61, %v329_v53  ;;  %vm90_vm3 = vcmp.lt.s32.totalorder %v2789_v16, 0 }
  0xaa   :  { %v190_v63 = vsub.s32 %v186_v41, %v189_v55  ;;  %v311_v44 = vadd.s32 %v309_v59, %v307_v36  ;;  %v212_v34 = vsub.s32 4, %v188_v46  ;;  %v323_v3 = vshrl.u32 %v319_v8, 16 }
  0xab   :  { %v2630_v38 = vadd.s32 4294967169, %v402_v62  ;;  %v303_v5 = vshrl.u32 %v298_v19, 16  ;;  %v282_v48 = vsel %vm276_vm13, %v279_v56, %v281_v58  ;;  %v325_v49 = vshrl.u32 %v320_v9, 16 }
  0xac   :  { %vm191_vm4 = vcmp.lt.s32.totalorder %v190_v63, 0  ;;  %v192_v4 = vsub.s32 0, %v190_v63  ;;  %v312_v7 = vadd.s32 %v311_v44, %v301_v0  ;;  %v334_v21 = vadd.s32 %v333_v32, %v323_v3 }
  0xad   :  { %v408_v22 = vadd.s32 1, %v2630_v38  ;;  %v2946_v14 = vadd.s32 %v328_v40, %v324_v31  ;;  %v405_v23 = vand.u32 8388607, %v398_v6  ;;  %v213_v24 = vsel %vm90_vm3, %v212_v34, %v188_v46 }
  0xae   :  { %v193_v13 = vsel %vm191_vm4, %v192_v4, %v190_v63  ;;  %v2944_v41 = vadd.s32 %v312_v7, %v303_v5  ;;  %v335_v19 = vadd.s32 %v334_v21, %v325_v49  ;;  %v55_v35 = vmul.f32 %v2800_v25, %v2778_v11 }
  0xaf   :  { %v194_v8 = vclz %v193_v13  ;;  %vm409_vm5 = vcmp.gt.s32.totalorder %v408_v22, 0  ;;  %vm2956_vm6 = vcmp.le.f32.partialorder %v88_v18, 0.7853982  ;;  %v336_v30 = vmul.u32 %v2818_v43, %v282_v48  ;;  %v3102_v13 = vpop.permute.xlu0 %72 }
  0xb0   :  { %vm338_vm7 = vc.u32 %v2944_v41, %v2946_v14  ;;  %v339_v26 = vadd.s32 1, %v335_v19  ;;  %v410_v27 = vsel %vm409_vm5, %v408_v22, 0  ;;  %v215_v28 = vsel %vm2956_vm6, 0, %v213_v24 }
  0xb1   :  { %v2625_v33 = vadd.s32 4294967294, %v194_v8  ;;  %v406_v31 = vor.u32 8388608, %v405_v23  ;;  %v412_v40 = vand.u32 31, %v410_v27  ;;  %v2966_v18 = vadd.f32 %v2808_v37, %v55_v35 }
  0xb2   :  { %v340_v46 = vsel %vm338_vm7, %v339_v26, %v335_v19  ;;  %v182_v53 = vadd.s32 %v2891_v29, %v2902_v52  ;;  %v232_v36 = vadd.s32 3, %v215_v28  ;;  %v2970_v61 = vshrl.u32 %v410_v27, 5 }
  0xb3   :  { %vm2626_vm8 = vcmp.lt.s32.totalorder %v2625_v33, 0  ;;  %v341_v1 = vadd.s32 %v340_v46, %v336_v30  ;;  %v413_v50 = vsub.s32 32, %v412_v40  ;;  %v2972_v43 = vshll.u32 %v406_v31, 8 }
  0xb4   :  { %v197_v42 = vsel %vm2626_vm8, 0, %v2625_v33  ;;  %vm245_vm9 = vcmp.lt.s32.totalorder %v2792_v17, 0  ;;  %v415_v29 = vshll.u32 %v2712_v45, %v412_v40  ;;  %v418_v52 = vshll.u32 %v2713_v47, %v412_v40 }
  0xb5   :  { %v198_v55 = vsub.s32 32, %v197_v42  ;;  %v202_v56 = vsub.s32 4294967266, %v197_v42  ;;  %v199_v58 = vshll.u32 %v190_v63, %v197_v42  ;;  %v342_v59 = vadd.s32 536870912, %v341_v1 }
  0xb6   :  { %v416_v44 = vshrl.u32 %v2713_v47, %v413_v50  ;;  %v419_v32 = vshrl.u32 %v2714_v51, %v413_v50  ;;  %v422_v63 = vshrl.u32 %v2715_v54, %v413_v50  ;;  %v424_v4 = vshll.u32 %v2715_v54, %v412_v40 }
  0xb7   :  { %v200_v62 = vshrl.u32 %v182_v53, %v198_v55  ;;  %v203_v0 = vadd.s32 127, %v202_v56  ;;  %v343_v34 = vshrl.u32 %v342_v59, 30  ;;  %v425_v5 = vshrl.u32 %v2716_v57, %v413_v50 }
  0xb8   :  { %v421_v48 = vshll.u32 %v2714_v51, %v412_v40  ;;  %v428_v49 = vshrl.u32 %v2717_v60, %v413_v50  ;;  %v553_v21 = vand.u32 2147483647, %v2966_v18  ;;  %vm2987_vm10 = vcmp.le.f32.partialorder %v243_v20, 0.7853982 }
  0xb9   :  { %v201_v3 = vor.u32 %v200_v62, %v199_v58  ;;  %v204_v38 = vshll.u32 %v203_v0, 23  ;;  %v344_v7 = vshll.u32 %v343_v34, 30  ;;  %v2991_v23 = vor.u32 %v416_v44, %v415_v29 }
  0xba   :  { %v2993_v8 = vor.u32 %v419_v32, %v418_v52  ;;  %v426_v24 = vor.u32 %v425_v5, %v424_v4  ;;  %v2995_v19 = vand.u32 3, %v232_v36  ;;  %v423_v33 = vor.u32 %v422_v63, %v421_v48 }
  0xbb   :  { %v205_v22 = vor.u32 4788187, %v204_v38  ;;  %v2997_v35 = vsub.s32 %v341_v1, %v344_v7  ;;  %v427_v26 = vshll.u32 %v2716_v57, %v412_v40  ;;  %v208_v28 = vcvt.s32.f32 %v201_v3 }
  0xbc   :  { %v367_v30 = vsub.s32 4, %v343_v34  ;;  %vm430_vm11 = vcmp.lt.s32.totalorder %v2970_v61, 1  ;;  %vm433_vm13 = vcmp.lt.s32.totalorder %v2970_v61, 4  ;;  %vm432_vm14 = vcmp.lt.s32.totalorder %v2970_v61, 3 }
  0xbd   :  { %v206_v27 = vand.u32 2147483647, %v205_v22  ;;  %vm346_vm12 = vcmp.lt.s32.totalorder %v2997_v35, 0  ;;  %v347_v20 = vsub.s32 0, %v2997_v35  ;;  %v429_v31 = vor.u32 %v428_v49, %v427_v26 }
  0xbe   :  { %v438_v40 = vsel %vm430_vm11, %v2991_v23, %v2993_v8  ;;  %v439_v42 = vsel %vm433_vm13, %v426_v24, 920167782  ;;  %vm431_vm15 = vcmp.lt.s32.totalorder %v2970_v61, 2  ;;  %v447_v55 = vand.u32 65535, %v2972_v43 }
  0xbf   :  { %v209_v46 = vmul.f32 %v208_v28, %v206_v27  ;;  %v348_v1 = vsel %vm346_vm12, %v347_v20, %v2997_v35  ;;  %v440_v53 = vsel %vm432_vm14, %v423_v33, %v439_v42  ;;  %v368_v58 = vsel %vm245_vm9, %v367_v30, %v343_v34 }
  0xc0   :  { %v349_v36 = vclz %v348_v1  ;;  %v3020_v59 = vsel %vm431_vm15, %v438_v40, %v440_v53  ;;  %v337_v62 = vadd.s32 %v2946_v14, %v2944_v41  ;;  %v442_v0 = vsel %vm430_vm11, %v2993_v8, %v423_v33 }
  0xc1   :  { %v210_v56 = vxor.u32 2147483648, %v209_v46  ;;  %v448_v44 = vshrl.u32 %v2972_v43, 16  ;;  %v556_v32 = vand.u32 2139095040, %v2966_v18  ;;  %v3032_v34 = vshrl.u32 %v2712_v45, %v413_v50 }
  0xc2   :  { %v2628_v52 = vadd.s32 4294967294, %v349_v36  ;;  %v443_v63 = vsel %vm433_vm13, %v429_v31, 1326507024  ;;  %v370_v14 = vsel %vm2987_vm10, 0, %v368_v58  ;;  %v471_v38 = vand.u32 65535, %v3020_v59 }
  0xc3   :  { %v211_v29 = vsel %vm90_vm3, %v210_v56, %v209_v46  ;;  %v444_v3 = vsel %vm432_vm14, %v426_v24, %v443_v63  ;;  %v472_v5 = vshrl.u32 %v3020_v59, 16  ;;  %v3053_v7 = vsel %vm433_vm13, %v423_v33, 2102212464 }
  0xc4   :  { %v3039_v41 = vsel %vm2956_vm6, %v2789_v16, %v211_v29  ;;  %vm2629_vm0 = vcmp.lt.s32.totalorder %v2628_v52, 0  ;;  %v445_v4 = vsel %vm431_vm15, %v442_v0, %v444_v3  ;;  %v3055_v27 = vadd.s32 3, %v370_v14 }
  0xc5   :  { %v216_v50 = vmul.f32 %v3039_v41, %v3039_v41  ;;  %v352_v9 = vsel %vm2629_vm0, 0, %v2628_v52  ;;  %v449_v48 = vand.u32 65535, %v445_v4  ;;  %v450_v49 = vshrl.u32 %v445_v4, 16 }
  0xc6   :  { %v353_v26 = vsub.s32 32, %v352_v9  ;;  %v357_v28 = vsub.s32 4294967266, %v352_v9  ;;  %v473_v31 = vmul.u32 %v471_v38, %v447_v55  ;;  %v3057_v1 = vmul.u32 %v472_v5, %v447_v55 }
  0xc7   :  { %v217_v22 = vmul.f32 -0.001358992, %v216_v50  ;;  %v224_v24 = vmul.f32 -0.00019511016, %v216_v50  ;;  %v452_v30 = vmul.u32 %v450_v49, %v447_v55  ;;  %v453_v20 = vmul.u32 %v449_v48, %v448_v44 }
  0xc8   :  { %v355_v42 = vshrl.u32 %v337_v62, %v353_v26  ;;  %v354_v53 = vshll.u32 %v2997_v35, %v352_v9  ;;  %v358_v33 = vadd.s32 127, %v357_v28  ;;  %v451_v56 = vmul.u32 %v449_v48, %v447_v55 }
  0xc9   :  { %v218_v46 = vadd.f32 0.041655596, %v217_v22  ;;  %v225_v40 = vadd.f32 0.008332121, %v224_v24  ;;  %v455_v36 = vshll.u32 %v452_v30, 16  ;;  %v454_v0 = vmul.u32 %v450_v49, %v448_v44 }
  0xca   :  { %v457_v29 = vshll.u32 %v453_v20, 16  ;;  %v356_v52 = vor.u32 %v355_v42, %v354_v53  ;;  %v359_v63 = vshll.u32 %v358_v33, 23  ;;  %v475_v62 = vmul.u32 %v471_v38, %v448_v44 }
  0xcb   :  { %v219_v58 = vmul.f32 %v218_v46, %v216_v50  ;;  %v226_v59 = vmul.f32 %v225_v40, %v216_v50  ;;  %vm459_vm1 = vc.u32 %v451_v56, %v455_v36  ;;  %v461_v14 = vadd.s32 %v455_v36, %v451_v56 }
  0xcc   :  { %v460_v22 = vsel %vm459_vm1, 1, %v2711_v2  ;;  %vm235_vm2 = vcmp.eq.s32.totalorder %v2995_v19, 0  ;;  %vm238_vm3 = vcmp.eq.s32.totalorder %v2995_v19, 2  ;;  %v360_v35 = vor.u32 4788187, %v359_v63 }
  0xcd   :  { %v220_v3 = vadd.f32 -0.4999988, %v219_v58  ;;  %v227_v4 = vadd.f32 -0.16666654, %v226_v59  ;;  %v456_v55 = vshrl.u32 %v452_v30, 16  ;;  %v462_v9 = vadd.s32 %v460_v22, %v454_v0 }
  0xce   :  { %vm463_vm4 = vc.u32 %v461_v14, %v457_v29  ;;  %vm234_vm5 = vcmp.lt.s32.totalorder %v2995_v19, 2  ;;  %v477_v26 = vshll.u32 %v3057_v1, 16  ;;  %vm231_vm6 = vweird.f32 %v2789_v16 }
  0xcf   :  { %v221_v48 = vmul.f32 %v220_v3, %v216_v50  ;;  %v228_v49 = vmul.f32 %v227_v4, %v216_v50  ;;  %v464_v24 = vsel %vm463_vm4, 1, %v2711_v2  ;;  %v361_v28 = vand.u32 2147483647, %v360_v35 }
  0xd0   :  { %v363_v38 = vcvt.s32.f32 %v356_v52  ;;  %v466_v46 = vadd.s32 %v464_v24, %v462_v9  ;;  %v476_v40 = vmul.u32 %v472_v5, %v448_v44  ;;  %v479_v33 = vshll.u32 %v475_v62, 16 }
  0xd1   :  { %v222_v42 = vadd.f32 1.0, %v221_v48  ;;  %v229_v53 = vadd.f32 1.0, %v228_v49  ;;  %vm481_vm7 = vc.u32 %v473_v31, %v477_v26  ;;  %v483_v36 = vadd.s32 %v477_v26, %v473_v31 }
  0xd2   :  { %v364_v30 = vmul.f32 %v363_v38, %v361_v28  ;;  %v467_v56 = vadd.s32 %v466_v46, %v456_v55  ;;  %v482_v50 = vsel %vm481_vm7, 1, %v2711_v2  ;;  %v557_v29 = vshrl.u32 %v556_v32, 23 }
  0xd3   :  { %v230_v58 = vmul.f32 %v229_v53, %v3039_v41  ;;  %v239_v59 = vxor.u32 2147483648, %v222_v42  ;;  %v484_v0 = vadd.s32 %v482_v50, %v476_v40  ;;  %v434_v44 = vsel %vm430_vm11, %v3032_v34, %v2991_v23 }
  0xd4   :  { %v365_v63 = vxor.u32 2147483648, %v364_v30  ;;  %v458_v5 = vshrl.u32 %v453_v20, 16  ;;  %vm485_vm8 = vc.u32 %v483_v36, %v479_v33  ;;  %v436_v31 = vsel %vm432_vm14, %v2993_v8, %v3053_v7  ;;  %v3092_v20 = vpop.permute.xlu1 %44 }
  0xd5   :  { %v236_v52 = vxor.u32 2147483648, %v230_v58  ;;  %v486_v41 = vsel %vm485_vm8, 1, %v2711_v2  ;;  %v2633_v14 = vadd.s32 4294967169, %v557_v29  ;;  %v478_v4 = vshrl.u32 %v3057_v1, 16 }
  0xd6   :  { %v366_v32 = vsel %vm245_vm9, %v365_v63, %v364_v30  ;;  %v3082_v3 = vadd.s32 %v467_v56, %v458_v5  ;;  %v488_v22 = vadd.s32 %v486_v41, %v484_v0  ;;  %v240_v34 = vsel %vm238_vm3, %v239_v59, %v230_v58 }
  0xd7   :  { %v237_v23 = vsel %vm235_vm2, %v222_v42, %v236_v52  ;;  %v369_v8 = vsel %vm2987_vm10, %v2792_v17, %v366_v32  ;;  %v563_v7 = vadd.s32 1, %v2633_v14  ;;  %v480_v9 = vshrl.u32 %v475_v62, 16 }
  0xd8   :  { %v241_v35 = vsel %vm234_vm5, %v237_v23, %v240_v34  ;;  %v371_v55 = vmul.f32 %v369_v8, %v369_v8  ;;  %v489_v1 = vadd.s32 %v488_v22, %v478_v4  ;;  %v437_v49 = vsel %vm431_vm15, %v434_v44, %v436_v31 }
  0xd9   :  { %v242_v48 = vsel %vm231_vm6, nan, %v241_v35  ;;  %v3100_v24 = vadd.s32 %v483_v36, %v479_v33  ;;  %vm564_vm9 = vcmp.gt.s32.totalorder %v563_v7, 0  ;;  %v56_v19 = vmul.f32 %v3092_v20, %v2776_v10 }
  0xda   :  { %v372_v26 = vmul.f32 -0.001358992, %v371_v55  ;;  %v379_v28 = vmul.f32 -0.00019511016, %v371_v55  ;;  %v490_v38 = vadd.s32 %v489_v1, %v480_v9  ;;  %v565_v46 = vsel %vm564_vm9, %v563_v7, 0  ;;  %1328 = vst [vmem:[#allocation2] sm:$0xff] %v242_v48 }
  0xdb   :  { %vm493_vm10 = vc.u32 %v3082_v3, %v3100_v24  ;;  %v567_v16 = vand.u32 31, %v565_v46  ;;  %v57_v61 = vmul.f32 %v3092_v20, %v2778_v11  ;;  %v3111_v53 = vadd.f32 %v3102_v13, %v56_v19 }
  0xdc   :  { %v373_v62 = vadd.f32 0.041655596, %v372_v26  ;;  %v380_v40 = vadd.f32 0.008332121, %v379_v28  ;;  %v494_v42 = vadd.s32 1, %v490_v38  ;;  %v491_v33 = vmul.u32 %v2972_v43, %v437_v49 }
  0xdd   :  { %v560_v30 = vand.u32 8388607, %v553_v21  ;;  %v3116_v56 = vsub.s32 32, %v567_v16  ;;  %v388_v58 = vand.u32 3, %v3055_v27  ;;  %v3119_v29 = vshrl.u32 %v565_v46, 5 }
  0xde   :  { %v374_v50 = vmul.f32 %v373_v62, %v371_v55  ;;  %v381_v36 = vmul.f32 %v380_v40, %v371_v55  ;;  %v495_v59 = vsel %vm493_vm10, %v494_v42, %v490_v38  ;;  %v570_v52 = vshll.u32 %v2712_v45, %v567_v16 }
  0xdf   :  { %v496_v0 = vadd.s32 %v495_v59, %v491_v33  ;;  %v571_v63 = vshrl.u32 %v2713_v47, %v3116_v56  ;;  %v574_v44 = vshrl.u32 %v2714_v51, %v3116_v56  ;;  %v580_v31 = vshrl.u32 %v2716_v57, %v3116_v56 }
  0xe0   :  { %v375_v43 = vadd.f32 -0.4999988, %v374_v50  ;;  %v382_v5 = vadd.f32 -0.16666654, %v381_v36  ;;  %v573_v27 = vshll.u32 %v2713_v47, %v567_v16  ;;  %v577_v14 = vshrl.u32 %v2715_v54, %v3116_v56 }
  0xe1   :  { %v497_v41 = vadd.s32 536870912, %v496_v0  ;;  %v579_v32 = vshll.u32 %v2715_v54, %v567_v16  ;;  %vm389_vm11 = vcmp.lt.s32.totalorder %v388_v58, 2  ;;  %v572_v23 = vor.u32 %v571_v63, %v570_v52 }
  0xe2   :  { %v376_v4 = vmul.f32 %v375_v43, %v371_v55  ;;  %v383_v22 = vmul.f32 %v382_v5, %v371_v55  ;;  %v576_v34 = vshll.u32 %v2714_v51, %v567_v16  ;;  %vm386_vm12 = vweird.f32 %v2792_v17 }
  0xe3   :  { %v3134_v7 = vshrl.u32 %v497_v41, 30  ;;  %v3136_v35 = vor.u32 %v574_v44, %v573_v27  ;;  %v581_v9 = vor.u32 %v580_v31, %v579_v32  ;;  %v583_v1 = vshrl.u32 %v2717_v60, %v3116_v56 }
  0xe4   :  { %v377_v48 = vadd.f32 1.0, %v376_v4  ;;  %v384_v49 = vadd.f32 1.0, %v383_v22  ;;  %v561_v26 = vor.u32 8388608, %v560_v30  ;;  %v582_v28 = vshll.u32 %v2716_v57, %v567_v16 }
  0xe5   :  { %vm390_vm13 = vcmp.eq.s32.totalorder %v388_v58, 0  ;;  %v499_v55 = vshll.u32 %v3134_v7, 30  ;;  %v578_v38 = vor.u32 %v577_v14, %v576_v34  ;;  %vm585_vm14 = vcmp.lt.s32.totalorder %v3119_v29, 1 }
  0xe6   :  { %v385_v46 = vmul.f32 %v384_v49, %v369_v8  ;;  %v394_v19 = vxor.u32 2147483648, %v377_v48  ;;  %v584_v62 = vor.u32 %v583_v1, %v582_v28  ;;  %vm588_vm15 = vcmp.lt.s32.totalorder %v3119_v29, 4 }
  0xe7   :  { %vm393_vm0 = vcmp.eq.s32.totalorder %v388_v58, 2  ;;  %v500_v40 = vsub.s32 %v496_v0, %v499_v55  ;;  %v593_v42 = vsel %vm585_vm14, %v572_v23, %v3136_v35  ;;  %v594_v16 = vsel %vm588_vm15, %v581_v9, 920167782 }
  0xe8   :  { %v391_v33 = vxor.u32 2147483648, %v385_v46  ;;  %vm586_vm1 = vcmp.lt.s32.totalorder %v3119_v29, 2  ;;  %vm587_vm2 = vcmp.lt.s32.totalorder %v3119_v29, 3  ;;  %v3151_v30 = vshll.u32 %v561_v26, 8 }
  0xe9   :  { %v395_v8 = vsel %vm393_vm0, %v394_v19, %v385_v46  ;;  %vm501_vm3 = vcmp.lt.s32.totalorder %v500_v40, 0  ;;  %v502_v50 = vsub.s32 0, %v500_v40  ;;  %v595_v36 = vsel %vm587_vm2, %v578_v38, %v594_v16 }
  0xea   :  { %v392_v59 = vsel %vm390_vm13, %v377_v48, %v391_v33  ;;  %v596_v0 = vsel %vm586_vm1, %v593_v42, %v595_v36  ;;  %v597_v63 = vsel %vm585_vm14, %v3136_v35, %v578_v38  ;;  %v598_v44 = vsel %vm588_vm15, %v584_v62, 1326507024 }
  0xeb   :  { %v3164_v43 = vadd.f32 %v3102_v13, %v57_v61  ;;  %v396_v5 = vsel %vm389_vm11, %v392_v59, %v395_v8  ;;  %v503_v52 = vsel %vm501_vm3, %v502_v50, %v500_v40  ;;  %v599_v31 = vsel %vm587_vm2, %v581_v9, %v598_v44 }
  0xec   :  { %v397_v41 = vsel %vm386_vm12, nan, %v396_v5  ;;  %v492_v27 = vadd.s32 %v3100_v24, %v3082_v3  ;;  %v504_v14 = vclz %v503_v52  ;;  %v600_v32 = vsel %vm586_vm1, %v597_v63, %v599_v31 }
  0xed   :  { %v569_v61 = vshrl.u32 %v2712_v45, %v3116_v56  ;;  %v603_v58 = vshrl.u32 %v3151_v30, 16  ;;  %v604_v4 = vand.u32 65535, %v600_v32  ;;  %v626_v22 = vand.u32 65535, %v596_v0  ;;  %1329 = vst [vmem:[#allocation2 + $0x8] sm:$0xff] %v397_v41 }
  0xee   :  { %vm400_vm4 = vcmp.lt.s32.totalorder %v2811_v39, 0  ;;  %v2631_v34 = vadd.s32 4294967294, %v504_v14  ;;  %v602_v17 = vand.u32 65535, %v3151_v30  ;;  %v605_v9 = vshrl.u32 %v600_v32, 16 }
  0xef   :  { %v627_v1 = vshrl.u32 %v596_v0, 16  ;;  %v522_v3 = vsub.s32 4, %v3134_v7  ;;  %v589_v24 = vsel %vm585_vm14, %v569_v61, %v572_v23  ;;  %v608_v48 = vmul.u32 %v604_v4, %v603_v58 }
  0xf0   :  { %v708_v56 = vand.u32 2147483647, %v3111_v53  ;;  %vm2632_vm5 = vcmp.lt.s32.totalorder %v2631_v34, 0  ;;  %v590_v49 = vsel %vm588_vm15, %v578_v38, 2102212464  ;;  %v607_v26 = vmul.u32 %v605_v9, %v602_v17 }
  0xf1   :  { %v629_v28 = vmul.u32 %v627_v1, %v602_v17  ;;  %v507_v55 = vsel %vm2632_vm5, 0, %v2631_v34  ;;  %v606_v46 = vmul.u32 %v604_v4, %v602_v17  ;;  %v628_v19 = vmul.u32 %v626_v22, %v602_v17 }
  0xf2   :  { %v630_v62 = vmul.u32 %v626_v22, %v603_v58  ;;  %v508_v42 = vsub.s32 32, %v507_v55  ;;  %v512_v16 = vsub.s32 4294967266, %v507_v55  ;;  %v609_v33 = vmul.u32 %v605_v9, %v603_v58 }
  0xf3   :  { %v610_v8 = vshll.u32 %v607_v26, 16  ;;  %v509_v50 = vshll.u32 %v500_v40, %v507_v55  ;;  %v612_v36 = vshll.u32 %v608_v48, 16  ;;  %v631_v23 = vmul.u32 %v627_v1, %v603_v58 }
  0xf4   :  { %v632_v59 = vshll.u32 %v629_v28, 16  ;;  %v510_v0 = vshrl.u32 %v492_v27, %v508_v42  ;;  %v513_v63 = vadd.s32 127, %v512_v16  ;;  %v634_v5 = vshll.u32 %v630_v62, 16 }
  0xf5   :  { %vm614_vm6 = vc.u32 %v606_v46, %v610_v8  ;;  %v616_v44 = vadd.s32 %v610_v8, %v606_v46  ;;  %v523_v40 = vsel %vm400_vm4, %v522_v3, %v3134_v7  ;;  %v611_v58 = vshrl.u32 %v607_v26, 16 }
  0xf6   :  { %v615_v38 = vsel %vm614_vm6, 1, %v2711_v2  ;;  %vm636_vm7 = vc.u32 %v628_v19, %v632_v59  ;;  %v638_v52 = vadd.s32 %v632_v59, %v628_v19  ;;  %v511_v31 = vor.u32 %v510_v0, %v509_v50 }
  0xf7   :  { %v514_v41 = vshll.u32 %v513_v63, 23  ;;  %v617_v14 = vadd.s32 %v615_v38, %v609_v33  ;;  %vm618_vm8 = vc.u32 %v616_v44, %v612_v36  ;;  %v637_v27 = vsel %vm636_vm7, 1, %v2711_v2 }
  0xf8   :  { %v619_v32 = vsel %vm618_vm8, 1, %v2711_v2  ;;  %vm640_vm9 = vc.u32 %v638_v52, %v634_v5  ;;  %v639_v22 = vadd.s32 %v637_v27, %v631_v23  ;;  %v613_v34 = vshrl.u32 %v608_v48, 16 }
  0xf9   :  { %v515_v61 = vor.u32 4788187, %v514_v41  ;;  %v621_v4 = vadd.s32 %v619_v32, %v617_v14  ;;  %v633_v17 = vshrl.u32 %v629_v28, 16  ;;  %v641_v9 = vsel %vm640_vm9, 1, %v2711_v2 }
  0xfa   :  { %v711_v1 = vand.u32 2139095040, %v3111_v53  ;;  %v518_v46 = vcvt.s32.f32 %v511_v31  ;;  %v643_v42 = vadd.s32 %v641_v9, %v639_v22  ;;  %v591_v7 = vsel %vm587_vm2, %v3136_v35, %v590_v49 }
  0xfb   :  { %v516_v55 = vand.u32 2147483647, %v515_v61  ;;  %v622_v19 = vadd.s32 %v621_v4, %v611_v58  ;;  %v635_v3 = vshrl.u32 %v630_v62, 16  ;;  %v715_v26 = vand.u32 8388607, %v708_v56 }
  0xfc   :  { %v712_v16 = vshrl.u32 %v711_v1, 23  ;;  %v644_v28 = vadd.s32 %v643_v42, %v633_v17  ;;  %v866_v8 = vand.u32 2139095040, %v3164_v43  ;;  %vm399_vm10 = vcmp.le.f32.partialorder %v398_v6, 0.7853982 }
  0xfd   :  { %v519_v33 = vmul.f32 %v518_v46, %v516_v55  ;;  %v623_v48 = vadd.s32 %v622_v19, %v613_v34  ;;  %v642_v50 = vadd.s32 %v638_v52, %v634_v5  ;;  %v525_v59 = vsel %vm399_vm10, 0, %v523_v40 }
  0xfe   :  { %v2636_v36 = vadd.s32 4294967169, %v712_v16  ;;  %v592_v35 = vsel %vm586_vm1, %v589_v24, %v591_v7  ;;  %v645_v49 = vadd.s32 %v644_v28, %v635_v3  ;;  %v716_v62 = vor.u32 8388608, %v715_v26 }
  0xff   :  { %v520_v23 = vxor.u32 2147483648, %v519_v33  ;;  %vm648_vm11 = vc.u32 %v623_v48, %v642_v50  ;;  %v867_v38 = vshrl.u32 %v866_v8, 23  ;;  %v542_v41 = vadd.s32 3, %v525_v59 }
 0x100   :  { %v718_v0 = vadd.s32 1, %v2636_v36  ;;  %v649_v44 = vadd.s32 1, %v645_v49  ;;  %v646_v6 = vmul.u32 %v3151_v30, %v592_v35  ;;  %v3208_v40 = vshll.u32 %v716_v62, 8 }
 0x101   :  { %v521_v63 = vsel %vm400_vm4, %v520_v23, %v519_v33  ;;  %v2639_v61 = vadd.s32 4294967169, %v867_v38  ;;  %v3210_v58 = vand.u32 3, %v542_v41  ;;  %vm555_vm13 = vcmp.lt.s32.totalorder %v2966_v18, 0 }
 0x102   :  { %v524_v31 = vsel %vm399_vm10, %v2811_v39, %v521_v63  ;;  %vm719_vm12 = vcmp.gt.s32.totalorder %v718_v0, 0  ;;  %v650_v52 = vsel %vm648_vm11, %v649_v44, %v645_v49  ;;  %v3213_v30 = vadd.s32 %v642_v50, %v623_v48 }
 0x103   :  { %v526_v5 = vmul.f32 %v524_v31, %v524_v31  ;;  %v720_v14 = vsel %vm719_vm12, %v718_v0, 0  ;;  %v651_v29 = vadd.s32 %v650_v52, %v646_v6  ;;  %v3216_v1 = vand.u32 65535, %v3208_v40 }
 0x104   :  { %v722_v24 = vand.u32 31, %v720_v14  ;;  %v3219_v55 = vshrl.u32 %v3208_v40, 16  ;;  %v3221_v42 = vshrl.u32 %v720_v14, 5  ;;  %v3223_v7 = vadd.s32 1, %v2639_v61 }
 0x105   :  { %v527_v32 = vmul.f32 -0.001358992, %v526_v5  ;;  %v534_v27 = vmul.f32 -0.00019511016, %v526_v5  ;;  %v652_v4 = vadd.s32 536870912, %v651_v29  ;;  %vm548_vm14 = vcmp.eq.s32.totalorder %v3210_v58, 2 }
 0x106   :  { %v723_v17 = vsub.s32 32, %v722_v24  ;;  %v725_v16 = vshll.u32 %v2712_v45, %v722_v24  ;;  %v728_v26 = vshll.u32 %v2713_v47, %v722_v24  ;;  %v731_v33 = vshll.u32 %v2714_v51, %v722_v24 }
 0x107   :  { %v528_v22 = vadd.f32 0.041655596, %v527_v32  ;;  %v535_v34 = vadd.f32 0.008332121, %v534_v27  ;;  %v653_v9 = vshrl.u32 %v652_v4, 30  ;;  %vm545_vm15 = vcmp.eq.s32.totalorder %v3210_v58, 0 }
 0x108   :  { %v726_v8 = vshrl.u32 %v2713_v47, %v723_v17  ;;  %v732_v50 = vshrl.u32 %v2715_v54, %v723_v17  ;;  %v729_v23 = vshrl.u32 %v2714_v51, %v723_v17  ;;  %v735_v59 = vshrl.u32 %v2716_v57, %v723_v17 }
 0x109   :  { %v529_v46 = vmul.f32 %v528_v22, %v526_v5  ;;  %v536_v19 = vmul.f32 %v535_v34, %v526_v5  ;;  %v654_v3 = vshll.u32 %v653_v9, 30  ;;  %v738_v35 = vshrl.u32 %v2717_v60, %v723_v17 }
 0x10a   :  { %vm544_vm0 = vcmp.lt.s32.totalorder %v3210_v58, 2  ;;  %v677_v0 = vsub.s32 4, %v653_v9  ;;  %v734_v63 = vshll.u32 %v2715_v54, %v722_v24  ;;  %vm541_vm1 = vweird.f32 %v2811_v39 }
 0x10b   :  { %v530_v48 = vadd.f32 -0.4999988, %v529_v46  ;;  %v537_v28 = vadd.f32 -0.16666654, %v536_v19  ;;  %v3232_v36 = vsub.s32 %v651_v29, %v654_v3  ;;  %v724_v38 = vshrl.u32 %v2712_v45, %v723_v17 }
 0x10c   :  { %v737_v41 = vshll.u32 %v2716_v57, %v722_v24  ;;  %v727_v14 = vor.u32 %v726_v8, %v725_v16  ;;  %v733_v29 = vor.u32 %v732_v50, %v731_v33  ;;  %v730_v32 = vor.u32 %v729_v23, %v728_v26 }
 0x10d   :  { %v531_v49 = vmul.f32 %v530_v48, %v526_v5  ;;  %v538_v62 = vmul.f32 %v537_v28, %v526_v5  ;;  %vm656_vm2 = vcmp.lt.s32.totalorder %v3232_v36, 0  ;;  %v657_v44 = vsub.s32 0, %v3232_v36 }
 0x10e   :  { %v736_v27 = vor.u32 %v735_v59, %v734_v63  ;;  %v739_v61 = vor.u32 %v738_v35, %v737_v41  ;;  %vm3247_vm3 = vcmp.le.f32.partialorder %v553_v21, 0.7853982  ;;  %v3253_v24 = vsel %vm555_vm13, %v677_v0, %v653_v9 }
 0x10f   :  { %v532_v6 = vadd.f32 1.0, %v531_v49  ;;  %v539_v52 = vadd.f32 1.0, %v538_v62  ;;  %v658_v5 = vsel %vm656_vm2, %v657_v44, %v3232_v36  ;;  %vm740_vm4 = vcmp.lt.s32.totalorder %v3221_v42, 1 }
 0x110   :  { %v659_v17 = vclz %v658_v5  ;;  %vm741_vm5 = vcmp.lt.s32.totalorder %v3221_v42, 2  ;;  %vm742_vm6 = vcmp.lt.s32.totalorder %v3221_v42, 3  ;;  %vm743_vm7 = vcmp.lt.s32.totalorder %v3221_v42, 4 }
 0x111   :  { %v540_v4 = vmul.f32 %v539_v52, %v524_v31  ;;  %v549_v22 = vxor.u32 2147483648, %v532_v6  ;;  %v745_v19 = vsel %vm743_vm7, %v733_v29, 2102212464  ;;  %v748_v3 = vsel %vm740_vm4, %v727_v14, %v730_v32 }
 0x112   :  { %v2634_v46 = vadd.s32 4294967294, %v659_v17  ;;  %v749_v16 = vsel %vm743_vm7, %v736_v27, 920167782  ;;  %v752_v9 = vsel %vm740_vm4, %v730_v32, %v733_v29  ;;  %v753_v26 = vsel %vm743_vm7, %v739_v61, 1326507024 }
 0x113   :  { %v546_v31 = vxor.u32 2147483648, %v540_v4  ;;  %v550_v21 = vsel %vm548_vm14, %v549_v22, %v540_v4  ;;  %v750_v48 = vsel %vm742_vm6, %v733_v29, %v749_v16  ;;  %v754_v28 = vsel %vm742_vm6, %v736_v27, %v753_v26 }
 0x114   :  { %vm2635_vm8 = vcmp.lt.s32.totalorder %v2634_v46, 0  ;;  %v751_v23 = vsel %vm741_vm5, %v748_v3, %v750_v48  ;;  %v755_v59 = vsel %vm741_vm5, %v752_v9, %v754_v28  ;;  %v744_v0 = vsel %vm740_vm4, %v724_v38, %v727_v14 }
 0x115   :  { %v547_v33 = vsel %vm545_vm15, %v532_v6, %v546_v31  ;;  %v662_v50 = vsel %vm2635_vm8, 0, %v2634_v46  ;;  %v746_v63 = vsel %vm742_vm6, %v730_v32, %v745_v19  ;;  %v759_v58 = vand.u32 65535, %v755_v59 }
 0x116   :  { %v551_v8 = vsel %vm544_vm0, %v547_v33, %v550_v21  ;;  %v663_v49 = vsub.s32 32, %v662_v50  ;;  %v667_v62 = vsub.s32 4294967266, %v662_v50  ;;  %v760_v44 = vshrl.u32 %v755_v59, 16 }
 0x117   :  { %v552_v35 = vsel %vm541_vm1, nan, %v551_v8  ;;  %v782_v41 = vshrl.u32 %v751_v23, 16  ;;  %v664_v6 = vshll.u32 %v3232_v36, %v662_v50  ;;  %v781_v5 = vand.u32 65535, %v751_v23 }
 0x118   :  { %1330 = vst [vmem:[#allocation2 + $0x10] sm:$0xff] %v552_v35  ;;  %v665_v52 = vshrl.u32 %v3213_v30, %v663_v49  ;;  %v668_v29 = vadd.s32 127, %v667_v62  ;;  %v680_v39 = vsel %vm3247_vm3, 0, %v3253_v24  ;;  %v762_v27 = vmul.u32 %v760_v44, %v3216_v1 }
 0x119   :  { %v763_v38 = vmul.u32 %v759_v58, %v3219_v55  ;;  %v863_v14 = vand.u32 2147483647, %v3164_v43  ;;  %v3293_v4 = vsel %vm741_vm5, %v744_v0, %v746_v63  ;;  %v784_v30 = vmul.u32 %v782_v41, %v3216_v1 }
 0x11a   :  { %v666_v32 = vor.u32 %v665_v52, %v664_v6  ;;  %v669_v61 = vshll.u32 %v668_v29, 23  ;;  %v761_v36 = vmul.u32 %v759_v58, %v3216_v1  ;;  %v764_v22 = vmul.u32 %v760_v44, %v3219_v55 }
 0x11b   :  { %v765_v17 = vshll.u32 %v762_v27, 16  ;;  %vm874_vm9 = vcmp.gt.s32.totalorder %v3223_v7, 0  ;;  %v767_v31 = vshll.u32 %v763_v38, 16  ;;  %v783_v21 = vmul.u32 %v781_v5, %v3216_v1 }
 0x11c   :  { %v670_v24 = vor.u32 4788187, %v669_v61  ;;  %v785_v46 = vmul.u32 %v781_v5, %v3219_v55  ;;  %v673_v19 = vcvt.s32.f32 %v666_v32  ;;  %v787_v3 = vshll.u32 %v784_v30, 16 }
 0x11d   :  { %vm769_vm10 = vc.u32 %v761_v36, %v765_v17  ;;  %v771_v42 = vadd.s32 %v765_v17, %v761_v36  ;;  %v786_v26 = vmul.u32 %v782_v41, %v3219_v55  ;;  %v875_v23 = vsel %vm874_vm9, %v3223_v7, 0 }
 0x11e   :  { %v671_v16 = vand.u32 2147483647, %v670_v24  ;;  %v770_v9 = vsel %vm769_vm10, 1, %v2711_v2  ;;  %v789_v33 = vshll.u32 %v785_v46, 16  ;;  %vm791_vm12 = vc.u32 %v783_v21, %v787_v3 }
 0x11f   :  { %v772_v48 = vadd.s32 %v770_v9, %v764_v22  ;;  %vm773_vm11 = vc.u32 %v771_v42, %v767_v31  ;;  %v793_v28 = vadd.s32 %v787_v3, %v783_v21  ;;  %v792_v1 = vsel %vm791_vm12, 1, %v2711_v2 }
 0x120   :  { %v674_v8 = vmul.f32 %v673_v19, %v671_v16  ;;  %v774_v50 = vsel %vm773_vm11, 1, %v2711_v2  ;;  %v766_v59 = vshrl.u32 %v762_v27, 16  ;;  %v794_v49 = vadd.s32 %v792_v1, %v786_v26 }
 0x121   :  { %v776_v35 = vadd.s32 %v774_v50, %v772_v48  ;;  %vm795_vm14 = vc.u32 %v793_v28, %v789_v33  ;;  %v3311_v0 = vand.u32 8388607, %v863_v14  ;;  %v877_v63 = vand.u32 31, %v875_v23 }
 0x122   :  { %v675_v62 = vxor.u32 2147483648, %v674_v8  ;;  %v796_v55 = vsel %vm795_vm14, 1, %v2711_v2  ;;  %v768_v58 = vshrl.u32 %v763_v38, 16  ;;  %v788_v41 = vshrl.u32 %v784_v30, 16  ;;  %v3326_v30 = vpop.permute.xlu1 %49 }
 0x123   :  { %v777_v44 = vadd.s32 %v776_v35, %v766_v59  ;;  %v798_v6 = vadd.s32 %v796_v55, %v794_v49  ;;  %v697_v7 = vadd.s32 3, %v680_v39  ;;  %v801_v29 = vmul.u32 %v3208_v40, %v3293_v4 }
 0x124   :  { %v676_v52 = vsel %vm555_vm13, %v675_v62, %v674_v8  ;;  %v3317_v5 = vsub.s32 32, %v877_v63  ;;  %v790_v38 = vshrl.u32 %v785_v46, 16  ;;  %v3330_v39 = vadd.s32 %v793_v28, %v789_v33 }
 0x125   :  { %v3322_v27 = vsel %vm3247_vm3, %v2966_v18, %v676_v52  ;;  %v3324_v32 = vadd.s32 %v777_v44, %v768_v58  ;;  %v799_v61 = vadd.s32 %v798_v6, %v788_v41  ;;  %v3332_v22 = vshrl.u32 %v875_v23, 5 }
 0x126   :  { %v681_v36 = vmul.f32 %v3322_v27, %v3322_v27  ;;  %v880_v40 = vshll.u32 %v2712_v45, %v877_v63  ;;  %v883_v34 = vshll.u32 %v2713_v47, %v877_v63  ;;  %v884_v17 = vshrl.u32 %v2714_v51, %v3317_v5 }
 0x127   :  { %v800_v4 = vadd.s32 %v799_v61, %v790_v38  ;;  %v887_v24 = vshrl.u32 %v2715_v54, %v3317_v5  ;;  %vm803_vm13 = vc.u32 %v3324_v32, %v3330_v39  ;;  %v886_v46 = vshll.u32 %v2714_v51, %v877_v63 }
 0x128   :  { %v682_v31 = vmul.f32 -0.001358992, %v681_v36  ;;  %v689_v21 = vmul.f32 -0.00019511016, %v681_v36  ;;  %v881_v42 = vshrl.u32 %v2713_v47, %v3317_v5  ;;  %v889_v3 = vshll.u32 %v2715_v54, %v877_v63 }
 0x129   :  { %v804_v19 = vadd.s32 1, %v800_v4  ;;  %v890_v16 = vshrl.u32 %v2716_v57, %v3317_v5  ;;  %v892_v33 = vshll.u32 %v2716_v57, %v877_v63  ;;  %v893_v48 = vshrl.u32 %v2717_v60, %v3317_v5 }
 0x12a   :  { %v683_v9 = vadd.f32 0.041655596, %v682_v31  ;;  %v690_v26 = vadd.f32 0.008332121, %v689_v21  ;;  %v3351_v8 = vor.u32 %v884_v17, %v883_v34  ;;  %v3353_v50 = vor.u32 %v887_v24, %v886_v46 }
 0x12b   :  { %v805_v28 = vsel %vm803_vm13, %v804_v19, %v800_v4  ;;  %v891_v1 = vor.u32 %v890_v16, %v889_v3  ;;  %v894_v49 = vor.u32 %v893_v48, %v892_v33  ;;  %v58_v62 = vmul.f32 %v3326_v30, %v2776_v10 }
 0x12c   :  { %v684_v23 = vmul.f32 %v683_v9, %v681_v36  ;;  %v691_v59 = vmul.f32 %v690_v26, %v681_v36  ;;  %v806_v35 = vadd.s32 %v805_v28, %v801_v29  ;;  %v698_v55 = vand.u32 3, %v697_v7  ;;  %v3367_v7 = vpop.permute.xlu1 %77 }
 0x12d   :  { %v871_v58 = vor.u32 8388608, %v3311_v0  ;;  %v3358_v63 = vor.u32 %v881_v42, %v880_v40  ;;  %vm898_vm15 = vcmp.lt.s32.totalorder %v3332_v22, 4  ;;  %vm895_vm0 = vcmp.lt.s32.totalorder %v3332_v22, 1 }
 0x12e   :  { %v685_v44 = vadd.f32 -0.4999988, %v684_v23  ;;  %v692_v41 = vadd.f32 -0.16666654, %v691_v59  ;;  %v807_v6 = vadd.s32 536870912, %v806_v35  ;;  %vm897_vm1 = vcmp.lt.s32.totalorder %v3332_v22, 3 }
 0x12f   :  { %v904_v52 = vsel %vm898_vm15, %v891_v1, 920167782  ;;  %v908_v10 = vsel %vm898_vm15, %v894_v49, 1326507024  ;;  %v907_v61 = vsel %vm895_vm0, %v3351_v8, %v3353_v50  ;;  %vm896_vm2 = vcmp.lt.s32.totalorder %v3332_v22, 2 }
 0x130   :  { %v686_v0 = vmul.f32 %v685_v44, %v681_v36  ;;  %v693_v29 = vmul.f32 %v692_v41, %v681_v36  ;;  %v3369_v38 = vshrl.u32 %v807_v6, 30  ;;  %v903_v40 = vsel %vm895_vm0, %v3358_v63, %v3351_v8 }
 0x131   :  { %v909_v4 = vsel %vm897_vm1, %v891_v1, %v908_v10  ;;  %v3382_v34 = vshll.u32 %v871_v58, 8  ;;  %v905_v31 = vsel %vm897_vm1, %v3353_v50, %v904_v52  ;;  %v59_v21 = vmul.f32 %v3326_v30, %v2778_v11 }
 0x132   :  { %v687_v36 = vadd.f32 1.0, %v686_v0  ;;  %v694_v17 = vadd.f32 1.0, %v693_v29  ;;  %v809_v24 = vshll.u32 %v3369_v38, 30  ;;  %v3391_v46 = vadd.f32 %v3367_v7, %v58_v62 }
 0x133   :  { %vm696_vm3 = vweird.f32 %v2966_v18  ;;  %v910_v19 = vsel %vm896_vm2, %v907_v61, %v909_v4  ;;  %vm703_vm4 = vcmp.eq.s32.totalorder %v698_v55, 2  ;;  %v906_v9 = vsel %vm896_vm2, %v903_v40, %v905_v31 }
 0x134   :  { %v695_v42 = vmul.f32 %v694_v17, %v3322_v27  ;;  %v704_v3 = vxor.u32 2147483648, %v687_v36  ;;  %v810_v16 = vsub.s32 %v806_v35, %v809_v24  ;;  %v912_v26 = vand.u32 65535, %v3382_v34 }
 0x135   :  { %v914_v33 = vand.u32 65535, %v910_v19  ;;  %v915_v11 = vshrl.u32 %v910_v19, 16  ;;  %v913_v1 = vshrl.u32 %v3382_v34, 16  ;;  %vm699_vm6 = vcmp.lt.s32.totalorder %v698_v55, 2 }
 0x136   :  { %v701_v48 = vxor.u32 2147483648, %v695_v42  ;;  %vm811_vm5 = vcmp.lt.s32.totalorder %v810_v16, 0  ;;  %v812_v28 = vsub.s32 0, %v810_v16  ;;  %vm700_vm7 = vcmp.eq.s32.totalorder %v698_v55, 0 }
 0x137   :  { %v705_v23 = vsel %vm703_vm4, %v704_v3, %v695_v42  ;;  %v917_v59 = vmul.u32 %v915_v11, %v912_v26  ;;  %v918_v62 = vmul.u32 %v914_v33, %v913_v1  ;;  %v937_v35 = vshrl.u32 %v906_v9, 16 }
 0x138   :  { %v702_v27 = vsel %vm700_vm7, %v687_v36, %v701_v48  ;;  %v813_v49 = vsel %vm811_vm5, %v812_v28, %v810_v16  ;;  %v936_v6 = vand.u32 65535, %v906_v9  ;;  %v3402_v52 = vadd.f32 %v3367_v7, %v59_v21 }
 0x139   :  { %v706_v58 = vsel %vm699_vm6, %v702_v27, %v705_v23  ;;  %v814_v44 = vclz %v813_v49  ;;  %v920_v41 = vshll.u32 %v917_v59, 16  ;;  %v879_v0 = vshrl.u32 %v2712_v45, %v3317_v5 }
 0x13a   :  { %v707_v10 = vsel %vm696_vm3, nan, %v706_v58  ;;  %v916_v55 = vmul.u32 %v914_v33, %v912_v26  ;;  %v802_v29 = vadd.s32 %v3330_v39, %v3324_v32  ;;  %v900_v40 = vsel %vm898_vm15, %v3353_v50, 2102212464 }
 0x13b   :  { %v2637_v61 = vadd.s32 4294967294, %v814_v44  ;;  %v919_v4 = vmul.u32 %v915_v11, %v913_v1  ;;  %1331 = vst [vmem:[#allocation2 + $0x18] sm:$0xff] %v707_v10  ;;  %v922_v36 = vshll.u32 %v918_v62, 16  ;;  %v939_v24 = vmul.u32 %v937_v35, %v912_v26 }
 0x13c   :  { %vm924_vm8 = vc.u32 %v916_v55, %v920_v41  ;;  %v926_v17 = vadd.s32 %v920_v41, %v916_v55  ;;  %vm710_vm9 = vcmp.lt.s32.totalorder %v3111_v53, 0  ;;  %v921_v18 = vshrl.u32 %v917_v59, 16 }
 0x13d   :  { %vm2638_vm10 = vcmp.lt.s32.totalorder %v2637_v61, 0  ;;  %v925_v5 = vsel %vm924_vm8, 1, %v2711_v2  ;;  %v940_v31 = vmul.u32 %v936_v6, %v913_v1  ;;  %v942_v39 = vshll.u32 %v939_v24, 16 }
 0x13e   :  { %v817_v21 = vsel %vm2638_vm10, 0, %v2637_v61  ;;  %v927_v32 = vadd.s32 %v925_v5, %v919_v4  ;;  %vm928_vm11 = vc.u32 %v926_v17, %v922_v36  ;;  %v938_v3 = vmul.u32 %v936_v6, %v912_v26 }
 0x13f   :  { %v818_v19 = vsub.s32 32, %v817_v21  ;;  %v822_v42 = vsub.s32 4294967266, %v817_v21  ;;  %v929_v50 = vsel %vm928_vm11, 1, %v2711_v2  ;;  %v819_v9 = vshll.u32 %v810_v16, %v817_v21 }
 0x140   :  { %v931_v33 = vadd.s32 %v929_v50, %v927_v32  ;;  %v941_v11 = vmul.u32 %v937_v35, %v913_v1  ;;  %v944_v48 = vshll.u32 %v940_v31, 16  ;;  %vm946_vm12 = vc.u32 %v938_v3, %v942_v39 }
 0x141   :  { %v820_v28 = vshrl.u32 %v802_v29, %v818_v19  ;;  %v823_v23 = vadd.s32 127, %v822_v42  ;;  %v948_v59 = vadd.s32 %v942_v39, %v938_v3  ;;  %v832_v27 = vsub.s32 4, %v3369_v38 }
 0x142   :  { %v932_v49 = vadd.s32 %v931_v33, %v921_v18  ;;  %v947_v58 = vsel %vm946_vm12, 1, %v2711_v2  ;;  %v1018_v44 = vand.u32 2147483647, %v3391_v46  ;;  %v899_v16 = vsel %vm895_vm0, %v879_v0, %v3358_v63 }
 0x143   :  { %v821_v41 = vor.u32 %v820_v28, %v819_v9  ;;  %v824_v10 = vshll.u32 %v823_v23, 23  ;;  %v949_v55 = vadd.s32 %v947_v58, %v941_v11  ;;  %vm950_vm14 = vc.u32 %v948_v59, %v944_v48 }
 0x144   :  { %v901_v26 = vsel %vm897_vm1, %v3351_v8, %v900_v40  ;;  %v923_v1 = vshrl.u32 %v918_v62, 16  ;;  %v951_v35 = vsel %vm950_vm14, 1, %v2711_v2  ;;  %v943_v29 = vshrl.u32 %v939_v24, 16 }
 0x145   :  { %v825_v6 = vor.u32 4788187, %v824_v10  ;;  %v953_v61 = vadd.s32 %v951_v35, %v949_v55  ;;  %v1021_v4 = vand.u32 2139095040, %v3391_v46  ;;  %v828_v36 = vcvt.s32.f32 %v821_v41 }
 0x146   :  { %v833_v17 = vsel %vm710_vm9, %v832_v27, %v3369_v38  ;;  %v933_v18 = vadd.s32 %v932_v49, %v923_v1  ;;  %v945_v5 = vshrl.u32 %v940_v31, 16  ;;  %v1025_v8 = vand.u32 8388607, %v1018_v44 }
 0x147   :  { %v826_v63 = vand.u32 2147483647, %v825_v6  ;;  %v954_v0 = vadd.s32 %v953_v61, %v943_v29  ;;  %v1022_v21 = vshrl.u32 %v1021_v4, 23  ;;  %vm3434_vm13 = vcmp.le.f32.partialorder %v708_v56, 0.7853982 }
 0x148   :  { %v952_v40 = vadd.s32 %v948_v59, %v944_v48  ;;  %v1176_v24 = vand.u32 2139095040, %v3402_v52  ;;  %v902_v38 = vsel %vm896_vm2, %v899_v16, %v901_v26  ;;  %v835_v19 = vsel %vm3434_vm13, 0, %v833_v17 }
 0x149   :  { %v829_v32 = vmul.f32 %v828_v36, %v826_v63  ;;  %v955_v31 = vadd.s32 %v954_v0, %v945_v5  ;;  %v2642_v39 = vadd.s32 4294967169, %v1022_v21  ;;  %v1026_v3 = vor.u32 8388608, %v1025_v8 }
 0x14a   :  { %vm958_vm15 = vc.u32 %v933_v18, %v952_v40  ;;  %v956_v9 = vmul.u32 %v3382_v34, %v902_v38  ;;  %v1177_v33 = vshrl.u32 %v1176_v24, 23  ;;  %v852_v28 = vadd.s32 3, %v835_v19 }
 0x14b   :  { %v830_v42 = vxor.u32 2147483648, %v829_v32  ;;  %v959_v50 = vadd.s32 1, %v955_v31  ;;  %v1028_v56 = vadd.s32 1, %v2642_v39  ;;  %v3453_v58 = vshll.u32 %v1026_v3, 8 }
 0x14c   :  { %v2645_v41 = vadd.s32 4294967169, %v1177_v33  ;;  %vm865_vm1 = vcmp.lt.s32.totalorder %v3164_v43, 0  ;;  %v3456_v26 = vand.u32 3, %v852_v28  ;;  %v3458_v1 = vadd.s32 %v952_v40, %v933_v18 }
 0x14d   :  { %v831_v11 = vsel %vm710_vm9, %v830_v42, %v829_v32  ;;  %v960_v48 = vsel %vm958_vm15, %v959_v50, %v955_v31  ;;  %vm1029_vm0 = vcmp.gt.s32.totalorder %v1028_v56, 0  ;;  %v1173_v6 = vand.u32 2147483647, %v3402_v52 }
 0x14e   :  { %v3449_v22 = vsel %vm3434_vm13, %v3111_v53, %v831_v11  ;;  %v961_v23 = vadd.s32 %v960_v48, %v956_v9  ;;  %v1030_v59 = vsel %vm1029_vm0, %v1028_v56, 0  ;;  %vm3463_vm2 = vcmp.le.f32.partialorder %v863_v14, 0.7853982 }
 0x14f   :  { %v836_v27 = vmul.f32 %v3449_v22, %v3449_v22  ;;  %v1032_v49 = vand.u32 31, %v1030_v59  ;;  %v3468_v36 = vand.u32 65535, %v3453_v58  ;;  %v3471_v17 = vshrl.u32 %v3453_v58, 16 }
 0x150   :  { %v962_v34 = vadd.s32 536870912, %v961_v23  ;;  %v3473_v18 = vshrl.u32 %v1030_v59, 5  ;;  %v3476_v0 = vadd.s32 1, %v2645_v41  ;;  %vm855_vm3 = vcmp.eq.s32.totalorder %v3456_v26, 0 }
 0x151   :  { %v837_v10 = vmul.f32 -0.001358992, %v836_v27  ;;  %v844_v55 = vmul.f32 -0.00019511016, %v836_v27  ;;  %v1033_v16 = vsub.s32 32, %v1032_v49  ;;  %v1035_v14 = vshll.u32 %v2712_v45, %v1032_v49 }
 0x152   :  { %v963_v35 = vshrl.u32 %v962_v34, 30  ;;  %v1038_v24 = vshll.u32 %v2713_v47, %v1032_v49  ;;  %v1041_v19 = vshll.u32 %v2714_v51, %v1032_v49  ;;  %vm858_vm4 = vcmp.eq.s32.totalorder %v3456_v26, 2 }
 0x153   :  { %v838_v29 = vadd.f32 0.041655596, %v837_v10  ;;  %v845_v61 = vadd.f32 0.008332121, %v844_v55  ;;  %v1036_v63 = vshrl.u32 %v2713_v47, %v1033_v16  ;;  %v1039_v32 = vshrl.u32 %v2714_v51, %v1033_v16 }
 0x154   :  { %v964_v5 = vshll.u32 %v963_v35, 30  ;;  %v987_v62 = vsub.s32 4, %v963_v35  ;;  %v1045_v38 = vshrl.u32 %v2716_v57, %v1033_v16  ;;  %v1042_v42 = vshrl.u32 %v2715_v54, %v1033_v16 }
 0x155   :  { %v839_v21 = vmul.f32 %v838_v29, %v836_v27  ;;  %v846_v8 = vmul.f32 %v845_v61, %v836_v27  ;;  %v1037_v3 = vor.u32 %v1036_v63, %v1035_v14  ;;  %v1044_v56 = vshll.u32 %v2715_v54, %v1032_v49 }
 0x156   :  { %v3479_v40 = vsub.s32 %v961_v23, %v964_v5  ;;  %vm854_vm6 = vcmp.lt.s32.totalorder %v3456_v26, 2  ;;  %v988_v11 = vsel %vm865_vm1, %v987_v62, %v963_v35  ;;  %v1048_v48 = vshrl.u32 %v2717_v60, %v1033_v16 }
 0x157   :  { %v840_v31 = vadd.f32 -0.4999988, %v839_v21  ;;  %v847_v39 = vadd.f32 -0.16666654, %v846_v8  ;;  %vm851_vm7 = vweird.f32 %v3111_v53  ;;  %v1040_v23 = vor.u32 %v1039_v32, %v1038_v24 }
 0x158   :  { %vm966_vm5 = vcmp.lt.s32.totalorder %v3479_v40, 0  ;;  %v967_v50 = vsub.s32 0, %v3479_v40  ;;  %v1046_v59 = vor.u32 %v1045_v38, %v1044_v56  ;;  %v1047_v34 = vshll.u32 %v2716_v57, %v1032_v49 }
 0x159   :  { %v841_v9 = vmul.f32 %v840_v31, %v836_v27  ;;  %v848_v33 = vmul.f32 %v847_v39, %v836_v27  ;;  %v1043_v29 = vor.u32 %v1042_v42, %v1041_v19  ;;  %v990_v27 = vsel %vm3463_vm2, 0, %v988_v11 }
 0x15a   :  { %v968_v28 = vsel %vm966_vm5, %v967_v50, %v3479_v40  ;;  %v1034_v61 = vshrl.u32 %v2712_v45, %v1033_v16  ;;  %v1049_v35 = vor.u32 %v1048_v48, %v1047_v34  ;;  %vm1050_vm8 = vcmp.lt.s32.totalorder %v3473_v18, 1 }
 0x15b   :  { %v842_v41 = vadd.f32 1.0, %v841_v9  ;;  %v849_v10 = vadd.f32 1.0, %v848_v33  ;;  %v969_v55 = vclz %v968_v28  ;;  %vm1184_vm9 = vcmp.gt.s32.totalorder %v3476_v0, 0 }
 0x15c   :  { %vm1053_vm10 = vcmp.lt.s32.totalorder %v3473_v18, 4  ;;  %vm1051_vm11 = vcmp.lt.s32.totalorder %v3473_v18, 2  ;;  %vm1052_vm12 = vcmp.lt.s32.totalorder %v3473_v18, 3  ;;  %v1054_v49 = vsel %vm1050_vm8, %v1034_v61, %v1037_v3 }
 0x15d   :  { %v850_v5 = vmul.f32 %v849_v10, %v3449_v22  ;;  %v859_v63 = vxor.u32 2147483648, %v842_v41  ;;  %v2640_v21 = vadd.s32 4294967294, %v969_v55  ;;  %v1059_v8 = vsel %vm1053_vm10, %v1046_v59, 920167782 }
 0x15e   :  { %v1055_v62 = vsel %vm1053_vm10, %v1043_v29, 2102212464  ;;  %v1058_v14 = vsel %vm1050_vm8, %v1037_v3, %v1040_v23  ;;  %v1060_v22 = vsel %vm1052_vm12, %v1043_v29, %v1059_v8  ;;  %v1062_v32 = vsel %vm1050_vm8, %v1040_v23, %v1043_v29 }
 0x15f   :  { %v856_v16 = vxor.u32 2147483648, %v850_v5  ;;  %vm2641_vm14 = vcmp.lt.s32.totalorder %v2640_v21, 0  ;;  %v1063_v38 = vsel %vm1053_vm10, %v1049_v35, 1326507024  ;;  %v860_v39 = vsel %vm858_vm4, %v859_v63, %v850_v5 }
 0x160   :  { %v972_v24 = vsel %vm2641_vm14, 0, %v2640_v21  ;;  %v1061_v56 = vsel %vm1051_vm11, %v1058_v14, %v1060_v22  ;;  %v1064_v9 = vsel %vm1052_vm12, %v1046_v59, %v1063_v38  ;;  %v1056_v26 = vsel %vm1052_vm12, %v1040_v23, %v1055_v62 }
 0x161   :  { %v857_v31 = vsel %vm855_vm3, %v842_v41, %v856_v16  ;;  %v973_v19 = vsub.s32 32, %v972_v24  ;;  %v977_v42 = vsub.s32 4294967266, %v972_v24  ;;  %v974_v3 = vshll.u32 %v3479_v40, %v972_v24 }
 0x162   :  { %v861_v50 = vsel %vm854_vm6, %v857_v31, %v860_v39  ;;  %v1065_v28 = vsel %vm1051_vm11, %v1062_v32, %v1064_v9  ;;  %v1092_v41 = vshrl.u32 %v1061_v56, 16  ;;  %v1091_v29 = vand.u32 65535, %v1061_v56 }
 0x163   :  { %v862_v33 = vsel %vm851_vm7, nan, %v861_v50  ;;  %v975_v11 = vshrl.u32 %v3458_v1, %v973_v19  ;;  %v978_v48 = vadd.s32 127, %v977_v42  ;;  %v1069_v34 = vand.u32 65535, %v1065_v28 }
 0x164   :  { %v1070_v40 = vshrl.u32 %v1065_v28, 16  ;;  %1332 = vst [vmem:[#allocation2 + $0x20] sm:$0xff] %v862_v33  ;;  %v3533_v59 = vadd.s32 3, %v990_v27  ;;  %v3539_v61 = vand.u32 8388607, %v1173_v6  ;;  %v3543_v23 = vsel %vm1051_vm11, %v1054_v49, %v1056_v26 }
 0x165   :  { %v976_v10 = vor.u32 %v975_v11, %v974_v3  ;;  %v979_v55 = vshll.u32 %v978_v48, 23  ;;  %v1073_v1 = vmul.u32 %v1069_v34, %v3471_v17  ;;  %v1094_v5 = vmul.u32 %v1092_v41, %v3468_v36 }
 0x166   :  { %v1072_v53 = vmul.u32 %v1070_v40, %v3468_v36  ;;  %v1185_v27 = vsel %vm1184_vm9, %v3476_v0, 0  ;;  %v1071_v21 = vmul.u32 %v1069_v34, %v3468_v36  ;;  %v1074_v8 = vmul.u32 %v1070_v40, %v3471_v17 }
 0x167   :  { %v980_v35 = vor.u32 4788187, %v979_v55  ;;  %v983_v63 = vcvt.s32.f32 %v976_v10  ;;  %v1093_v14 = vmul.u32 %v1091_v29, %v3468_v36  ;;  %v1095_v24 = vmul.u32 %v1091_v29, %v3471_v17 }
 0x168   :  { %v1075_v16 = vshll.u32 %v1072_v53, 16  ;;  %v1097_v18 = vshll.u32 %v1094_v5, 16  ;;  %v1076_v49 = vshrl.u32 %v1072_v53, 16  ;;  %v1077_v22 = vshll.u32 %v1073_v1, 16 }
 0x169   :  { %v981_v62 = vand.u32 2147483647, %v980_v35  ;;  %v1096_v0 = vmul.u32 %v1092_v41, %v3471_v17  ;;  %v1099_v39 = vshll.u32 %v1095_v24, 16  ;;  %v1187_v56 = vand.u32 31, %v1185_v27 }
 0x16a   :  { %vm1079_vm13 = vc.u32 %v1071_v21, %v1075_v16  ;;  %v1081_v32 = vadd.s32 %v1075_v16, %v1071_v21  ;;  %vm1101_vm0 = vc.u32 %v1093_v14, %v1097_v18  ;;  %v1103_v42 = vadd.s32 %v1097_v18, %v1093_v14 }
 0x16b   :  { %v984_v38 = vmul.f32 %v983_v63, %v981_v62  ;;  %v1080_v31 = vsel %vm1079_vm13, 1, %v2711_v2  ;;  %v1102_v3 = vsel %vm1101_vm0, 1, %v2711_v2  ;;  %v1078_v9 = vshrl.u32 %v1073_v1, 16 }
 0x16c   :  { %v1082_v19 = vadd.s32 %v1080_v31, %v1074_v8  ;;  %vm1083_vm15 = vc.u32 %v1081_v32, %v1077_v22  ;;  %v1104_v11 = vadd.s32 %v1102_v3, %v1096_v0  ;;  %vm1105_vm3 = vc.u32 %v1103_v42, %v1099_v39 }
 0x16d   :  { %v985_v50 = vxor.u32 2147483648, %v984_v38  ;;  %v1084_v36 = vsel %vm1083_vm15, 1, %v2711_v2  ;;  %v1098_v28 = vshrl.u32 %v1094_v5, 16  ;;  %v1106_v17 = vsel %vm1105_vm3, 1, %v2711_v2 }
 0x16e   :  { %v1086_v33 = vadd.s32 %v1084_v36, %v1082_v19  ;;  %v3560_v26 = vsub.s32 32, %v1187_v56  ;;  %v1108_v41 = vadd.s32 %v1106_v17, %v1104_v11  ;;  %v3565_v10 = vshrl.u32 %v1185_v27, 5 }
 0x16f   :  { %v986_v48 = vsel %vm865_vm1, %v985_v50, %v984_v38  ;;  %v1100_v29 = vshrl.u32 %v1095_v24, 16  ;;  %v3567_v53 = vadd.s32 %v1103_v42, %v1099_v39  ;;  %v1190_v63 = vshll.u32 %v2712_v45, %v1187_v56 }
 0x170   :  { %v989_v34 = vsel %vm3463_vm2, %v3164_v43, %v986_v48  ;;  %v1087_v40 = vadd.s32 %v1086_v33, %v1076_v49  ;;  %v1191_v1 = vshrl.u32 %v2713_v47, %v3560_v26  ;;  %v1109_v5 = vadd.s32 %v1108_v41, %v1098_v28 }
 0x171   :  { %v991_v55 = vmul.f32 %v989_v34, %v989_v34  ;;  %v1194_v4 = vshrl.u32 %v2714_v51, %v3560_v26  ;;  %v1193_v27 = vshll.u32 %v2713_v47, %v1187_v56  ;;  %v1196_v16 = vshll.u32 %v2714_v51, %v1187_v56 }
 0x172   :  { %v3571_v35 = vadd.s32 %v1087_v40, %v1078_v9  ;;  %v1110_v62 = vadd.s32 %v1109_v5, %v1100_v29  ;;  %v3580_v14 = vor.u32 %v1191_v1, %v1190_v63  ;;  %v1197_v24 = vshrl.u32 %v2715_v54, %v3560_v26 }
 0x173   :  { %v992_v21 = vmul.f32 -0.001358992, %v991_v55  ;;  %v999_v8 = vmul.f32 -0.00019511016, %v991_v55  ;;  %v1199_v22 = vshll.u32 %v2715_v54, %v1187_v56  ;;  %v1200_v32 = vshrl.u32 %v2716_v57, %v3560_v26 }
 0x174   :  { %vm1113_vm1 = vc.u32 %v3571_v35, %v3567_v53  ;;  %v1114_v38 = vadd.s32 1, %v1110_v62  ;;  %v3587_v31 = vor.u32 %v1194_v4, %v1193_v27  ;;  %v1202_v0 = vshll.u32 %v2716_v57, %v1187_v56 }
 0x175   :  { %v993_v18 = vadd.f32 0.041655596, %v992_v21  ;;  %v1000_v49 = vadd.f32 0.008332121, %v999_v8  ;;  %v1203_v39 = vshrl.u32 %v2717_v60, %v3560_v26  ;;  %v1111_v50 = vmul.u32 %v3453_v58, %v3543_v23 }
 0x176   :  { %v1201_v36 = vor.u32 %v1200_v32, %v1199_v22  ;;  %v1115_v3 = vsel %vm1113_vm1, %v1114_v38, %v1110_v62  ;;  %v3594_v9 = vor.u32 %v1197_v24, %v1196_v16  ;;  %vm1205_vm2 = vcmp.lt.s32.totalorder %v3565_v10, 1 }
 0x177   :  { %v994_v19 = vmul.f32 %v993_v18, %v991_v55  ;;  %v1001_v42 = vmul.f32 %v1000_v49, %v991_v55  ;;  %v1204_v33 = vor.u32 %v1203_v39, %v1202_v0  ;;  %v1116_v28 = vadd.s32 %v1115_v3, %v1111_v50 }
 0x178   :  { %vm1208_vm4 = vcmp.lt.s32.totalorder %v3565_v10, 4  ;;  %v1008_v56 = vand.u32 3, %v3533_v59  ;;  %v1181_v17 = vor.u32 8388608, %v3539_v61  ;;  %v1213_v58 = vsel %vm1205_vm2, %v3580_v14, %v3587_v31 }
 0x179   :  { %v995_v11 = vadd.f32 -0.4999988, %v994_v19  ;;  %v1002_v48 = vadd.f32 -0.16666654, %v1001_v42  ;;  %v1214_v23 = vsel %vm1208_vm4, %v1201_v36, 920167782  ;;  %v1217_v61 = vsel %vm1205_vm2, %v3587_v31, %v3594_v9 }
 0x17a   :  { %v1117_v29 = vadd.s32 536870912, %v1116_v28  ;;  %vm1207_vm5 = vcmp.lt.s32.totalorder %v3565_v10, 3  ;;  %vm1206_vm6 = vcmp.lt.s32.totalorder %v3565_v10, 2  ;;  %v1218_v1 = vsel %vm1208_vm4, %v1204_v33, 1326507024 }
 0x17b   :  { %v996_v40 = vmul.f32 %v995_v11, %v991_v55  ;;  %v1003_v41 = vmul.f32 %v1002_v48, %v991_v55  ;;  %v1215_v59 = vsel %vm1207_vm5, %v3594_v9, %v1214_v23  ;;  %v1219_v21 = vsel %vm1207_vm5, %v1201_v36, %v1218_v1 }
 0x17c   :  { %v3617_v55 = vshrl.u32 %v1117_v29, 30  ;;  %v1216_v4 = vsel %vm1206_vm6, %v1213_v58, %v1215_v59  ;;  %v3623_v8 = vshll.u32 %v1181_v17, 8  ;;  %vm1006_vm7 = vweird.f32 %v3164_v43 }
 0x17d   :  { %v997_v5 = vadd.f32 1.0, %v996_v40  ;;  %v1004_v63 = vadd.f32 1.0, %v1003_v41  ;;  %vm1009_vm8 = vcmp.lt.s32.totalorder %v1008_v56, 2  ;;  %vm1010_vm9 = vcmp.eq.s32.totalorder %v1008_v56, 0 }
 0x17e   :  { %v1119_v62 = vshll.u32 %v3617_v55, 30  ;;  %v1220_v24 = vsel %vm1206_vm6, %v1217_v61, %v1219_v21  ;;  %v1247_v18 = vshrl.u32 %v1216_v4, 16  ;;  %vm1013_vm10 = vcmp.eq.s32.totalorder %v1008_v56, 2 }
 0x17f   :  { %v1005_v27 = vmul.f32 %v1004_v63, %v989_v34  ;;  %v1014_v16 = vxor.u32 2147483648, %v997_v5  ;;  %v1246_v32 = vand.u32 65535, %v1216_v4  ;;  %v1222_v38 = vand.u32 65535, %v3623_v8 }
 0x180   :  { %v1120_v22 = vsub.s32 %v1116_v28, %v1119_v62  ;;  %v1223_v0 = vshrl.u32 %v3623_v8, 16  ;;  %v1224_v34 = vand.u32 65535, %v1220_v24  ;;  %v1225_v39 = vshrl.u32 %v1220_v24, 16 }
 0x181   :  { %v1011_v49 = vxor.u32 2147483648, %v1005_v27  ;;  %v1015_v42 = vsel %vm1013_vm10, %v1014_v16, %v1005_v27  ;;  %v1249_v11 = vmul.u32 %v1247_v18, %v1222_v38  ;;  %v1189_v17 = vshrl.u32 %v2712_v45, %v3560_v26 }
 0x182   :  { %vm1121_vm11 = vcmp.lt.s32.totalorder %v1120_v22, 0  ;;  %v1122_v50 = vsub.s32 0, %v1120_v22  ;;  %v1227_v3 = vmul.u32 %v1225_v39, %v1222_v38  ;;  %v1228_v33 = vmul.u32 %v1224_v34, %v1223_v0 }
 0x183   :  { %v1012_v19 = vsel %vm1010_vm9, %v997_v5, %v1011_v49  ;;  %v1250_v58 = vmul.u32 %v1246_v32, %v1223_v0  ;;  %v1112_v23 = vadd.s32 %v3567_v53, %v3571_v35  ;;  %v1226_v41 = vmul.u32 %v1224_v34, %v1222_v38 }
 0x184   :  { %v1016_v36 = vsel %vm1009_vm8, %v1012_v19, %v1015_v42  ;;  %v1123_v28 = vsel %vm1121_vm11, %v1122_v50, %v1120_v22  ;;  %v1230_v29 = vshll.u32 %v1227_v3, 16  ;;  %v1209_v56 = vsel %vm1205_vm2, %v1189_v17, %v3580_v14 }
 0x185   :  { %v1017_v48 = vsel %vm1006_vm7, nan, %v1016_v36  ;;  %v1124_v40 = vclz %v1123_v28  ;;  %v1229_v59 = vmul.u32 %v1225_v39, %v1223_v0  ;;  %v1232_v61 = vshll.u32 %v1228_v33, 16 }
 0x186   :  { %1333 = vst [vmem:[#allocation2 + $0x28] sm:$0xff] %v1017_v48  ;;  %v1248_v43 = vmul.u32 %v1246_v32, %v1222_v38  ;;  %vm1234_vm12 = vc.u32 %v1226_v41, %v1230_v29  ;;  %v1236_v5 = vadd.s32 %v1230_v29, %v1226_v41  ;;  %v1252_v63 = vshll.u32 %v1249_v11, 16 }
 0x187   :  { %v2643_v1 = vadd.s32 4294967294, %v1124_v40  ;;  %v1210_v26 = vsel %vm1208_vm4, %v3594_v9, 2102212464  ;;  %v1235_v53 = vsel %vm1234_vm12, 1, %v2711_v2  ;;  %v1251_v35 = vmul.u32 %v1247_v18, %v1223_v0  ;;  %v1336_v9 = vld [vmem:[%s4640_s3] sm:$0x3] }
 0x188   :  { %v1254_v4 = vshll.u32 %v1250_v58, 16  ;;  %v1237_v21 = vadd.s32 %v1235_v53, %v1229_v59  ;;  %vm1238_vm13 = vc.u32 %v1236_v5, %v1232_v61  ;;  %vm1256_vm15 = vc.u32 %v1248_v43, %v1252_v63  ;;  %s2610_s3 = sshll.u32 %s2718_s2, 4  ;;  %s2611_s3 = int_to_ptr.vmem [resolvable:$true] %s2610_s3 }
 0x189   :  { %vm2644_vm14 = vcmp.lt.s32.totalorder %v2643_v1, 0  ;;  %v1239_v27 = vsel %vm1238_vm13, 1, %v2711_v2  ;;  %v1257_v16 = vsel %vm1256_vm15, 1, %v2711_v2  ;;  %v1258_v62 = vadd.s32 %v1252_v63, %v1248_v43 }
 0x18a   :  { %v1127_v14 = vsel %vm2644_vm14, 0, %v2643_v1  ;;  %v1231_v32 = vshrl.u32 %v1227_v3, 16  ;;  %v1241_v38 = vadd.s32 %v1239_v27, %v1237_v21  ;;  %v1233_v0 = vshrl.u32 %v1228_v33, 16 }
 0x18b   :  { %v1128_v24 = vsub.s32 32, %v1127_v14  ;;  %v1132_v49 = vsub.s32 4294967266, %v1127_v14  ;;  %v1129_v18 = vshll.u32 %v1120_v22, %v1127_v14  ;;  %v1259_v34 = vadd.s32 %v1257_v16, %v1251_v35 }
 0x18c   :  { %vm1260_vm0 = vc.u32 %v1258_v62, %v1254_v4  ;;  %v1242_v42 = vadd.s32 %v1241_v38, %v1231_v32  ;;  %v1253_v36 = vshrl.u32 %v1249_v11, 16  ;;  %v3651_v28 = vperm.slane %v1336_v9, 0 }
 0x18d   :  { %v1130_v39 = vshrl.u32 %v1112_v23, %v1128_v24  ;;  %v1133_v19 = vadd.s32 127, %v1132_v49  ;;  %v1261_v50 = vsel %vm1260_vm0, 1, %v2711_v2  ;;  %v3653_v17 = vperm.slane %v1336_v9, 1 }
 0x18e   :  { %v1263_v48 = vadd.s32 %v1261_v50, %v1259_v34  ;;  %v1211_v22 = vsel %vm1207_vm5, %v3587_v31, %v1210_v26  ;;  %v3658_v33 = vadd.s32 %v1242_v42, %v1233_v0  ;;  %v1255_v41 = vshrl.u32 %v1250_v58, 16 }
 0x18f   :  { %v1131_v3 = vor.u32 %v1130_v39, %v1129_v18  ;;  %v1134_v40 = vshll.u32 %v1133_v19, 23  ;;  %v1342_v29 = vmul.f32 %v3651_v28, %v2780_v12  ;;  %v1142_v11 = vsub.s32 4, %v3617_v55 }
 0x190   :  { %v1264_v23 = vadd.s32 %v1263_v48, %v1253_v36  ;;  %v3663_v61 = vadd.s32 %v1258_v62, %v1254_v4  ;;  %v1212_v43 = vsel %vm1206_vm6, %v1209_v56, %v1211_v22  ;;  %v1343_v5 = vmul.f32 %v3653_v17, %v2780_v12 }
 0x191   :  { %v1135_v59 = vor.u32 4788187, %v1134_v40  ;;  %v1138_v63 = vcvt.s32.f32 %v1131_v3  ;;  %v3672_v58 = vadd.f32 %v1342_v29, %v2786_v15  ;;  %vm1020_vm1 = vcmp.lt.s32.totalorder %v3391_v46, 0 }
 0x192   :  { %v1265_v1 = vadd.s32 %v1264_v23, %v1255_v41  ;;  %vm1268_vm3 = vc.u32 %v3658_v33, %v3663_v61  ;;  %v1143_v35 = vsel %vm1020_vm1, %v1142_v11, %v3617_v55  ;;  %v1266_v10 = vmul.u32 %v3623_v8, %v1212_v43 }
 0x193   :  { %v1136_v31 = vand.u32 2147483647, %v1135_v59  ;;  %v3678_v4 = vadd.f32 %v1343_v5, %v2786_v15  ;;  %v1358_v12 = vand.u32 2147483647, %v3672_v58  ;;  %vm1019_vm2 = vcmp.le.f32.partialorder %v1018_v44, 0.7853982 }
 0x194   :  { %v1269_v26 = vadd.s32 1, %v1265_v1  ;;  %v1361_v27 = vand.u32 2139095040, %v3672_v58  ;;  %v1145_v16 = vsel %vm1019_vm2, 0, %v1143_v35  ;;  %vm1175_vm4 = vcmp.lt.s32.totalorder %v3402_v52, 0 }
 0x195   :  { %v1139_v53 = vmul.f32 %v1138_v63, %v1136_v31  ;;  %v1365_v62 = vand.u32 8388607, %v1358_v12  ;;  %v1516_v15 = vand.u32 2139095040, %v3678_v4  ;;  %v1162_v38 = vadd.s32 3, %v1145_v16 }
 0x196   :  { %v1270_v56 = vsel %vm1268_vm3, %v1269_v26, %v1265_v1  ;;  %v1362_v8 = vshrl.u32 %v1361_v27, 23  ;;  %v1513_v36 = vand.u32 2147483647, %v3678_v4  ;;  %vm3698_vm7 = vcmp.le.f32.partialorder %v1173_v6, 0.7853982 }
 0x197   :  { %v1140_v21 = vxor.u32 2147483648, %v1139_v53  ;;  %v1271_v14 = vadd.s32 %v1270_v56, %v1266_v10  ;;  %v1366_v44 = vor.u32 8388608, %v1365_v62  ;;  %v1517_v0 = vshrl.u32 %v1516_v15, 23 }
 0x198   :  { %v2648_v18 = vadd.s32 4294967169, %v1362_v8  ;;  %v3690_v22 = vand.u32 3, %v1162_v38  ;;  %v3704_v63 = vand.u32 8388607, %v1513_v36  ;;  %v1267_v16 = vadd.s32 %v3663_v61, %v3658_v33 }
 0x199   :  { %v1141_v55 = vsel %vm1020_vm1, %v1140_v21, %v1139_v53  ;;  %v1272_v24 = vadd.s32 536870912, %v1271_v14  ;;  %v2651_v48 = vadd.s32 4294967169, %v1517_v0  ;;  %v3694_v29 = vshll.u32 %v1366_v44, 8 }
 0x19a   :  { %v1144_v49 = vsel %vm1019_vm2, %v3391_v46, %v1141_v55  ;;  %v1368_v50 = vadd.s32 1, %v2648_v18  ;;  %vm1168_vm8 = vcmp.eq.s32.totalorder %v3690_v22, 2  ;;  %vm1165_vm9 = vcmp.eq.s32.totalorder %v3690_v22, 0 }
 0x19b   :  { %v1146_v32 = vmul.f32 %v1144_v49, %v1144_v49  ;;  %v1273_v9 = vshrl.u32 %v1272_v24, 30  ;;  %v1523_v59 = vadd.s32 1, %v2651_v48  ;;  %vm1164_vm11 = vcmp.lt.s32.totalorder %v3690_v22, 2 }
 0x19c   :  { %vm1369_vm5 = vcmp.gt.s32.totalorder %v1368_v50, 0  ;;  %v3716_v62 = vand.u32 65535, %v3694_v29  ;;  %vm1161_vm12 = vweird.f32 %v3391_v46  ;;  %v3720_v8 = vshrl.u32 %v3694_v29, 16 }
 0x19d   :  { %v1147_v34 = vmul.f32 -0.001358992, %v1146_v32  ;;  %v1154_v39 = vmul.f32 -0.00019511016, %v1146_v32  ;;  %v1274_v19 = vshll.u32 %v1273_v9, 30  ;;  %v1297_v42 = vsub.s32 4, %v1273_v9 }
 0x19e   :  { %v1370_v31 = vsel %vm1369_vm5, %v1368_v50, 0  ;;  %vm1524_vm10 = vcmp.gt.s32.totalorder %v1523_v59, 0  ;;  %v1521_v15 = vor.u32 8388608, %v3704_v63 }
 0x19f   :  { %v1148_v3 = vadd.f32 0.041655596, %v1147_v34  ;;  %v1155_v40 = vadd.f32 0.008332121, %v1154_v39  ;;  %v1275_v41 = vsub.s32 %v1271_v14, %v1274_v19  ;;  %v1298_v23 = vsel %vm1175_vm4, %v1297_v42, %v1273_v9 }
 0x1a0   :  { %v1300_v10 = vsel %vm3698_vm7, 0, %v1298_v23  ;;  %v3710_v6 = vshrl.u32 %v1370_v31, 5  ;;  %v1372_v21 = vand.u32 31, %v1370_v31  ;;  %v3723_v18 = vsel %vm1524_vm10, %v1523_v59, 0 }
 0x1a1   :  { %v1149_v11 = vmul.f32 %v1148_v3, %v1146_v32  ;;  %v1156_v43 = vmul.f32 %v1155_v40, %v1146_v32  ;;  %vm1276_vm6 = vcmp.lt.s32.totalorder %v1275_v41, 0  ;;  %v1277_v1 = vsub.s32 0, %v1275_v41 }
 0x1a2   :  { %v1317_v24 = vadd.s32 3, %v1300_v10  ;;  %v1375_v33 = vshll.u32 %v2712_v45, %v1372_v21  ;;  %v1378_v61 = vshll.u32 %v2713_v47, %v1372_v21  ;;  %vm1390_vm13 = vcmp.lt.s32.totalorder %v3710_v6, 1 }
 0x1a3   :  { %v1150_v26 = vadd.f32 -0.4999988, %v1149_v11  ;;  %v1157_v53 = vadd.f32 -0.16666654, %v1156_v43  ;;  %v1278_v35 = vsel %vm1276_vm6, %v1277_v1, %v1275_v41  ;;  %v1381_v39 = vshll.u32 %v2714_v51, %v1372_v21 }
 0x1a4   :  { %v1279_v56 = vclz %v1278_v35  ;;  %v1384_v48 = vshll.u32 %v2715_v54, %v1372_v21  ;;  %vm1393_vm15 = vcmp.lt.s32.totalorder %v3710_v6, 4  ;;  %vm1391_vm0 = vcmp.lt.s32.totalorder %v3710_v6, 2 }
 0x1a5   :  { %v1151_v14 = vmul.f32 %v1150_v26, %v1146_v32  ;;  %v1158_v27 = vmul.f32 %v1157_v53, %v1146_v32  ;;  %v1373_v32 = vsub.s32 32, %v1372_v21  ;;  %vm1392_vm3 = vcmp.lt.s32.totalorder %v3710_v6, 3 }
 0x1a6   :  { %v2646_v55 = vadd.s32 4294967294, %v1279_v56 }
 0x1a7   :  { %v1152_v38 = vadd.f32 1.0, %v1151_v14  ;;  %v1159_v9 = vadd.f32 1.0, %v1158_v27  ;;  %v1376_v50 = vshrl.u32 %v2713_v47, %v1373_v32  ;;  %v1379_v23 = vshrl.u32 %v2714_v51, %v1373_v32 }
 0x1a8   :  { %vm2647_vm14 = vcmp.lt.s32.totalorder %v2646_v55, 0  ;;  %v1382_v59 = vshrl.u32 %v2715_v54, %v1373_v32  ;;  %v1385_v1 = vshrl.u32 %v2716_v57, %v1373_v32  ;;  %v1387_v27 = vshll.u32 %v2716_v57, %v1372_v21 }
 0x1a9   :  { %v1160_v44 = vmul.f32 %v1159_v9, %v1144_v49  ;;  %v1169_v0 = vxor.u32 2147483648, %v1152_v38  ;;  %v1282_v34 = vsel %vm2647_vm14, 0, %v2646_v55  ;;  %v1377_v63 = vor.u32 %v1376_v50, %v1375_v33 }
 0x1aa   :  { %v1283_v19 = vsub.s32 32, %v1282_v34  ;;  %v1287_v42 = vsub.s32 4294967266, %v1282_v34  ;;  %v1284_v40 = vshll.u32 %v1275_v41, %v1282_v34  ;;  %v1380_v26 = vor.u32 %v1379_v23, %v1378_v61 }
 0x1ab   :  { %v1166_v3 = vxor.u32 2147483648, %v1160_v44  ;;  %v1170_v11 = vsel %vm1168_vm8, %v1169_v0, %v1160_v44  ;;  %v1383_v53 = vor.u32 %v1382_v59, %v1381_v39  ;;  %v1386_v56 = vor.u32 %v1385_v1, %v1384_v48 }
 0x1ac   :  { %v1285_v49 = vshrl.u32 %v1267_v16, %v1283_v19  ;;  %v1288_v43 = vadd.s32 127, %v1287_v42  ;;  %v1388_v16 = vshrl.u32 %v2717_v60, %v1373_v32  ;;  %v1398_v46 = vsel %vm1390_vm13, %v1377_v63, %v1380_v26 }
 0x1ad   :  { %v1167_v31 = vsel %vm1165_vm9, %v1152_v38, %v1166_v3  ;;  %v1374_v38 = vshrl.u32 %v2712_v45, %v1373_v32  ;;  %v1395_v22 = vsel %vm1393_vm15, %v1383_v53, 2102212464  ;;  %v1399_v21 = vsel %vm1393_vm15, %v1386_v56, 920167782 }
 0x1ae   :  { %v1171_v41 = vsel %vm1164_vm11, %v1167_v31, %v1170_v11  ;;  %v1286_v35 = vor.u32 %v1285_v49, %v1284_v40  ;;  %v1289_v10 = vshll.u32 %v1288_v43, 23  ;;  %v1389_v9 = vor.u32 %v1388_v16, %v1387_v27 }
 0x1af   :  { %v1172_v14 = vsel %vm1161_vm12, nan, %v1171_v41  ;;  %v1400_v44 = vsel %vm1392_vm3, %v1383_v53, %v1399_v21  ;;  %v1402_v32 = vsel %vm1390_vm13, %v1380_v26, %v1383_v53  ;;  %v1394_v0 = vsel %vm1390_vm13, %v1374_v38, %v1377_v63 }
 0x1b0   :  { %v1290_v55 = vor.u32 4788187, %v1289_v10  ;;  %1334 = vst [vmem:[#allocation2 + $0x30] sm:$0xff] %v1172_v14  ;;  %v1293_v61 = vcvt.s32.f32 %v1286_v35  ;;  %v1396_v34 = vsel %vm1392_vm3, %v1380_v26, %v1395_v22  ;;  %v1401_v39 = vsel %vm1391_vm0, %v1398_v46, %v1400_v44 }
 0x1b1   :  { %v1403_v19 = vsel %vm1393_vm15, %v1389_v9, 1326507024  ;;  %v1431_v48 = vand.u32 65535, %v1401_v39  ;;  %v1432_v3 = vshrl.u32 %v1401_v39, 16  ;;  %v3762_v40 = vand.u32 3, %v1317_v24 }
 0x1b2   :  { %v1291_v33 = vand.u32 2147483647, %v1290_v55  ;;  %v1404_v50 = vsel %vm1392_vm3, %v1386_v56, %v1403_v19  ;;  %v3767_v59 = vand.u32 31, %v3723_v18  ;;  %v3769_v11 = vshll.u32 %v1521_v15, 8 }
 0x1b3   :  { %v1405_v23 = vsel %vm1391_vm0, %v1402_v32, %v1404_v50  ;;  %v3773_v43 = vsel %vm1391_vm0, %v1394_v0, %v1396_v34  ;;  %v1433_v63 = vmul.u32 %v1431_v48, %v3716_v62  ;;  %v1434_v24 = vmul.u32 %v1432_v3, %v3716_v62 }
 0x1b4   :  { %v1294_v42 = vmul.f32 %v1293_v61, %v1291_v33  ;;  %v1409_v1 = vand.u32 65535, %v1405_v23  ;;  %v1410_v31 = vshrl.u32 %v1405_v23, 16  ;;  %v1435_v26 = vmul.u32 %v1431_v48, %v3720_v8 }
 0x1b5   :  { %v3779_v53 = vshrl.u32 %v3723_v18, 5  ;;  %v1436_v35 = vmul.u32 %v1432_v3, %v3720_v8  ;;  %v1437_v14 = vshll.u32 %v1434_v24, 16  ;;  %v3793_v18 = vsub.s32 32, %v3767_v59 }
 0x1b6   :  { %v1295_v49 = vxor.u32 2147483648, %v1294_v42  ;;  %v1412_v41 = vmul.u32 %v1410_v31, %v3716_v62  ;;  %v1413_v6 = vmul.u32 %v1409_v1, %v3720_v8  ;;  %v1411_v56 = vmul.u32 %v1409_v1, %v3716_v62 }
 0x1b7   :  { %v1414_v16 = vmul.u32 %v1410_v31, %v3720_v8  ;;  %v1438_v38 = vshrl.u32 %v1434_v24, 16  ;;  %vm1441_vm1 = vc.u32 %v1433_v63, %v1437_v14  ;;  %v1439_v61 = vshll.u32 %v1435_v26, 16 }
 0x1b8   :  { %v1296_v15 = vsel %vm1175_vm4, %v1295_v49, %v1294_v42  ;;  %v1415_v55 = vshll.u32 %v1412_v41, 16  ;;  %v1416_v22 = vshrl.u32 %v1412_v41, 16  ;;  %v1417_v9 = vshll.u32 %v1413_v6, 16 }
 0x1b9   :  { %v3789_v10 = vsel %vm3698_vm7, %v3402_v52, %v1296_v15  ;;  %v1418_v46 = vshrl.u32 %v1413_v6, 16  ;;  %v1442_v44 = vsel %vm1441_vm1, 1, %v2711_v2  ;;  %v1443_v32 = vadd.s32 %v1437_v14, %v1433_v63 }
 0x1ba   :  { %v1301_v27 = vmul.f32 %v3789_v10, %v3789_v10  ;;  %vm1419_vm2 = vc.u32 %v1411_v56, %v1415_v55  ;;  %v1421_v33 = vadd.s32 %v1415_v55, %v1411_v56  ;;  %v1440_v19 = vshrl.u32 %v1435_v26, 16 }
 0x1bb   :  { %v1420_v62 = vsel %vm1419_vm2, 1, %v2711_v2  ;;  %v1444_v42 = vadd.s32 %v1442_v44, %v1436_v35  ;;  %vm1445_vm5 = vc.u32 %v1443_v32, %v1439_v61  ;;  %v3802_v49 = vadd.s32 %v1443_v32, %v1439_v61 }
 0x1bc   :  { %v1302_v5 = vmul.f32 -0.001358992, %v1301_v27  ;;  %v1309_v21 = vmul.f32 -0.00019511016, %v1301_v27  ;;  %v1422_v39 = vadd.s32 %v1420_v62, %v1414_v16  ;;  %vm1423_vm4 = vc.u32 %v1421_v33, %v1417_v9 }
 0x1bd   :  { %v1424_v8 = vsel %vm1423_vm4, 1, %v2711_v2  ;;  %v1446_v23 = vsel %vm1445_vm5, 1, %v2711_v2  ;;  %v1530_v31 = vshll.u32 %v2712_v45, %v3767_v59  ;;  %v1531_v63 = vshrl.u32 %v2713_v47, %v3793_v18 }
 0x1be   :  { %v1303_v0 = vadd.f32 0.041655596, %v1302_v5  ;;  %v1310_v34 = vadd.f32 0.008332121, %v1309_v21  ;;  %v1426_v3 = vadd.s32 %v1424_v8, %v1422_v39  ;;  %v1448_v1 = vadd.s32 %v1446_v23, %v1444_v42 }
 0x1bf   :  { %v1534_v26 = vshrl.u32 %v2714_v51, %v3793_v18  ;;  %vm1320_vm6 = vcmp.eq.s32.totalorder %v3762_v40, 0  ;;  %v3811_v35 = vor.u32 %v1531_v63, %v1530_v31  ;;  %v1533_v56 = vshll.u32 %v2713_v47, %v3767_v59 }
 0x1c0   :  { %v1304_v50 = vmul.f32 %v1303_v0, %v1301_v27  ;;  %v1311_v48 = vmul.f32 %v1310_v34, %v1301_v27  ;;  %v1427_v41 = vadd.s32 %v1426_v3, %v1416_v22  ;;  %v1449_v6 = vadd.s32 %v1448_v1, %v1438_v38 }
 0x1c1   :  { %v1537_v14 = vshrl.u32 %v2715_v54, %v3793_v18  ;;  %vm1319_vm7 = vcmp.lt.s32.totalorder %v3762_v40, 2  ;;  %v1536_v22 = vshll.u32 %v2714_v51, %v3767_v59  ;;  %vm1316_vm8 = vweird.f32 %v3402_v52 }
 0x1c2   :  { %v1305_v24 = vadd.f32 -0.4999988, %v1304_v50  ;;  %v1312_v15 = vadd.f32 -0.16666654, %v1311_v48  ;;  %v3818_v9 = vadd.s32 %v1427_v41, %v1418_v46  ;;  %v1450_v38 = vadd.s32 %v1449_v6, %v1440_v19 }
 0x1c3   :  { %v3823_v5 = vor.u32 %v1534_v26, %v1533_v56  ;;  %v1539_v21 = vshll.u32 %v2715_v54, %v3767_v59  ;;  %v1540_v33 = vshrl.u32 %v2716_v57, %v3793_v18  ;;  %v3831_v46 = vor.u32 %v1537_v14, %v1536_v22 }
 0x1c4   :  { %v1306_v16 = vmul.f32 %v1305_v24, %v1301_v27  ;;  %v1313_v55 = vmul.f32 %v1312_v15, %v1301_v27  ;;  %vm1453_vm9 = vc.u32 %v3818_v9, %v3802_v49  ;;  %v1454_v61 = vadd.s32 1, %v1450_v38 }
 0x1c5   :  { %v1541_v44 = vor.u32 %v1540_v33, %v1539_v21  ;;  %v1542_v32 = vshll.u32 %v2716_v57, %v3767_v59  ;;  %v1543_v0 = vshrl.u32 %v2717_v60, %v3793_v18  ;;  %vm1323_vm10 = vcmp.eq.s32.totalorder %v3762_v40, 2 }
 0x1c6   :  { %v1307_v62 = vadd.f32 1.0, %v1306_v16  ;;  %v1314_v27 = vadd.f32 1.0, %v1313_v55  ;;  %v1451_v8 = vmul.u32 %v3694_v29, %v3773_v43  ;;  %v1455_v19 = vsel %vm1453_vm9, %v1454_v61, %v1450_v38 }
 0x1c7   :  { %v1544_v42 = vor.u32 %v1543_v0, %v1542_v32  ;;  %vm1545_vm11 = vcmp.lt.s32.totalorder %v3779_v53, 1  ;;  %vm1546_vm12 = vcmp.lt.s32.totalorder %v3779_v53, 2  ;;  %vm1547_vm14 = vcmp.lt.s32.totalorder %v3779_v53, 3 }
 0x1c8   :  { %v1315_v34 = vmul.f32 %v1314_v27, %v3789_v10  ;;  %v1324_v39 = vxor.u32 2147483648, %v1307_v62  ;;  %v1456_v48 = vadd.s32 %v1455_v19, %v1451_v8  ;;  %vm1548_vm13 = vcmp.lt.s32.totalorder %v3779_v53, 4 }
 0x1c9   :  { %v1553_v10 = vsel %vm1545_vm11, %v3811_v35, %v3823_v5  ;;  %v1554_v29 = vsel %vm1548_vm13, %v1541_v44, 920167782  ;;  %v1557_v43 = vsel %vm1545_vm11, %v3823_v5, %v3831_v46  ;;  %v1558_v31 = vsel %vm1548_vm13, %v1544_v42, 1326507024 }
 0x1ca   :  { %v1321_v50 = vxor.u32 2147483648, %v1315_v34  ;;  %v1325_v59 = vsel %vm1323_vm10, %v1324_v39, %v1315_v34  ;;  %v1457_v23 = vadd.s32 536870912, %v1456_v48  ;;  %v1555_v1 = vsel %vm1547_vm14, %v3831_v46, %v1554_v29 }
 0x1cb   :  { %v1344_v24 = vmul.f32 %v3651_v28, %v2800_v25  ;;  %v1556_v15 = vsel %vm1546_vm12, %v1553_v10, %v1555_v1  ;;  %v1559_v41 = vsel %vm1547_vm14, %v1541_v44, %v1558_v31  ;;  %v1562_v14 = vand.u32 65535, %v3769_v11 }
 0x1cc   :  { %v1322_v3 = vsel %vm1320_vm6, %v1307_v62, %v1321_v50  ;;  %v1458_v6 = vshrl.u32 %v1457_v23, 30  ;;  %v1560_v56 = vsel %vm1546_vm12, %v1557_v43, %v1559_v41  ;;  %v1563_v40 = vshrl.u32 %v3769_v11, 16 }
 0x1cd   :  { %v1326_v63 = vsel %vm1319_vm7, %v1322_v3, %v1325_v59  ;;  %v1564_v16 = vand.u32 65535, %v1560_v56  ;;  %v1565_v55 = vshrl.u32 %v1560_v56, 16  ;;  %v1587_v22 = vshrl.u32 %v1556_v15, 16 }
 0x1ce   :  { %v1327_v26 = vsel %vm1316_vm8, nan, %v1326_v63  ;;  %v1459_v38 = vshll.u32 %v1458_v6, 30  ;;  %v1586_v27 = vand.u32 65535, %v1556_v15  ;;  %v1345_v52 = vmul.f32 %v3653_v17, %v2800_v25 }
 0x1cf   :  { %1335 = vst [vmem:[#allocation2 + $0x38] sm:$0xff] %v1327_v26  ;;  %v1567_v21 = vmul.u32 %v1565_v55, %v1562_v14  ;;  %v1568_v33 = vmul.u32 %v1564_v16, %v1563_v40  ;;  %v1589_v61 = vmul.u32 %v1587_v22, %v1562_v14  ;;  %v3879_v44 = vadd.f32 %v1344_v24, %v2808_v37 }
 0x1d0   :  { %v1460_v62 = vsub.s32 %v1456_v48, %v1459_v38  ;;  %v1566_v32 = vmul.u32 %v1564_v16, %v1562_v14  ;;  %vm1360_vm15 = vcmp.lt.s32.totalorder %v3672_v58, 0  ;;  %v1529_v39 = vshrl.u32 %v2712_v45, %v3793_v18 }
 0x1d1   :  { %v1570_v0 = vshll.u32 %v1567_v21, 16  ;;  %v1569_v8 = vmul.u32 %v1565_v55, %v1563_v40  ;;  %v1572_v19 = vshll.u32 %v1568_v33, 16  ;;  %v1590_v25 = vmul.u32 %v1586_v27, %v1563_v40 }
 0x1d2   :  { %vm1461_vm0 = vcmp.lt.s32.totalorder %v1460_v62, 0  ;;  %v1462_v34 = vsub.s32 0, %v1460_v62  ;;  %v1592_v59 = vshll.u32 %v1589_v61, 16  ;;  %vm3887_vm1 = vcmp.le.f32.partialorder %v1358_v12, 0.7853982 }
 0x1d3   :  { %vm1574_vm3 = vc.u32 %v1566_v32, %v1570_v0  ;;  %v1576_v42 = vadd.s32 %v1570_v0, %v1566_v32  ;;  %v1452_v29 = vadd.s32 %v3802_v49, %v3818_v9  ;;  %v1482_v3 = vsub.s32 4, %v1458_v6 }
 0x1d4   :  { %v1463_v50 = vsel %vm1461_vm0, %v1462_v34, %v1460_v62  ;;  %v1575_v48 = vsel %vm1574_vm3, 1, %v2711_v2  ;;  %v1549_v23 = vsel %vm1545_vm11, %v1529_v39, %v3811_v35  ;;  %v1588_v31 = vmul.u32 %v1586_v27, %v1562_v14 }
 0x1d5   :  { %v1464_v43 = vclz %v1463_v50  ;;  %v1577_v18 = vadd.s32 %v1575_v48, %v1569_v8  ;;  %vm1578_vm2 = vc.u32 %v1576_v42, %v1572_v19  ;;  %v1571_v24 = vshrl.u32 %v1567_v21, 16 }
 0x1d6   :  { %v1579_v1 = vsel %vm1578_vm2, 1, %v2711_v2  ;;  %v1591_v15 = vmul.u32 %v1587_v22, %v1563_v40  ;;  %v1594_v41 = vshll.u32 %v1590_v25, 16  ;;  %vm1596_vm4 = vc.u32 %v1588_v31, %v1592_v59 }
 0x1d7   :  { %v2649_v63 = vadd.s32 4294967294, %v1464_v43  ;;  %v1581_v12 = vadd.s32 %v1579_v1, %v1577_v18  ;;  %v1598_v26 = vadd.s32 %v1592_v59, %v1588_v31  ;;  %v1668_v49 = vand.u32 2147483647, %v3879_v44 }
 0x1d8   :  { %v1550_v9 = vsel %vm1548_vm13, %v3831_v46, 2102212464  ;;  %v1597_v56 = vsel %vm1596_vm4, 1, %v2711_v2  ;;  %v1671_v35 = vand.u32 2139095040, %v3879_v44  ;;  %v1483_v22 = vsel %vm1360_vm15, %v1482_v3, %v1458_v6 }
 0x1d9   :  { %vm2650_vm5 = vcmp.lt.s32.totalorder %v2649_v63, 0  ;;  %v1582_v14 = vadd.s32 %v1581_v12, %v1571_v24  ;;  %v1599_v55 = vadd.s32 %v1597_v56, %v1591_v15  ;;  %vm1600_vm6 = vc.u32 %v1598_v26, %v1594_v41 }
 0x1da   :  { %v1467_v16 = vsel %vm2650_vm5, 0, %v2649_v63  ;;  %v1573_v21 = vshrl.u32 %v1568_v33, 16  ;;  %v1593_v27 = vshrl.u32 %v1589_v61, 16  ;;  %v1601_v32 = vsel %vm1600_vm6, 1, %v2711_v2 }
 0x1db   :  { %v1468_v38 = vsub.s32 32, %v1467_v16  ;;  %v1472_v40 = vsub.s32 4294967266, %v1467_v16  ;;  %v1672_v0 = vshrl.u32 %v1671_v35, 23  ;;  %v1675_v46 = vand.u32 8388607, %v1668_v49 }
 0x1dc   :  { %v1469_v34 = vshll.u32 %v1460_v62, %v1467_v16  ;;  %v1603_v19 = vadd.s32 %v1601_v32, %v1599_v55  ;;  %v1485_v42 = vsel %vm3887_vm1, 0, %v1483_v22  ;;  %v1551_v50 = vsel %vm1547_vm14, %v3823_v5, %v1550_v9 }
 0x1dd   :  { %v1470_v39 = vshrl.u32 %v1452_v29, %v1468_v38  ;;  %v1473_v8 = vadd.s32 127, %v1472_v40  ;;  %v1583_v6 = vadd.s32 %v1582_v14, %v1573_v21  ;;  %v2654_v33 = vadd.s32 4294967169, %v1672_v0 }
 0x1de   :  { %v1595_v59 = vshrl.u32 %v1590_v25, 16  ;;  %v1604_v43 = vadd.s32 %v1603_v19, %v1593_v27  ;;  %v3914_v18 = vadd.f32 %v1345_v52, %v2808_v37  ;;  %v1602_v62 = vadd.s32 %v1598_v26, %v1594_v41 }
 0x1df   :  { %v1471_v61 = vor.u32 %v1470_v39, %v1469_v34  ;;  %v1474_v48 = vshll.u32 %v1473_v8, 23  ;;  %v1676_v29 = vor.u32 8388608, %v1675_v46  ;;  %v1678_v3 = vadd.s32 1, %v2654_v33 }
 0x1e0   :  { %v1552_v31 = vsel %vm1546_vm12, %v1549_v23, %v1551_v50  ;;  %v1605_v63 = vadd.s32 %v1604_v43, %v1595_v59  ;;  %v1502_v24 = vadd.s32 3, %v1485_v42  ;;  %vm1608_vm7 = vc.u32 %v1583_v6, %v1602_v62 }
 0x1e1   :  { %v1475_v1 = vor.u32 4788187, %v1474_v48  ;;  %vm1679_vm8 = vcmp.gt.s32.totalorder %v1678_v3, 0  ;;  %v1478_v12 = vcvt.s32.f32 %v1471_v61  ;;  %v1606_v25 = vmul.u32 %v3769_v11, %v1552_v31 }
 0x1e2   :  { %v1609_v15 = vadd.s32 1, %v1605_v63  ;;  %v1680_v9 = vsel %vm1679_vm8, %v1678_v3, 0  ;;  %v3919_v37 = vshll.u32 %v1676_v29, 8  ;;  %v1826_v52 = vand.u32 2139095040, %v3914_v18 }
 0x1e3   :  { %v1476_v5 = vand.u32 2147483647, %v1475_v1  ;;  %v1682_v56 = vand.u32 31, %v1680_v9  ;;  %v3924_v16 = vand.u32 3, %v1502_v24  ;;  %v3926_v14 = vadd.s32 %v1602_v62, %v1583_v6 }
 0x1e4   :  { %v1610_v26 = vsel %vm1608_vm7, %v1609_v15, %v1605_v63  ;;  %v1823_v55 = vand.u32 2147483647, %v3914_v18  ;;  %v3932_v40 = vand.u32 65535, %v3919_v37  ;;  %v1827_v22 = vshrl.u32 %v1826_v52, 23 }
 0x1e5   :  { %v1479_v41 = vmul.f32 %v1478_v12, %v1476_v5  ;;  %v1611_v35 = vadd.s32 %v1610_v26, %v1606_v25  ;;  %v3922_v53 = vsub.s32 32, %v1682_v56  ;;  %v1685_v27 = vshll.u32 %v2712_v45, %v1682_v56 }
 0x1e6   :  { %v3952_v42 = vshrl.u32 %v1680_v9, 5  ;;  %v1688_v50 = vshll.u32 %v2713_v47, %v1682_v56  ;;  %v1694_v6 = vshll.u32 %v2715_v54, %v1682_v56  ;;  %v1691_v61 = vshll.u32 %v2714_v51, %v1682_v56 }
 0x1e7   :  { %v1480_v23 = vxor.u32 2147483648, %v1479_v41  ;;  %v1612_v38 = vadd.s32 536870912, %v1611_v35  ;;  %v1686_v11 = vshrl.u32 %v2713_v47, %v3922_v53  ;;  %v1689_v32 = vshrl.u32 %v2714_v51, %v3922_v53 }
 0x1e8   :  { %v1695_v0 = vshrl.u32 %v2716_v57, %v3922_v53  ;;  %v1692_v39 = vshrl.u32 %v2715_v54, %v3922_v53  ;;  %v1698_v8 = vshrl.u32 %v2717_v60, %v3922_v53  ;;  %v1697_v48 = vshll.u32 %v2716_v57, %v1682_v56 }
 0x1e9   :  { %v1481_v21 = vsel %vm1360_vm15, %v1480_v23, %v1479_v41  ;;  %v1613_v34 = vshrl.u32 %v1612_v38, 30  ;;  %v1687_v10 = vor.u32 %v1686_v11, %v1685_v27  ;;  %vm1515_vm9 = vcmp.lt.s32.totalorder %v3678_v4, 0 }
 0x1ea   :  { %v3944_v46 = vsel %vm3887_vm1, %v3672_v58, %v1481_v21  ;;  %v1690_v62 = vor.u32 %v1689_v32, %v1688_v50  ;;  %v1696_v29 = vor.u32 %v1695_v0, %v1694_v6  ;;  %v1693_v1 = vor.u32 %v1692_v39, %v1691_v61 }
 0x1eb   :  { %v1486_v19 = vmul.f32 %v3944_v46, %v3944_v46  ;;  %v1614_v33 = vshll.u32 %v1613_v34, 30  ;;  %v1699_v31 = vor.u32 %v1698_v8, %v1697_v48  ;;  %v3963_v63 = vand.u32 8388607, %v1823_v55 }
 0x1ec   :  { %v1637_v12 = vsub.s32 4, %v1613_v34  ;;  %vm1700_vm10 = vcmp.lt.s32.totalorder %v3952_v42, 1  ;;  %vm1702_vm12 = vcmp.lt.s32.totalorder %v3952_v42, 3  ;;  %vm1703_vm14 = vcmp.lt.s32.totalorder %v3952_v42, 4 }
 0x1ed   :  { %v1487_v59 = vmul.f32 -0.001358992, %v1486_v19  ;;  %v1494_v43 = vmul.f32 -0.00019511016, %v1486_v19  ;;  %v3959_v3 = vsub.s32 %v1611_v35, %v1614_v33  ;;  %v1708_v56 = vsel %vm1700_vm10, %v1687_v10, %v1690_v62 }
 0x1ee   :  { %v1709_v52 = vsel %vm1703_vm14, %v1696_v29, 920167782  ;;  %vm1701_vm13 = vcmp.lt.s32.totalorder %v3952_v42, 2  ;;  %v1712_v35 = vsel %vm1700_vm10, %v1690_v62, %v1693_v1  ;;  %vm1508_vm15 = vcmp.eq.s32.totalorder %v3924_v16, 2 }
 0x1ef   :  { %v1488_v24 = vadd.f32 0.041655596, %v1487_v59  ;;  %v1495_v5 = vadd.f32 0.008332121, %v1494_v43  ;;  %vm1616_vm11 = vcmp.lt.s32.totalorder %v3959_v3, 0  ;;  %v1617_v15 = vsub.s32 0, %v3959_v3 }
 0x1f0   :  { %v1710_v26 = vsel %vm1702_vm12, %v1693_v1, %v1709_v52  ;;  %vm1505_vm0 = vcmp.eq.s32.totalorder %v3924_v16, 0  ;;  %v1705_v27 = vsel %vm1703_vm14, %v1693_v1, 2102212464  ;;  %v1713_v32 = vsel %vm1703_vm14, %v1699_v31, 1326507024 }
 0x1f1   :  { %v1489_v9 = vmul.f32 %v1488_v24, %v1486_v19  ;;  %v1496_v25 = vmul.f32 %v1495_v5, %v1486_v19  ;;  %v1618_v41 = vsel %vm1616_vm11, %v1617_v15, %v3959_v3  ;;  %v1711_v21 = vsel %vm1701_vm13, %v1708_v56, %v1710_v26 }
 0x1f2   :  { %v1619_v11 = vclz %v1618_v41  ;;  %v1718_v0 = vshrl.u32 %v3919_v37, 16  ;;  %v3989_v39 = vadd.s32 4294967169, %v1827_v22  ;;  %vm1504_vm3 = vcmp.lt.s32.totalorder %v3924_v16, 2 }
 0x1f3   :  { %v1490_v23 = vadd.f32 -0.4999988, %v1489_v9  ;;  %v1497_v38 = vadd.f32 -0.16666654, %v1496_v25  ;;  %v1714_v33 = vsel %vm1702_vm12, %v1696_v29, %v1713_v32  ;;  %vm1501_vm1 = vweird.f32 %v3672_v58 }
 0x1f4   :  { %v2652_v6 = vadd.s32 4294967294, %v1619_v11  ;;  %v3997_v61 = vsel %vm1515_vm9, %v1637_v12, %v1613_v34  ;;  %v1684_v48 = vshrl.u32 %v2712_v45, %v3922_v53  ;;  %v1715_v22 = vsel %vm1701_vm13, %v1712_v35, %v1714_v33 }
 0x1f5   :  { %v1491_v8 = vmul.f32 %v1490_v23, %v1486_v19  ;;  %v1498_v50 = vmul.f32 %v1497_v38, %v1486_v19  ;;  %v1742_v59 = vshrl.u32 %v1711_v21, 16  ;;  %v1719_v1 = vand.u32 65535, %v1715_v22 }
 0x1f6   :  { %vm2653_vm2 = vcmp.lt.s32.totalorder %v2652_v6, 0  ;;  %v1704_v29 = vsel %vm1700_vm10, %v1684_v48, %v1687_v10  ;;  %v1706_v24 = vsel %vm1702_vm12, %v1690_v62, %v1705_v27  ;;  %v1720_v34 = vshrl.u32 %v1715_v22, 16 }
 0x1f7   :  { %v1492_v19 = vadd.f32 1.0, %v1491_v8  ;;  %v1499_v43 = vadd.f32 1.0, %v1498_v50  ;;  %v1622_v31 = vsel %vm2653_vm2, 0, %v2652_v6  ;;  %v1741_v15 = vand.u32 65535, %v1711_v21 }
 0x1f8   :  { %v1623_v53 = vsub.s32 32, %v1622_v31  ;;  %vm4010_vm4 = vcmp.le.f32.partialorder %v1513_v36, 0.7853982  ;;  %v1627_v25 = vsub.s32 4294967266, %v1622_v31  ;;  %v1722_v56 = vmul.u32 %v1720_v34, %v3932_v40 }
 0x1f9   :  { %v1500_v5 = vmul.f32 %v1499_v43, %v3944_v46  ;;  %v1509_v12 = vxor.u32 2147483648, %v1492_v19  ;;  %v1723_v52 = vmul.u32 %v1719_v1, %v1718_v0  ;;  %v1744_v10 = vmul.u32 %v1742_v59, %v3932_v40 }
 0x1fa   :  { %v1624_v62 = vshll.u32 %v3959_v3, %v1622_v31  ;;  %v1625_v46 = vshrl.u32 %v3926_v14, %v1623_v53  ;;  %v1721_v26 = vmul.u32 %v1719_v1, %v3932_v40  ;;  %v1628_v36 = vadd.s32 127, %v1627_v25 }
 0x1fb   :  { %v1506_v41 = vxor.u32 2147483648, %v1500_v5  ;;  %v1510_v35 = vsel %vm1508_vm15, %v1509_v12, %v1500_v5  ;;  %v1724_v23 = vmul.u32 %v1720_v34, %v1718_v0  ;;  %v1725_v38 = vshll.u32 %v1722_v56, 16 }
 0x1fc   :  { %v1626_v21 = vor.u32 %v1625_v46, %v1624_v62  ;;  %v1727_v27 = vshll.u32 %v1723_v52, 16  ;;  %v1745_v32 = vmul.u32 %v1741_v15, %v1718_v0  ;;  %v1629_v3 = vshll.u32 %v1628_v36, 23 }
 0x1fd   :  { %v1507_v11 = vsel %vm1505_vm0, %v1492_v19, %v1506_v41  ;;  %vm1729_vm5 = vc.u32 %v1721_v26, %v1725_v38  ;;  %v1731_v14 = vadd.s32 %v1725_v38, %v1721_v26  ;;  %v1726_v6 = vshrl.u32 %v1722_v56, 16 }
 0x1fe   :  { %v1511_v8 = vsel %vm1504_vm3, %v1507_v11, %v1510_v35  ;;  %v1730_v33 = vsel %vm1729_vm5, 1, %v2711_v2  ;;  %v1743_v48 = vmul.u32 %v1741_v15, %v3932_v40  ;;  %v1630_v22 = vor.u32 4788187, %v1629_v3 }
 0x1ff   :  { %v1512_v50 = vsel %vm1501_vm1, nan, %v1511_v8  ;;  %v1732_v43 = vadd.s32 %v1730_v33, %v1724_v23  ;;  %vm1733_vm6 = vc.u32 %v1731_v14, %v1727_v27  ;;  %v1747_v19 = vshll.u32 %v1744_v10, 16 }
 0x200   :  { %2598 = vst [vmem:[#allocation2 + $0x40] sm:$0xff] %v1512_v50  ;;  %v1633_v1 = vcvt.s32.f32 %v1626_v21  ;;  %v1734_v16 = vsel %vm1733_vm6, 1, %v2711_v2  ;;  %v1746_v31 = vmul.u32 %v1742_v59, %v1718_v0  ;;  %v1749_v34 = vshll.u32 %v1745_v32, 16 }
 0x201   :  { %v1631_v5 = vand.u32 2147483647, %v1630_v22  ;;  %v1736_v12 = vadd.s32 %v1734_v16, %v1732_v43  ;;  %vm1751_vm7 = vc.u32 %v1743_v48, %v1747_v19  ;;  %v1753_v58 = vadd.s32 %v1747_v19, %v1743_v48 }
 0x202   :  { %v1640_v53 = vsel %vm4010_vm4, 0, %v3997_v61  ;;  %v1728_v25 = vshrl.u32 %v1723_v52, 16  ;;  %v1752_v40 = vsel %vm1751_vm7, 1, %v2711_v2  ;;  %v1833_v15 = vadd.s32 1, %v3989_v39 }
 0x203   :  { %v1634_v56 = vmul.f32 %v1633_v1, %v1631_v5  ;;  %v1737_v41 = vadd.s32 %v1736_v12, %v1726_v6  ;;  %v1754_v62 = vadd.s32 %v1752_v40, %v1746_v31  ;;  %vm1755_vm8 = vc.u32 %v1753_v58, %v1749_v34 }
 0x204   :  { %v1707_v0 = vsel %vm1701_vm13, %v1704_v29, %v1706_v24  ;;  %v1748_v59 = vshrl.u32 %v1744_v10, 16  ;;  %v1756_v46 = vsel %vm1755_vm8, 1, %v2711_v2  ;;  %vm1834_vm10 = vcmp.gt.s32.totalorder %v1833_v15, 0 }
 0x205   :  { %v1635_v26 = vxor.u32 2147483648, %v1634_v56  ;;  %v4038_v35 = vadd.s32 %v1737_v41, %v1728_v25  ;;  %v1758_v61 = vadd.s32 %v1756_v46, %v1754_v62  ;;  %v1835_v52 = vsel %vm1834_vm10, %v1833_v15, 0 }
 0x206   :  { %v1346_v36 = vmul.f32 %v3651_v28, %v3092_v20  ;;  %v1831_v39 = vor.u32 8388608, %v3963_v63  ;;  %v1837_v23 = vand.u32 31, %v1835_v52  ;;  %v1750_v42 = vshrl.u32 %v1745_v32, 16 }
 0x207   :  { %v1636_v38 = vsel %vm1515_vm9, %v1635_v26, %v1634_v56  ;;  %v4045_v29 = vadd.s32 %v1753_v58, %v1749_v34  ;;  %v1759_v24 = vadd.s32 %v1758_v61, %v1748_v59  ;;  %v1657_v11 = vadd.s32 3, %v1640_v53 }
 0x208   :  { %v1639_v10 = vsel %vm4010_vm4, %v3678_v4, %v1636_v38  ;;  %v1761_v21 = vmul.u32 %v3919_v37, %v1707_v0  ;;  %v4051_v27 = vsub.s32 32, %v1837_v23  ;;  %v4055_v63 = vshrl.u32 %v1835_v52, 5 }
 0x209   :  { %v1641_v8 = vmul.f32 %v1639_v10, %v1639_v10  ;;  %v1760_v3 = vadd.s32 %v1759_v24, %v1750_v42  ;;  %vm1763_vm11 = vc.u32 %v4038_v35, %v4045_v29  ;;  %v1843_v32 = vshll.u32 %v2713_v47, %v1837_v23 }
 0x20a   :  { %v1844_v14 = vshrl.u32 %v2714_v51, %v4051_v27  ;;  %v1846_v9 = vshll.u32 %v2714_v51, %v1837_v23  ;;  %v1847_v50 = vshrl.u32 %v2715_v54, %v4051_v27  ;;  %v1850_v48 = vshrl.u32 %v2716_v57, %v4051_v27 }
 0x20b   :  { %v1642_v37 = vmul.f32 -0.001358992, %v1641_v8  ;;  %v1649_v6 = vmul.f32 -0.00019511016, %v1641_v8  ;;  %v1764_v33 = vadd.s32 1, %v1760_v3  ;;  %v1840_v22 = vshll.u32 %v2712_v45, %v1837_v23 }
 0x20c   :  { %v1841_v43 = vshrl.u32 %v2713_v47, %v4051_v27  ;;  %v4068_v19 = vor.u32 %v1844_v14, %v1843_v32  ;;  %v1849_v1 = vshll.u32 %v2715_v54, %v1837_v23  ;;  %v4074_v5 = vor.u32 %v1847_v50, %v1846_v9 }
 0x20d   :  { %v1643_v16 = vadd.f32 0.041655596, %v1642_v37  ;;  %v1650_v31 = vadd.f32 0.008332121, %v1649_v6  ;;  %v1765_v34 = vsel %vm1763_vm11, %v1764_v33, %v1760_v3  ;;  %v1852_v53 = vshll.u32 %v2716_v57, %v1837_v23 }
 0x20e   :  { %v1766_v12 = vadd.s32 %v1765_v34, %v1761_v21  ;;  %v1851_v58 = vor.u32 %v1850_v48, %v1849_v1  ;;  %v1853_v25 = vshrl.u32 %v2717_v60, %v4051_v27  ;;  %v4081_v40 = vmul.f32 %v3653_v17, %v3092_v20 }
 0x20f   :  { %v1644_v15 = vmul.f32 %v1643_v16, %v1641_v8  ;;  %v1651_v56 = vmul.f32 %v1650_v31, %v1641_v8  ;;  %v1658_v41 = vand.u32 3, %v1657_v11  ;;  %v4083_v0 = vor.u32 %v1841_v43, %v1840_v22 }
 0x210   :  { %v1767_v62 = vadd.s32 536870912, %v1766_v12  ;;  %v1854_v59 = vor.u32 %v1853_v25, %v1852_v53  ;;  %v4085_v46 = vshll.u32 %v1831_v39, 8  ;;  %vm1855_vm9 = vcmp.lt.s32.totalorder %v4055_v63, 1 }
 0x211   :  { %v1645_v26 = vadd.f32 -0.4999988, %v1644_v15  ;;  %v1652_v61 = vadd.f32 -0.16666654, %v1651_v56  ;;  %vm1858_vm12 = vcmp.lt.s32.totalorder %v4055_v63, 4  ;;  %vm1856_vm14 = vcmp.lt.s32.totalorder %v4055_v63, 2 }
 0x212   :  { %v4089_v52 = vshrl.u32 %v1767_v62, 30  ;;  %v1864_v20 = vsel %vm1858_vm12, %v1851_v58, 920167782  ;;  %v1867_v23 = vsel %vm1855_vm9, %v4068_v19, %v4074_v5  ;;  %vm1857_vm13 = vcmp.lt.s32.totalorder %v4055_v63, 3 }
 0x213   :  { %v1646_v39 = vmul.f32 %v1645_v26, %v1641_v8  ;;  %v1653_v38 = vmul.f32 %v1652_v61, %v1641_v8  ;;  %v1868_v42 = vsel %vm1858_vm12, %v1854_v59, 1326507024  ;;  %v1863_v11 = vsel %vm1855_vm9, %v4083_v0, %v4068_v19 }
 0x214   :  { %v1769_v24 = vshll.u32 %v4089_v52, 30  ;;  %v1865_v21 = vsel %vm1857_vm13, %v4074_v5, %v1864_v20  ;;  %v1869_v3 = vsel %vm1857_vm13, %v1851_v58, %v1868_v42  ;;  %v4112_v8 = vadd.f32 %v1346_v36, %v3102_v13 }
 0x215   :  { %v1647_v32 = vadd.f32 1.0, %v1646_v39  ;;  %v1654_v14 = vadd.f32 1.0, %v1653_v38  ;;  %v1870_v9 = vsel %vm1856_vm14, %v1867_v23, %v1869_v3  ;;  %v1872_v37 = vand.u32 65535, %v4085_v46 }
 0x216   :  { %v4116_v50 = vsub.s32 %v1766_v12, %v1769_v24  ;;  %v1874_v6 = vand.u32 65535, %v1870_v9  ;;  %v1875_v33 = vshrl.u32 %v1870_v9, 16  ;;  %v1866_v43 = vsel %vm1856_vm14, %v1863_v11, %v1865_v21 }
 0x217   :  { %v1655_v48 = vmul.f32 %v1654_v14, %v1639_v10  ;;  %v1664_v22 = vxor.u32 2147483648, %v1647_v32  ;;  %v1873_v1 = vshrl.u32 %v4085_v46, 16  ;;  %vm1656_vm15 = vweird.f32 %v3678_v4 }
 0x218   :  { %vm1659_vm0 = vcmp.lt.s32.totalorder %v1658_v41, 2  ;;  %vm1771_vm3 = vcmp.lt.s32.totalorder %v4116_v50, 0  ;;  %v1772_v36 = vsub.s32 0, %v4116_v50  ;;  %vm1660_vm1 = vcmp.eq.s32.totalorder %v1658_v41, 0 }
 0x219   :  { %v1661_v16 = vxor.u32 2147483648, %v1655_v48  ;;  %v1877_v31 = vmul.u32 %v1875_v33, %v1872_v37  ;;  %v1878_v34 = vmul.u32 %v1874_v6, %v1873_v1  ;;  %vm1663_vm2 = vcmp.eq.s32.totalorder %v1658_v41, 2 }
 0x21a   :  { %v1773_v10 = vsel %vm1771_vm3, %v1772_v36, %v4116_v50  ;;  %v1896_v12 = vand.u32 65535, %v1866_v43  ;;  %v1897_v58 = vshrl.u32 %v1866_v43, 16  ;;  %v1665_v25 = vsel %vm1663_vm2, %v1664_v22, %v1655_v48 }
 0x21b   :  { %v1662_v53 = vsel %vm1660_vm1, %v1647_v32, %v1661_v16  ;;  %v1774_v15 = vclz %v1773_v10  ;;  %v1880_v56 = vshll.u32 %v1877_v31, 16  ;;  %v1762_v59 = vadd.s32 %v4045_v29, %v4038_v35 }
 0x21c   :  { %v1666_v62 = vsel %vm1659_vm0, %v1662_v53, %v1665_v25  ;;  %v1876_v26 = vmul.u32 %v1874_v6, %v1872_v37  ;;  %v1978_v61 = vand.u32 2147483647, %v4112_v8  ;;  %v1879_v41 = vmul.u32 %v1875_v33, %v1873_v1 }
 0x21d   :  { %v1667_v20 = vsel %vm1656_vm15, nan, %v1666_v62  ;;  %v2655_v23 = vadd.s32 4294967294, %v1774_v15  ;;  %v1882_v39 = vshll.u32 %v1878_v34, 16  ;;  %v1899_v42 = vmul.u32 %v1897_v58, %v1872_v37 }
 0x21e   :  { %vm1884_vm4 = vc.u32 %v1876_v26, %v1880_v56  ;;  %v1886_v38 = vadd.s32 %v1880_v56, %v1876_v26  ;;  %v1900_v24 = vmul.u32 %v1896_v12, %v1873_v1  ;;  %2599 = vst [vmem:[#allocation2 + $0x48] sm:$0xff] %v1667_v20  ;;  %vm1670_vm5 = vcmp.lt.s32.totalorder %v3879_v44, 0 }
 0x21f   :  { %vm2656_vm6 = vcmp.lt.s32.totalorder %v2655_v23, 0  ;;  %v1839_v35 = vshrl.u32 %v2712_v45, %v4051_v27  ;;  %v1885_v29 = vsel %vm1884_vm4, 1, %v2711_v2  ;;  %v1898_v11 = vmul.u32 %v1896_v12, %v1872_v37 }
 0x220   :  { %v1777_v21 = vsel %vm2656_vm6, 0, %v2655_v23  ;;  %v1887_v4 = vadd.s32 %v1885_v29, %v1879_v41  ;;  %vm1888_vm7 = vc.u32 %v1886_v38, %v1882_v39  ;;  %v1902_v3 = vshll.u32 %v1899_v42, 16 }
 0x221   :  { %v1778_v32 = vsub.s32 32, %v1777_v21  ;;  %v1782_v14 = vsub.s32 4294967266, %v1777_v21  ;;  %v1881_v9 = vshrl.u32 %v1877_v31, 16  ;;  %v1889_v6 = vsel %vm1888_vm7, 1, %v2711_v2 }
 0x222   :  { %v1779_v33 = vshll.u32 %v4116_v50, %v1777_v21  ;;  %v1891_v48 = vadd.s32 %v1889_v6, %v1887_v4  ;;  %v1901_v22 = vmul.u32 %v1897_v58, %v1873_v1  ;;  %v1904_v43 = vshll.u32 %v1900_v24, 16 }
 0x223   :  { %v1780_v36 = vshrl.u32 %v1762_v59, %v1778_v32  ;;  %v1783_v16 = vadd.s32 127, %v1782_v14  ;;  %vm1906_vm8 = vc.u32 %v1898_v11, %v1902_v3  ;;  %v1908_v27 = vadd.s32 %v1902_v3, %v1898_v11 }
 0x224   :  { %v1792_v37 = vsub.s32 4, %v4089_v52  ;;  %v1860_v10 = vsel %vm1858_vm12, %v4074_v5, 2102212464  ;;  %v1892_v12 = vadd.s32 %v1891_v48, %v1881_v9  ;;  %v1907_v31 = vsel %vm1906_vm8, 1, %v2711_v2 }
 0x225   :  { %v1781_v53 = vor.u32 %v1780_v36, %v1779_v33  ;;  %v1784_v25 = vshll.u32 %v1783_v16, 23  ;;  %v1909_v15 = vadd.s32 %v1907_v31, %v1901_v22  ;;  %vm1910_vm10 = vc.u32 %v1908_v27, %v1904_v43 }
 0x226   :  { %v1859_v50 = vsel %vm1855_vm9, %v1839_v35, %v4083_v0  ;;  %v1883_v1 = vshrl.u32 %v1878_v34, 16  ;;  %v1911_v58 = vsel %vm1910_vm10, 1, %v2711_v2  ;;  %v1981_v56 = vand.u32 2139095040, %v4112_v8 }
 0x227   :  { %v1785_v62 = vor.u32 4788187, %v1784_v25  ;;  %v1861_v5 = vsel %vm1857_vm13, %v4068_v19, %v1860_v10  ;;  %v1903_v59 = vshrl.u32 %v1899_v42, 16  ;;  %v1913_v26 = vadd.s32 %v1911_v58, %v1909_v15 }
 0x228   :  { %v1793_v20 = vsel %vm1670_vm5, %v1792_v37, %v4089_v52  ;;  %v1893_v23 = vadd.s32 %v1892_v12, %v1883_v1  ;;  %v1905_v41 = vshrl.u32 %v1900_v24, 16  ;;  %v1982_v39 = vshrl.u32 %v1981_v56, 23 }
 0x229   :  { %v1786_v0 = vand.u32 2147483647, %v1785_v62  ;;  %v1788_v34 = vcvt.s32.f32 %v1781_v53  ;;  %v1914_v38 = vadd.s32 %v1913_v26, %v1903_v59  ;;  %v1985_v35 = vand.u32 8388607, %v1978_v61 }
 0x22a   :  { %v4157_v29 = vadd.f32 %v4081_v40, %v3102_v13  ;;  %v1912_v19 = vadd.s32 %v1908_v27, %v1904_v43  ;;  %v2660_v42 = vadd.s32 4294967169, %v1982_v39  ;;  %vm4161_vm11 = vcmp.le.f32.partialorder %v1668_v49, 0.7853982 }
 0x22b   :  { %v1789_v52 = vmul.f32 %v1788_v34, %v1786_v0  ;;  %v1862_v24 = vsel %vm1856_vm14, %v1859_v50, %v1861_v5  ;;  %v1915_v21 = vadd.s32 %v1914_v38, %v1905_v41  ;;  %v1795_v4 = vsel %vm4161_vm11, 0, %v1793_v20 }
 0x22c   :  { %vm1918_vm9 = vc.u32 %v1893_v23, %v1912_v19  ;;  %v1988_v3 = vadd.s32 1, %v2660_v42  ;;  %v1986_v32 = vor.u32 8388608, %v1985_v35  ;;  %v1916_v14 = vmul.u32 %v4085_v46, %v1862_v24 }
 0x22d   :  { %v1790_v13 = vxor.u32 2147483648, %v1789_v52  ;;  %v1919_v40 = vadd.s32 1, %v1915_v21  ;;  %v2136_v49 = vand.u32 2139095040, %v4157_v29  ;;  %v1812_v6 = vadd.s32 3, %v1795_v4 }
 0x22e   :  { %vm1989_vm12 = vcmp.gt.s32.totalorder %v1988_v3, 0  ;;  %v2133_v36 = vand.u32 2147483647, %v4157_v29  ;;  %v4177_v27 = vshll.u32 %v1986_v32, 8  ;;  %v4183_v25 = vadd.s32 %v1912_v19, %v1893_v23 }
 0x22f   :  { %v1791_v9 = vsel %vm1670_vm5, %v1790_v13, %v1789_v52  ;;  %v1920_v63 = vsel %vm1918_vm9, %v1919_v40, %v1915_v21  ;;  %v1990_v33 = vsel %vm1989_vm12, %v1988_v3, 0  ;;  %v2137_v37 = vshrl.u32 %v2136_v49, 23 }
 0x230   :  { %v1794_v48 = vsel %vm4161_vm11, %v3879_v44, %v1791_v9  ;;  %v1921_v22 = vadd.s32 %v1920_v63, %v1916_v14  ;;  %v1992_v43 = vand.u32 31, %v1990_v33  ;;  %v4181_v53 = vand.u32 3, %v1812_v6 }
 0x231   :  { %v1796_v16 = vmul.f32 %v1794_v48, %v1794_v48  ;;  %v4189_v50 = vand.u32 8388607, %v2133_v36  ;;  %v4192_v56 = vand.u32 65535, %v4177_v27  ;;  %v4195_v62 = vshrl.u32 %v4177_v27, 16 }
 0x232   :  { %v1922_v46 = vadd.s32 536870912, %v1921_v22  ;;  %v4179_v31 = vsub.s32 32, %v1992_v43  ;;  %v4198_v59 = vshrl.u32 %v1990_v33, 5  ;;  %v1995_v26 = vshll.u32 %v2712_v45, %v1992_v43 }
 0x233   :  { %v1797_v10 = vmul.f32 -0.001358992, %v1796_v16  ;;  %v1804_v12 = vmul.f32 -0.00019511016, %v1796_v16  ;;  %v2663_v20 = vadd.s32 4294967169, %v2137_v37  ;;  %vm1818_vm14 = vcmp.eq.s32.totalorder %v4181_v53, 2 }
 0x234   :  { %v4185_v15 = vshrl.u32 %v1922_v46, 30  ;;  %v1996_v39 = vshrl.u32 %v2713_v47, %v4179_v31  ;;  %v1999_v0 = vshrl.u32 %v2714_v51, %v4179_v31  ;;  %v2002_v38 = vshrl.u32 %v2715_v54, %v4179_v31 }
 0x235   :  { %v1798_v1 = vadd.f32 0.041655596, %v1797_v10  ;;  %v1805_v58 = vadd.f32 0.008332121, %v1804_v12  ;;  %v2005_v35 = vshrl.u32 %v2716_v57, %v4179_v31  ;;  %v2008_v19 = vshrl.u32 %v2717_v60, %v4179_v31 }
 0x236   :  { %v1924_v5 = vshll.u32 %v4185_v15, 30  ;;  %v1998_v52 = vshll.u32 %v2713_v47, %v1992_v43  ;;  %v2001_v24 = vshll.u32 %v2714_v51, %v1992_v43  ;;  %vm1815_vm13 = vcmp.eq.s32.totalorder %v4181_v53, 0 }
 0x237   :  { %v1799_v23 = vmul.f32 %v1798_v1, %v1796_v16  ;;  %v1806_v41 = vmul.f32 %v1805_v58, %v1796_v16  ;;  %v2004_v4 = vshll.u32 %v2715_v54, %v1992_v43  ;;  %v2007_v3 = vshll.u32 %v2716_v57, %v1992_v43 }
 0x238   :  { %v4205_v34 = vsub.s32 %v1921_v22, %v1924_v5  ;;  %vm1814_vm0 = vcmp.lt.s32.totalorder %v4181_v53, 2  ;;  %v1997_v32 = vor.u32 %v1996_v39, %v1995_v26  ;;  %v2000_v14 = vor.u32 %v1999_v0, %v1998_v52 }
 0x239   :  { %v1800_v42 = vadd.f32 -0.4999988, %v1799_v23  ;;  %v1807_v11 = vadd.f32 -0.16666654, %v1806_v41  ;;  %vm1811_vm3 = vweird.f32 %v3879_v44  ;;  %v2003_v9 = vor.u32 %v2002_v38, %v2001_v24 }
 0x23a   :  { %vm1926_vm15 = vcmp.lt.s32.totalorder %v4205_v34, 0  ;;  %v1927_v21 = vsub.s32 0, %v4205_v34  ;;  %v2006_v6 = vor.u32 %v2005_v35, %v2004_v4  ;;  %v2009_v63 = vor.u32 %v2008_v19, %v2007_v3 }
 0x23b   :  { %v1801_v13 = vmul.f32 %v1800_v42, %v1796_v16  ;;  %v1808_v40 = vmul.f32 %v1807_v11, %v1796_v16  ;;  %vm1825_vm1 = vcmp.lt.s32.totalorder %v3914_v18, 0  ;;  %v4225_v37 = vadd.s32 1, %v2663_v20 }
 0x23c   :  { %v1928_v49 = vsel %vm1926_vm15, %v1927_v21, %v4205_v34  ;;  %v1947_v43 = vsub.s32 4, %v4185_v15  ;;  %vm2010_vm2 = vcmp.lt.s32.totalorder %v4198_v59, 1  ;;  %vm2011_vm4 = vcmp.lt.s32.totalorder %v4198_v59, 2 }
 0x23d   :  { %v1802_v33 = vadd.f32 1.0, %v1801_v13  ;;  %v1809_v22 = vadd.f32 1.0, %v1808_v40  ;;  %v1929_v46 = vclz %v1928_v49  ;;  %vm2012_vm5 = vcmp.lt.s32.totalorder %v4198_v59, 3 }
 0x23e   :  { %vm2013_vm6 = vcmp.lt.s32.totalorder %v4198_v59, 4  ;;  %v2018_v58 = vsel %vm2010_vm2, %v1997_v32, %v2000_v14  ;;  %v2022_v41 = vsel %vm2010_vm2, %v2000_v14, %v2003_v9  ;;  %v1994_v53 = vshrl.u32 %v2712_v45, %v4179_v31 }
 0x23f   :  { %v1810_v16 = vmul.f32 %v1809_v22, %v1794_v48  ;;  %v1819_v10 = vxor.u32 2147483648, %v1802_v33  ;;  %v2658_v12 = vadd.s32 4294967294, %v1929_v46  ;;  %v2015_v1 = vsel %vm2013_vm6, %v2003_v9, 2102212464 }
 0x240   :  { %v2019_v5 = vsel %vm2013_vm6, %v2006_v6, 920167782  ;;  %v2023_v26 = vsel %vm2013_vm6, %v2009_v63, 1326507024  ;;  %vm4262_vm8 = vcmp.le.f32.partialorder %v1823_v55, 0.7853982  ;;  %v2016_v31 = vsel %vm2012_vm5, %v2000_v14, %v2015_v1 }
 0x241   :  { %v1816_v20 = vxor.u32 2147483648, %v1810_v16  ;;  %vm2659_vm7 = vcmp.lt.s32.totalorder %v2658_v12, 0  ;;  %v2020_v23 = vsel %vm2012_vm5, %v2003_v9, %v2019_v5  ;;  %v1820_v48 = vsel %vm1818_vm14, %v1819_v10, %v1810_v16 }
 0x242   :  { %v1932_v39 = vsel %vm2659_vm7, 0, %v2658_v12  ;;  %v2021_v0 = vsel %vm2011_vm4, %v2018_v58, %v2020_v23  ;;  %v2024_v38 = vsel %vm2012_vm5, %v2006_v6, %v2023_v26  ;;  %vm2144_vm9 = vcmp.gt.s32.totalorder %v4225_v37, 0 }
 0x243   :  { %v1817_v35 = vsel %vm1815_vm13, %v1802_v33, %v1816_v20  ;;  %v1933_v19 = vsub.s32 32, %v1932_v39  ;;  %v1934_v42 = vshll.u32 %v4205_v34, %v1932_v39  ;;  %v1937_v11 = vsub.s32 4294967266, %v1932_v39 }
 0x244   :  { %v1821_v52 = vsel %vm1814_vm0, %v1817_v35, %v1820_v48  ;;  %v2025_v24 = vsel %vm2011_vm4, %v2022_v41, %v2024_v38  ;;  %v2051_v21 = vand.u32 65535, %v2021_v0  ;;  %v2052_v4 = vshrl.u32 %v2021_v0, 16 }
 0x245   :  { %v1822_v3 = vsel %vm1811_vm3, nan, %v1821_v52  ;;  %v1935_v13 = vshrl.u32 %v4183_v25, %v1933_v19  ;;  %v1938_v40 = vadd.s32 127, %v1937_v11  ;;  %v2029_v49 = vand.u32 65535, %v2025_v24 }
 0x246   :  { %v1948_v34 = vsel %vm1825_vm1, %v1947_v43, %v4185_v15  ;;  %v2030_v9 = vshrl.u32 %v2025_v24, 16  ;;  %v2054_v6 = vmul.u32 %v2052_v4, %v4192_v56  ;;  %2600 = vst [vmem:[#allocation2 + $0x50] sm:$0xff] %v1822_v3  ;;  %v2055_v22 = vmul.u32 %v2051_v21, %v4195_v62 }
 0x247   :  { %v1936_v25 = vor.u32 %v1935_v13, %v1934_v42  ;;  %v1939_v63 = vshll.u32 %v1938_v40, 23  ;;  %v2033_v33 = vmul.u32 %v2029_v49, %v4195_v62  ;;  %v2014_v15 = vsel %vm2010_vm2, %v1994_v53, %v1997_v32 }
 0x248   :  { %v2032_v46 = vmul.u32 %v2030_v9, %v4192_v56  ;;  %v2057_v43 = vshll.u32 %v2054_v6, 16  ;;  %v2031_v55 = vmul.u32 %v2029_v49, %v4192_v56  ;;  %v2034_v10 = vmul.u32 %v2030_v9, %v4195_v62 }
 0x249   :  { %v1940_v16 = vor.u32 4788187, %v1939_v63  ;;  %v2053_v12 = vmul.u32 %v2051_v21, %v4192_v56  ;;  %v1943_v58 = vcvt.s32.f32 %v1936_v25  ;;  %v2037_v26 = vshll.u32 %v2033_v33, 16 }
 0x24a   :  { %v2035_v5 = vshll.u32 %v2032_v46, 16  ;;  %v2056_v20 = vmul.u32 %v2052_v4, %v4195_v62  ;;  %v2059_v32 = vshll.u32 %v2055_v22, 16  ;;  %v2058_v38 = vshrl.u32 %v2054_v6, 16 }
 0x24b   :  { %v1941_v23 = vand.u32 2147483647, %v1940_v16  ;;  %vm2061_vm10 = vc.u32 %v2053_v12, %v2057_v43  ;;  %v2063_v41 = vadd.s32 %v2057_v43, %v2053_v12  ;;  %v2145_v11 = vsel %vm2144_vm9, %v4225_v37, 0 }
 0x24c   :  { %vm2039_vm11 = vc.u32 %v2031_v55, %v2035_v5  ;;  %v2041_v14 = vadd.s32 %v2035_v5, %v2031_v55  ;;  %v2062_v1 = vsel %vm2061_vm10, 1, %v2711_v2  ;;  %v1950_v52 = vsel %vm4262_vm8, 0, %v1948_v34 }
 0x24d   :  { %v1944_v48 = vmul.f32 %v1943_v58, %v1941_v23  ;;  %v2040_v39 = vsel %vm2039_vm11, 1, %v2711_v2  ;;  %v2064_v0 = vadd.s32 %v2062_v1, %v2056_v20  ;;  %vm2065_vm12 = vc.u32 %v2063_v41, %v2059_v32 }
 0x24e   :  { %v2042_v56 = vadd.s32 %v2040_v39, %v2034_v10  ;;  %vm2043_vm14 = vc.u32 %v2041_v14, %v2037_v26  ;;  %v2066_v62 = vsel %vm2065_vm12, 1, %v2711_v2  ;;  %v2036_v24 = vshrl.u32 %v2032_v46, 16 }
 0x24f   :  { %v1945_v35 = vxor.u32 2147483648, %v1944_v48  ;;  %v2044_v19 = vsel %vm2043_vm14, 1, %v2711_v2  ;;  %v2068_v42 = vadd.s32 %v2066_v62, %v2064_v0  ;;  %v2147_v4 = vand.u32 31, %v2145_v11 }
 0x250   :  { %v2046_v21 = vadd.s32 %v2044_v19, %v2042_v56  ;;  %v2017_v13 = vsel %vm2011_vm4, %v2014_v15, %v2016_v31  ;;  %v2060_v40 = vshrl.u32 %v2055_v22, 16  ;;  %v2038_v9 = vshrl.u32 %v2033_v33, 16 }
 0x251   :  { %v1946_v3 = vsel %vm1825_vm1, %v1945_v35, %v1944_v48  ;;  %v2069_v49 = vadd.s32 %v2068_v42, %v2058_v38  ;;  %v4292_v6 = vsub.s32 32, %v2147_v4  ;;  %v1348_v34 = vmul.f32 %v3651_v28, %v3326_v30 }
 0x252   :  { %v1949_v53 = vsel %vm4262_vm8, %v3914_v18, %v1946_v3  ;;  %v2047_v37 = vadd.s32 %v2046_v21, %v2036_v24  ;;  %v4298_v25 = vmul.f32 %v3653_v17, %v3326_v30  ;;  %v1967_v15 = vadd.s32 3, %v1950_v52 }
 0x253   :  { %v1951_v63 = vmul.f32 %v1949_v53, %v1949_v53  ;;  %v2070_v59 = vadd.s32 %v2069_v49, %v2060_v40  ;;  %v4302_v31 = vadd.s32 %v2063_v41, %v2059_v32  ;;  %v2141_v44 = vor.u32 8388608, %v4189_v50 }
 0x254   :  { %v4300_v22 = vadd.s32 %v2047_v37, %v2038_v9  ;;  %v2071_v43 = vmul.u32 %v4177_v27, %v2017_v13  ;;  %v4308_v28 = vshrl.u32 %v2145_v11, 5  ;;  %v2153_v30 = vshll.u32 %v2713_v47, %v2147_v4 }
 0x255   :  { %v1952_v33 = vmul.f32 -0.001358992, %v1951_v63  ;;  %v1959_v46 = vmul.f32 -0.00019511016, %v1951_v63  ;;  %v2074_v16 = vadd.s32 1, %v2070_v59  ;;  %v2154_v17 = vshrl.u32 %v2714_v51, %v4292_v6 }
 0x256   :  { %vm2073_vm13 = vc.u32 %v4300_v22, %v4302_v31  ;;  %v2157_v50 = vshrl.u32 %v2715_v54, %v4292_v6  ;;  %v2151_v27 = vshrl.u32 %v2713_v47, %v4292_v6  ;;  %v2159_v5 = vshll.u32 %v2715_v54, %v2147_v4 }
 0x257   :  { %v1953_v55 = vadd.f32 0.041655596, %v1952_v33  ;;  %v1960_v10 = vadd.f32 0.008332121, %v1959_v46  ;;  %v2075_v12 = vsel %vm2073_vm13, %v2074_v16, %v2070_v59  ;;  %v2160_v26 = vshrl.u32 %v2716_v57, %v4292_v6 }
 0x258   :  { %v2076_v58 = vadd.s32 %v2075_v12, %v2071_v43  ;;  %v2156_v32 = vshll.u32 %v2714_v51, %v2147_v4  ;;  %v2163_v41 = vshrl.u32 %v2717_v60, %v4292_v6  ;;  %v2150_v1 = vshll.u32 %v2712_v45, %v2147_v4 }
 0x259   :  { %v1954_v20 = vmul.f32 %v1953_v55, %v1951_v63  ;;  %v1961_v23 = vmul.f32 %v1960_v10, %v1951_v63  ;;  %v2161_v48 = vor.u32 %v2160_v26, %v2159_v5  ;;  %v2162_v39 = vshll.u32 %v2716_v57, %v2147_v4 }
 0x25a   :  { %v2077_v14 = vadd.s32 536870912, %v2076_v58  ;;  %v4325_v38 = vor.u32 %v2154_v17, %v2153_v30  ;;  %v2158_v62 = vor.u32 %v2157_v50, %v2156_v32  ;;  %v2152_v19 = vor.u32 %v2151_v27, %v2150_v1 }
 0x25b   :  { %v1955_v0 = vadd.f32 -0.4999988, %v1954_v20  ;;  %v1962_v56 = vadd.f32 -0.16666654, %v1961_v23  ;;  %v2164_v42 = vor.u32 %v2163_v41, %v2162_v39  ;;  %vm2168_vm15 = vcmp.lt.s32.totalorder %v4308_v28, 4 }
 0x25c   :  { %v4327_v35 = vshrl.u32 %v2077_v14, 30  ;;  %v4331_v11 = vadd.f32 %v1348_v34, %v3367_v7  ;;  %v2174_v21 = vsel %vm2168_vm15, %v2161_v48, 920167782  ;;  %vm1966_vm0 = vweird.f32 %v3914_v18 }
 0x25d   :  { %v1956_v52 = vmul.f32 %v1955_v0, %v1951_v63  ;;  %v1963_v24 = vmul.f32 %v1962_v56, %v1951_v63  ;;  %v1968_v4 = vand.u32 3, %v1967_v15  ;;  %vm2165_vm3 = vcmp.lt.s32.totalorder %v4308_v28, 1 }
 0x25e   :  { %v2079_v3 = vshll.u32 %v4327_v35, 30  ;;  %v4338_v13 = vshll.u32 %v2141_v44, 8  ;;  %vm2167_vm1 = vcmp.lt.s32.totalorder %v4308_v28, 3  ;;  %v2177_v9 = vsel %vm2165_vm3, %v4325_v38, %v2158_v62 }
 0x25f   :  { %v1957_v40 = vadd.f32 1.0, %v1956_v52  ;;  %v1964_v49 = vadd.f32 1.0, %v1963_v24  ;;  %v2173_v34 = vsel %vm2165_vm3, %v2152_v19, %v4325_v38  ;;  %v2175_v63 = vsel %vm2167_vm1, %v2158_v62, %v2174_v21 }
 0x260   :  { %v4344_v37 = vsub.s32 %v2076_v58, %v2079_v3  ;;  %v2178_v59 = vsel %vm2168_vm15, %v2164_v42, 1326507024  ;;  %vm2166_vm2 = vcmp.lt.s32.totalorder %v4308_v28, 2  ;;  %vm1969_vm4 = vcmp.lt.s32.totalorder %v1968_v4, 2 }
 0x261   :  { %v1965_v15 = vmul.f32 %v1964_v49, %v1949_v53  ;;  %v1974_v44 = vxor.u32 2147483648, %v1957_v40  ;;  %v2179_v33 = vsel %vm2167_vm1, %v2161_v48, %v2178_v59  ;;  %vm1970_vm6 = vcmp.eq.s32.totalorder %v1968_v4, 0 }
 0x262   :  { %vm2081_vm5 = vcmp.lt.s32.totalorder %v4344_v37, 0  ;;  %v2082_v46 = vsub.s32 0, %v4344_v37  ;;  %v2180_v43 = vsel %vm2166_vm2, %v2177_v9, %v2179_v33  ;;  %v2176_v30 = vsel %vm2166_vm2, %v2173_v34, %v2175_v63 }
 0x263   :  { %v1971_v16 = vxor.u32 2147483648, %v1965_v15  ;;  %v2184_v53 = vand.u32 65535, %v2180_v43  ;;  %vm1973_vm7 = vcmp.eq.s32.totalorder %v1968_v4, 2  ;;  %v2183_v55 = vshrl.u32 %v4338_v13, 16 }
 0x264   :  { %v2083_v17 = vsel %vm2081_vm5, %v2082_v46, %v4344_v37  ;;  %v2185_v10 = vshrl.u32 %v2180_v43, 16  ;;  %v1975_v50 = vsel %vm1973_vm7, %v1974_v44, %v1965_v15  ;;  %v2182_v27 = vand.u32 65535, %v4338_v13 }
 0x265   :  { %v1972_v12 = vsel %vm1970_vm6, %v1957_v40, %v1971_v16  ;;  %v2084_v58 = vclz %v2083_v17  ;;  %v2149_v26 = vshrl.u32 %v2712_v45, %v4292_v6  ;;  %v2188_v20 = vmul.u32 %v2184_v53, %v2183_v55 }
 0x266   :  { %v1976_v5 = vsel %vm1969_vm4, %v1972_v12, %v1975_v50  ;;  %v2206_v23 = vand.u32 65535, %v2176_v30  ;;  %v2187_v14 = vmul.u32 %v2185_v10, %v2182_v27  ;;  %v2288_v1 = vand.u32 2147483647, %v4331_v11 }
 0x267   :  { %v1977_v32 = vsel %vm1966_vm0, nan, %v1976_v5  ;;  %v2661_v41 = vadd.s32 4294967294, %v2084_v58  ;;  %v2072_v48 = vadd.s32 %v4302_v31, %v4300_v22  ;;  %v2169_v39 = vsel %vm2165_vm3, %v2149_v26, %v2152_v19 }
 0x268   :  { %v2170_v0 = vsel %vm2168_vm15, %v2158_v62, 2102212464  ;;  %v2207_v56 = vshrl.u32 %v2176_v30, 16  ;;  %2601 = vst [vmem:[#allocation2 + $0x58] sm:$0xff] %v1977_v32  ;;  %v2186_v6 = vmul.u32 %v2184_v53, %v2182_v27  ;;  %v2189_v42 = vmul.u32 %v2185_v10, %v2183_v55 }
 0x269   :  { %vm2662_vm8 = vcmp.lt.s32.totalorder %v2661_v41, 0  ;;  %v2190_v18 = vshll.u32 %v2187_v14, 16  ;;  %v2192_v24 = vshll.u32 %v2188_v20, 16  ;;  %v2210_v4 = vmul.u32 %v2206_v23, %v2183_v55 }
 0x26a   :  { %v2087_v52 = vsel %vm2662_vm8, 0, %v2661_v41  ;;  %v2209_v21 = vmul.u32 %v2207_v56, %v2182_v27  ;;  %v2208_v22 = vmul.u32 %v2206_v23, %v2182_v27  ;;  %vm1980_vm11 = vcmp.lt.s32.totalorder %v4112_v8, 0 }
 0x26b   :  { %v2088_v3 = vsub.s32 32, %v2087_v52  ;;  %v2092_v40 = vsub.s32 4294967266, %v2087_v52  ;;  %vm2194_vm10 = vc.u32 %v2186_v6, %v2190_v18  ;;  %v2196_v19 = vadd.s32 %v2190_v18, %v2186_v6 }
 0x26c   :  { %v2195_v31 = vsel %vm2194_vm10, 1, %v2711_v2  ;;  %v2211_v62 = vmul.u32 %v2207_v56, %v2183_v55  ;;  %v2212_v49 = vshll.u32 %v2209_v21, 16  ;;  %v2089_v9 = vshll.u32 %v4344_v37, %v2087_v52 }
 0x26d   :  { %v2090_v34 = vshrl.u32 %v2072_v48, %v2088_v3  ;;  %v2093_v63 = vadd.s32 127, %v2092_v40  ;;  %v2197_v59 = vadd.s32 %v2195_v31, %v2189_v42  ;;  %vm2198_vm9 = vc.u32 %v2196_v19, %v2192_v24 }
 0x26e   :  { %v2214_v15 = vshll.u32 %v2210_v4, 16  ;;  %vm2216_vm12 = vc.u32 %v2208_v22, %v2212_v49  ;;  %v2218_v44 = vadd.s32 %v2212_v49, %v2208_v22  ;;  %v2199_v43 = vsel %vm2198_vm9, 1, %v2711_v2 }
 0x26f   :  { %v2091_v33 = vor.u32 %v2090_v34, %v2089_v9  ;;  %v2094_v46 = vshll.u32 %v2093_v63, 23  ;;  %v2217_v16 = vsel %vm2216_vm12, 1, %v2711_v2  ;;  %v2191_v30 = vshrl.u32 %v2187_v14, 16 }
 0x270   :  { %v2201_v53 = vadd.s32 %v2199_v43, %v2197_v59  ;;  %v2219_v17 = vadd.s32 %v2217_v16, %v2211_v62  ;;  %vm2220_vm14 = vc.u32 %v2218_v44, %v2214_v15  ;;  %v2102_v37 = vsub.s32 4, %v4327_v35 }
 0x271   :  { %v2095_v55 = vor.u32 4788187, %v2094_v46  ;;  %v2193_v10 = vshrl.u32 %v2188_v20, 16  ;;  %v2221_v12 = vsel %vm2220_vm14, 1, %v2711_v2  ;;  %v2213_v58 = vshrl.u32 %v2209_v21, 16 }
 0x272   :  { %v2202_v50 = vadd.s32 %v2201_v53, %v2191_v30  ;;  %v2223_v27 = vadd.s32 %v2221_v12, %v2219_v17  ;;  %v2291_v5 = vand.u32 2139095040, %v4331_v11  ;;  %v2098_v23 = vcvt.s32.f32 %v2091_v33 }
 0x273   :  { %v2096_v26 = vand.u32 2147483647, %v2095_v55  ;;  %v2171_v32 = vsel %vm2167_vm1, %v4325_v38, %v2170_v0  ;;  %v2215_v41 = vshrl.u32 %v2210_v4, 16  ;;  %v2295_v20 = vand.u32 8388607, %v2288_v1 }
 0x274   :  { %v2203_v14 = vadd.s32 %v2202_v50, %v2193_v10  ;;  %v2224_v48 = vadd.s32 %v2223_v27, %v2213_v58  ;;  %v2292_v56 = vshrl.u32 %v2291_v5, 23  ;;  %v4392_v6 = vadd.f32 %v4298_v25, %v3367_v7 }
 0x275   :  { %v2099_v42 = vmul.f32 %v2098_v23, %v2096_v26  ;;  %v2103_v18 = vsel %vm1980_vm11, %v2102_v37, %v4327_v35  ;;  %v2222_v52 = vadd.s32 %v2218_v44, %v2214_v15  ;;  %v2172_v38 = vsel %vm2166_vm2, %v2169_v39, %v2171_v32 }
 0x276   :  { %v2225_v0 = vadd.s32 %v2224_v48, %v2215_v41  ;;  %v2666_v24 = vadd.s32 4294967169, %v2292_v56  ;;  %vm1979_vm13 = vcmp.le.f32.partialorder %v1978_v61, 0.7853982  ;;  %v2296_v7 = vor.u32 8388608, %v2295_v20 }
 0x277   :  { %v2100_v21 = vxor.u32 2147483648, %v2099_v42  ;;  %vm2228_vm15 = vc.u32 %v2203_v14, %v2222_v52  ;;  %v2105_v4 = vsel %vm1979_vm13, 0, %v2103_v18  ;;  %v2226_v35 = vmul.u32 %v4338_v13, %v2172_v38 }
 0x278   :  { %v2229_v3 = vadd.s32 1, %v2225_v0  ;;  %v2298_v25 = vadd.s32 1, %v2666_v24  ;;  %v2446_v22 = vand.u32 2139095040, %v4392_v6  ;;  %v2122_v19 = vadd.s32 3, %v2105_v4 }
 0x279   :  { %v2101_v40 = vsel %vm1980_vm11, %v2100_v21, %v2099_v42  ;;  %v4406_v9 = vshll.u32 %v2296_v7, 8  ;;  %v2443_v34 = vand.u32 2147483647, %v4392_v6  ;;  %v4415_v30 = vadd.s32 %v2222_v52, %v2203_v14 }
 0x27a   :  { %v2104_v28 = vsel %vm1979_vm13, %v4112_v8, %v2101_v40  ;;  %v2230_v39 = vsel %vm2228_vm15, %v2229_v3, %v2225_v0  ;;  %vm2299_vm0 = vcmp.gt.s32.totalorder %v2298_v25, 0  ;;  %v2447_v44 = vshrl.u32 %v2446_v22, 23 }
 0x27b   :  { %v2106_v31 = vmul.f32 %v2104_v28, %v2104_v28  ;;  %v2231_v61 = vadd.s32 %v2230_v39, %v2226_v35  ;;  %v2300_v62 = vsel %vm2299_vm0, %v2298_v25, 0  ;;  %v4411_v43 = vand.u32 3, %v2122_v19 }
 0x27c   :  { %v2302_v49 = vand.u32 31, %v2300_v62  ;;  %v4418_v53 = vand.u32 65535, %v4406_v9  ;;  %v4422_v17 = vand.u32 8388607, %v2443_v34  ;;  %v2669_v12 = vadd.s32 4294967169, %v2447_v44 }
 0x27d   :  { %v2107_v63 = vmul.f32 -0.001358992, %v2106_v31  ;;  %v2114_v59 = vmul.f32 -0.00019511016, %v2106_v31  ;;  %v2232_v15 = vadd.s32 536870912, %v2231_v61  ;;  %v4425_v50 = vshrl.u32 %v2300_v62, 5 }
 0x27e   :  { %v4409_v13 = vsub.s32 32, %v2302_v49  ;;  %vm2128_vm3 = vcmp.eq.s32.totalorder %v4411_v43, 2  ;;  %v2305_v41 = vshll.u32 %v2712_v45, %v2302_v49  ;;  %vm2125_vm1 = vcmp.eq.s32.totalorder %v4411_v43, 0 }
 0x27f   :  { %v2108_v33 = vadd.f32 0.041655596, %v2107_v63  ;;  %v2115_v46 = vadd.f32 0.008332121, %v2114_v59  ;;  %v4413_v16 = vshrl.u32 %v2232_v15, 30  ;;  %v2308_v14 = vshll.u32 %v2713_v47, %v2302_v49 }
 0x280   :  { %v2306_v58 = vshrl.u32 %v2713_v47, %v4409_v13  ;;  %v2309_v27 = vshrl.u32 %v2714_v51, %v4409_v13  ;;  %v2315_v5 = vshrl.u32 %v2716_v57, %v4409_v13  ;;  %v2312_v48 = vshrl.u32 %v2715_v54, %v4409_v13 }
 0x281   :  { %v2109_v55 = vmul.f32 %v2108_v33, %v2106_v31  ;;  %v2116_v37 = vmul.f32 %v2115_v46, %v2106_v31  ;;  %v2234_v10 = vshll.u32 %v4413_v16, 30  ;;  %v2314_v56 = vshll.u32 %v2715_v54, %v2302_v49 }
 0x282   :  { %v2318_v20 = vshrl.u32 %v2717_v60, %v4409_v13  ;;  %vm2124_vm2 = vcmp.lt.s32.totalorder %v4411_v43, 2  ;;  %vm2121_vm5 = vweird.f32 %v4112_v8  ;;  %v2307_v38 = vor.u32 %v2306_v58, %v2305_v41 }
 0x283   :  { %v2110_v26 = vadd.f32 -0.4999988, %v2109_v55  ;;  %v2117_v23 = vadd.f32 -0.16666654, %v2116_v37  ;;  %v4434_v32 = vsub.s32 %v2231_v61, %v2234_v10  ;;  %v2310_v0 = vor.u32 %v2309_v27, %v2308_v14 }
 0x284   :  { %v2311_v24 = vshll.u32 %v2714_v51, %v2302_v49  ;;  %v2316_v21 = vor.u32 %v2315_v5, %v2314_v56  ;;  %v2317_v25 = vshll.u32 %v2716_v57, %v2302_v49  ;;  %v2338_v22 = vshrl.u32 %v4406_v9, 16 }
 0x285   :  { %v2111_v42 = vmul.f32 %v2110_v26, %v2106_v31  ;;  %v2118_v18 = vmul.f32 %v2117_v23, %v2106_v31  ;;  %vm2236_vm4 = vcmp.lt.s32.totalorder %v4434_v32, 0  ;;  %v2237_v52 = vsub.s32 0, %v4434_v32 }
 0x286   :  { %v2313_v35 = vor.u32 %v2312_v48, %v2311_v24  ;;  %v4452_v39 = vadd.s32 1, %v2669_v12  ;;  %vm2135_vm6 = vcmp.lt.s32.totalorder %v4157_v29, 0  ;;  %v2319_v61 = vor.u32 %v2318_v20, %v2317_v25 }
 0x287   :  { %v2112_v4 = vadd.f32 1.0, %v2111_v42  ;;  %v2119_v3 = vadd.f32 1.0, %v2118_v18  ;;  %v2238_v7 = vsel %vm2236_vm4, %v2237_v52, %v4434_v32  ;;  %vm2320_vm7 = vcmp.lt.s32.totalorder %v4425_v50, 1 }
 0x288   :  { %v2239_v40 = vclz %v2238_v7  ;;  %v2257_v63 = vsub.s32 4, %v4413_v16  ;;  %vm2323_vm8 = vcmp.lt.s32.totalorder %v4425_v50, 4  ;;  %v2328_v49 = vsel %vm2320_vm7, %v2307_v38, %v2310_v0 }
 0x289   :  { %v2120_v31 = vmul.f32 %v2119_v3, %v2104_v28  ;;  %v2129_v19 = vxor.u32 2147483648, %v2112_v4  ;;  %vm2321_vm10 = vcmp.lt.s32.totalorder %v4425_v50, 2  ;;  %vm2322_vm11 = vcmp.lt.s32.totalorder %v4425_v50, 3 }
 0x28a   :  { %v2664_v62 = vadd.s32 4294967294, %v2239_v40  ;;  %v2329_v28 = vsel %vm2323_vm8, %v2316_v21, 920167782  ;;  %v2332_v33 = vsel %vm2320_vm7, %v2310_v0, %v2313_v35  ;;  %v2333_v10 = vsel %vm2323_vm8, %v2319_v61, 1326507024 }
 0x28b   :  { %v2126_v59 = vxor.u32 2147483648, %v2120_v31  ;;  %v2130_v15 = vsel %vm2128_vm3, %v2129_v19, %v2120_v31  ;;  %v2330_v44 = vsel %vm2322_vm11, %v2313_v35, %v2329_v28  ;;  %vm2454_vm12 = vcmp.gt.s32.totalorder %v4452_v39, 0 }
 0x28c   :  { %vm2665_vm9 = vcmp.lt.s32.totalorder %v2664_v62, 0  ;;  %v2331_v37 = vsel %vm2321_vm10, %v2328_v49, %v2330_v44  ;;  %v2325_v5 = vsel %vm2323_vm8, %v2313_v35, 2102212464  ;;  %v2334_v23 = vsel %vm2322_vm11, %v2316_v21, %v2333_v10 }
 0x28d   :  { %v2127_v46 = vsel %vm2125_vm1, %v2112_v4, %v2126_v59  ;;  %v2242_v55 = vsel %vm2665_vm9, 0, %v2664_v62  ;;  %v2361_v41 = vand.u32 65535, %v2331_v37  ;;  %v2362_v14 = vshrl.u32 %v2331_v37, 16 }
 0x28e   :  { %v2131_v12 = vsel %vm2124_vm2, %v2127_v46, %v2130_v15  ;;  %v2243_v58 = vsub.s32 32, %v2242_v55  ;;  %v2247_v27 = vsub.s32 4294967266, %v2242_v55  ;;  %v2244_v48 = vshll.u32 %v4434_v32, %v2242_v55 }
 0x28f   :  { %v2132_v26 = vsel %vm2121_vm5, nan, %v2131_v12  ;;  %v2335_v43 = vsel %vm2321_vm10, %v2332_v33, %v2334_v23  ;;  %v2304_v42 = vshrl.u32 %v2712_v45, %v4409_v13  ;;  %v2364_v52 = vmul.u32 %v2362_v14, %v4418_v53 }
 0x290   :  { %v2245_v56 = vshrl.u32 %v4415_v30, %v2243_v58  ;;  %v2248_v20 = vadd.s32 127, %v2247_v27  ;;  %2602 = vst [vmem:[#allocation2 + $0x60] sm:$0xff] %v2132_v26  ;;  %v2339_v18 = vand.u32 65535, %v2335_v43  ;;  %v2340_v8 = vshrl.u32 %v2335_v43, 16 }
 0x291   :  { %v4495_v32 = vsel %vm2135_vm6, %v2257_v63, %v4413_v16  ;;  %v2365_v30 = vmul.u32 %v2361_v41, %v2338_v22  ;;  %vm4499_vm14 = vcmp.le.f32.partialorder %v2133_v36, 0.7853982  ;;  %v2324_v13 = vsel %vm2320_vm7, %v2304_v42, %v2307_v38 }
 0x292   :  { %v2246_v24 = vor.u32 %v2245_v56, %v2244_v48  ;;  %v2249_v21 = vshll.u32 %v2248_v20, 23  ;;  %v2326_v3 = vsel %vm2322_vm11, %v2310_v0, %v2325_v5  ;;  %v2342_v7 = vmul.u32 %v2340_v8, %v4418_v53 }
 0x293   :  { %v2343_v25 = vmul.u32 %v2339_v18, %v2338_v22  ;;  %v2363_v16 = vmul.u32 %v2361_v41, %v4418_v53  ;;  %v2366_v35 = vmul.u32 %v2362_v14, %v2338_v22  ;;  %v2367_v31 = vshll.u32 %v2364_v52, 16 }
 0x294   :  { %v2250_v40 = vor.u32 4788187, %v2249_v21  ;;  %v2253_v19 = vcvt.s32.f32 %v2246_v24  ;;  %v2341_v36 = vmul.u32 %v2339_v18, %v4418_v53  ;;  %v2344_v61 = vmul.u32 %v2340_v8, %v2338_v22 }
 0x295   :  { %v2345_v62 = vshll.u32 %v2342_v7, 16  ;;  %v2347_v49 = vshll.u32 %v2343_v25, 16  ;;  %v2369_v59 = vshll.u32 %v2365_v30, 16  ;;  %vm2371_vm13 = vc.u32 %v2363_v16, %v2367_v31 }
 0x296   :  { %v2251_v63 = vand.u32 2147483647, %v2250_v40  ;;  %v2372_v0 = vsel %vm2371_vm13, 1, %v2711_v2  ;;  %v2373_v28 = vadd.s32 %v2367_v31, %v2363_v16  ;;  %v2455_v46 = vsel %vm2454_vm12, %v4452_v39, 0 }
 0x297   :  { %vm2349_vm15 = vc.u32 %v2341_v36, %v2345_v62  ;;  %v2351_v38 = vadd.s32 %v2345_v62, %v2341_v36  ;;  %v2374_v33 = vadd.s32 %v2372_v0, %v2366_v35  ;;  %v2327_v53 = vsel %vm2321_vm10, %v2324_v13, %v2326_v3 }
 0x298   :  { %v2254_v15 = vmul.f32 %v2253_v19, %v2251_v63  ;;  %v2350_v44 = vsel %vm2349_vm15, 1, %v2711_v2  ;;  %vm2375_vm3 = vc.u32 %v2373_v28, %v2369_v59  ;;  %v2368_v10 = vshrl.u32 %v2364_v52, 16 }
 0x299   :  { %v2352_v22 = vadd.s32 %v2350_v44, %v2344_v61  ;;  %vm2353_vm0 = vc.u32 %v2351_v38, %v2347_v49  ;;  %v2376_v12 = vsel %vm2375_vm3, 1, %v2711_v2  ;;  %v2346_v58 = vshrl.u32 %v2342_v7, 16 }
 0x29a   :  { %v2255_v55 = vxor.u32 2147483648, %v2254_v15  ;;  %v2354_v37 = vsel %vm2353_vm0, 1, %v2711_v2  ;;  %v2378_v5 = vadd.s32 %v2376_v12, %v2374_v33  ;;  %v2457_v26 = vand.u32 31, %v2455_v46 }
 0x29b   :  { %v2356_v27 = vadd.s32 %v2354_v37, %v2352_v22  ;;  %v2260_v50 = vsel %vm4499_vm14, 0, %v4495_v32  ;;  %v2348_v39 = vshrl.u32 %v2343_v25, 16  ;;  %v2370_v41 = vshrl.u32 %v2365_v30, 16 }
 0x29c   :  { %v2256_v23 = vsel %vm2135_vm6, %v2255_v55, %v2254_v15  ;;  %v2379_v56 = vadd.s32 %v2378_v5, %v2368_v10  ;;  %v4527_v20 = vsub.s32 32, %v2457_v26  ;;  %v4529_v42 = vadd.s32 %v2373_v28, %v2369_v59 }
 0x29d   :  { %v2259_v14 = vsel %vm4499_vm14, %v4157_v29, %v2256_v23  ;;  %v2357_v48 = vadd.s32 %v2356_v27, %v2346_v58  ;;  %v2381_v18 = vmul.u32 %v4406_v9, %v2327_v53  ;;  %v4532_v8 = vshrl.u32 %v2455_v46, 5 }
 0x29e   :  { %v2261_v43 = vmul.f32 %v2259_v14, %v2259_v14  ;;  %v2380_v24 = vadd.s32 %v2379_v56, %v2370_v41  ;;  %v2460_v21 = vshll.u32 %v2712_v45, %v2457_v26  ;;  %v2461_v32 = vshrl.u32 %v2713_v47, %v4527_v20 }
 0x29f   :  { %v4534_v52 = vadd.s32 %v2357_v48, %v2348_v39  ;;  %v2463_v13 = vshll.u32 %v2713_v47, %v2457_v26  ;;  %v2464_v3 = vshrl.u32 %v2714_v51, %v4527_v20  ;;  %v2466_v7 = vshll.u32 %v2714_v51, %v2457_v26 }
 0x2a0   :  { %v2262_v30 = vmul.f32 -0.001358992, %v2261_v43  ;;  %v2269_v4 = vmul.f32 -0.00019511016, %v2261_v43  ;;  %v2384_v9 = vadd.s32 1, %v2380_v24  ;;  %v2467_v25 = vshrl.u32 %v2715_v54, %v4527_v20 }
 0x2a1   :  { %vm2383_vm1 = vc.u32 %v4534_v52, %v4529_v42  ;;  %v4547_v35 = vor.u32 %v2461_v32, %v2460_v21  ;;  %v4549_v31 = vor.u32 %v2464_v3, %v2463_v13  ;;  %v2469_v47 = vshll.u32 %v2715_v54, %v2457_v26 }
 0x2a2   :  { %v2263_v40 = vadd.f32 0.041655596, %v2262_v30  ;;  %v2270_v16 = vadd.f32 0.008332121, %v2269_v4  ;;  %v2385_v19 = vsel %vm2383_vm1, %v2384_v9, %v2380_v24  ;;  %v2470_v36 = vshrl.u32 %v2716_v57, %v4527_v20 }
 0x2a3   :  { %v2472_v61 = vshll.u32 %v2716_v57, %v2457_v26  ;;  %v2386_v51 = vadd.s32 %v2385_v19, %v2381_v18  ;;  %v2473_v49 = vshrl.u32 %v2717_v60, %v4527_v20  ;;  %v2277_v59 = vadd.s32 3, %v2260_v50 }
 0x2a4   :  { %v2264_v62 = vmul.f32 %v2263_v40, %v2261_v43  ;;  %v2271_v63 = vmul.f32 %v2270_v16, %v2261_v43  ;;  %v4557_v38 = vor.u32 %v2467_v25, %v2466_v7  ;;  %v2471_v0 = vor.u32 %v2470_v36, %v2469_v47 }
 0x2a5   :  { %vm2478_vm2 = vcmp.lt.s32.totalorder %v4532_v8, 4  ;;  %v2387_v54 = vadd.s32 536870912, %v2386_v51  ;;  %v2474_v44 = vor.u32 %v2473_v49, %v2472_v61  ;;  %v2451_v33 = vor.u32 8388608, %v4422_v17 }
 0x2a6   :  { %v2265_v28 = vadd.f32 -0.4999988, %v2264_v62  ;;  %v2272_v15 = vadd.f32 -0.16666654, %v2271_v63  ;;  %vm2475_vm4 = vcmp.lt.s32.totalorder %v4532_v8, 1  ;;  %vm2477_vm5 = vcmp.lt.s32.totalorder %v4532_v8, 3 }
 0x2a7   :  { %v2484_v57 = vsel %vm2478_vm2, %v2471_v0, 920167782  ;;  %v4565_v53 = vshrl.u32 %v2387_v54, 30  ;;  %v2483_v22 = vsel %vm2475_vm4, %v4547_v35, %v4549_v31  ;;  %v2278_v55 = vand.u32 3, %v2277_v59 }
 0x2a8   :  { %v2266_v60 = vmul.f32 %v2265_v28, %v2261_v43  ;;  %v2273_v46 = vmul.f32 %v2272_v15, %v2261_v43  ;;  %vm2476_vm6 = vcmp.lt.s32.totalorder %v4532_v8, 2  ;;  %v2485_v17 = vsel %vm2477_vm5, %v4557_v38, %v2484_v57 }
 0x2a9   :  { %v2488_v37 = vsel %vm2478_vm2, %v2474_v44, 1326507024  ;;  %v2389_v58 = vshll.u32 %v4565_v53, 30  ;;  %v2487_v27 = vsel %vm2475_vm4, %v4549_v31, %v4557_v38  ;;  %v2486_v5 = vsel %vm2476_vm6, %v2483_v22, %v2485_v17 }
 0x2aa   :  { %v2267_v10 = vadd.f32 1.0, %v2266_v60  ;;  %v2274_v12 = vadd.f32 1.0, %v2273_v46  ;;  %v2489_v26 = vsel %vm2477_vm5, %v2471_v0, %v2488_v37  ;;  %v4586_v23 = vshll.u32 %v2451_v33, 8 }
 0x2ab   :  { %v2390_v41 = vsub.s32 %v2386_v51, %v2389_v58  ;;  %vm2279_vm7 = vcmp.lt.s32.totalorder %v2278_v55, 2  ;;  %vm2280_vm8 = vcmp.eq.s32.totalorder %v2278_v55, 0  ;;  %v2490_v48 = vsel %vm2476_vm6, %v2487_v27, %v2489_v26 }
 0x2ac   :  { %v2275_v50 = vmul.f32 %v2274_v12, %v2259_v14  ;;  %v2284_v39 = vxor.u32 2147483648, %v2267_v10  ;;  %v2517_v56 = vshrl.u32 %v2486_v5, 16  ;;  %vm2283_vm10 = vcmp.eq.s32.totalorder %v2278_v55, 2 }
 0x2ad   :  { %vm2391_vm11 = vcmp.lt.s32.totalorder %v2390_v41, 0  ;;  %v2392_v18 = vsub.s32 0, %v2390_v41  ;;  %v2492_v24 = vand.u32 65535, %v4586_v23  ;;  %v2493_v21 = vshrl.u32 %v4586_v23, 16 }
 0x2ae   :  { %v2281_v43 = vxor.u32 2147483648, %v2275_v50  ;;  %v2494_v32 = vand.u32 65535, %v2490_v48  ;;  %v2495_v30 = vshrl.u32 %v2490_v48, 16  ;;  %v2285_v14 = vsel %vm2283_vm10, %v2284_v39, %v2275_v50 }
 0x2af   :  { %v2393_v13 = vsel %vm2391_vm11, %v2392_v18, %v2390_v41  ;;  %v2516_v3 = vand.u32 65535, %v2486_v5  ;;  %vm2276_vm9 = vweird.f32 %v4157_v29  ;;  %v2519_v25 = vmul.u32 %v2517_v56, %v2492_v24 }
 0x2b0   :  { %v2282_v4 = vsel %vm2280_vm8, %v2267_v10, %v2281_v43  ;;  %v2394_v7 = vclz %v2393_v13  ;;  %v2497_v16 = vmul.u32 %v2495_v30, %v2492_v24  ;;  %v2498_v19 = vmul.u32 %v2494_v32, %v2493_v21 }
 0x2b1   :  { %v2286_v9 = vsel %vm2279_vm7, %v2282_v4, %v2285_v14  ;;  %v2382_v47 = vadd.s32 %v4529_v42, %v4534_v52  ;;  %v2496_v61 = vmul.u32 %v2494_v32, %v2492_v24  ;;  %v2518_v63 = vmul.u32 %v2516_v3, %v2492_v24 }
 0x2b2   :  { %v2287_v40 = vsel %vm2276_vm9, nan, %v2286_v9  ;;  %v2667_v36 = vadd.s32 4294967294, %v2394_v7  ;;  %v2500_v62 = vshll.u32 %v2497_v16, 16  ;;  %v2520_v51 = vmul.u32 %v2516_v3, %v2493_v21 }
 0x2b3   :  { %2603 = vst [vmem:[#allocation2 + $0x68] sm:$0xff] %v2287_v40  ;;  %v2499_v49 = vmul.u32 %v2495_v30, %v2493_v21  ;;  %v2501_v59 = vshrl.u32 %v2497_v16, 16  ;;  %v2522_v29 = vshll.u32 %v2519_v25, 16  ;;  %v2502_v28 = vshll.u32 %v2498_v19, 16 }
 0x2b4   :  { %vm2668_vm12 = vcmp.lt.s32.totalorder %v2667_v36, 0  ;;  %vm2504_vm14 = vc.u32 %v2496_v61, %v2500_v62  ;;  %v2506_v15 = vadd.s32 %v2500_v62, %v2496_v61  ;;  %v2521_v57 = vmul.u32 %v2517_v56, %v2493_v21 }
 0x2b5   :  { %v2397_v0 = vsel %vm2668_vm12, 0, %v2667_v36  ;;  %v2505_v33 = vsel %vm2504_vm14, 1, %v2711_v2  ;;  %vm2526_vm15 = vc.u32 %v2518_v63, %v2522_v29  ;;  %v2524_v37 = vshll.u32 %v2520_v51, 16 }
 0x2b6   :  { %v2398_v54 = vsub.s32 32, %v2397_v0  ;;  %v2402_v44 = vsub.s32 4294967266, %v2397_v0  ;;  %v2399_v42 = vshll.u32 %v2390_v41, %v2397_v0  ;;  %v2507_v52 = vadd.s32 %v2505_v33, %v2499_v49 }
 0x2b7   :  { %vm2508_vm13 = vc.u32 %v2506_v15, %v2502_v28  ;;  %v2527_v55 = vsel %vm2526_vm15, 1, %v2711_v2  ;;  %v2528_v10 = vadd.s32 %v2522_v29, %v2518_v63  ;;  %v2459_v5 = vshrl.u32 %v2712_v45, %v4527_v20 }
 0x2b8   :  { %v2400_v60 = vshrl.u32 %v2382_v47, %v2398_v54  ;;  %v2403_v46 = vadd.s32 127, %v2402_v44  ;;  %v2509_v22 = vsel %vm2508_vm13, 1, %v2711_v2  ;;  %v2529_v12 = vadd.s32 %v2527_v55, %v2521_v57 }
 0x2b9   :  { %v2511_v17 = vadd.s32 %v2509_v22, %v2507_v52  ;;  %v2480_v26 = vsel %vm2478_vm2, %v4557_v38, 2102212464  ;;  %vm2530_vm0 = vc.u32 %v2528_v10, %v2524_v37  ;;  %v2503_v41 = vshrl.u32 %v2498_v19, 16 }
 0x2ba   :  { %v2401_v58 = vor.u32 %v2400_v60, %v2399_v42  ;;  %v2404_v27 = vshll.u32 %v2403_v46, 23  ;;  %v2531_v48 = vsel %vm2530_vm0, 1, %v2711_v2  ;;  %v2479_v56 = vsel %vm2475_vm4, %v2459_v5, %v4547_v35 }
 0x2bb   :  { %v2512_v50 = vadd.s32 %v2511_v17, %v2501_v59  ;;  %v2523_v43 = vshrl.u32 %v2519_v25, 16  ;;  %v2533_v18 = vadd.s32 %v2531_v48, %v2529_v12  ;;  %v2481_v45 = vsel %vm2477_vm5, %v4549_v31, %v2480_v26 }
 0x2bc   :  { %v2405_v39 = vor.u32 4788187, %v2404_v27  ;;  %v2408_v21 = vcvt.s32.f32 %v2401_v58  ;;  %v2525_v38 = vshrl.u32 %v2520_v51, 16  ;;  %v2532_v4 = vadd.s32 %v2528_v10, %v2524_v37 }
 0x2bd   :  { %v2513_v20 = vadd.s32 %v2512_v50, %v2503_v41  ;;  %v2534_v32 = vadd.s32 %v2533_v18, %v2523_v43  ;;  %v2482_v2 = vsel %vm2476_vm6, %v2479_v56, %v2481_v45  ;;  %vm2290_vm1 = vcmp.lt.s32.totalorder %v4331_v11, 0 }
 0x2be   :  { %v2406_v24 = vand.u32 2147483647, %v2405_v39  ;;  %vm4616_vm2 = vcmp.le.f32.partialorder %v2288_v1, 0.7853982  ;;  %v2536_v9 = vmul.u32 %v4586_v23, %v2482_v2  ;;  %v2412_v7 = vsub.s32 4, %v4565_v53 }
 0x2bf   :  { %v2535_v14 = vadd.s32 %v2534_v32, %v2525_v38  ;;  %vm2538_vm3 = vc.u32 %v2513_v20, %v2532_v4  ;;  %vm2431_vm5 = vweird.f32 %v4331_v11  ;;  %v2537_v27 = vadd.s32 %v2532_v4, %v2513_v20 }
 0x2c0   :  { %v2409_v30 = vmul.f32 %v2408_v21, %v2406_v24  ;;  %v2413_v1 = vsel %vm2290_vm1, %v2412_v7, %v4565_v53  ;;  %vm2445_vm11 = vcmp.lt.s32.totalorder %v4392_v6, 0  ;;  %vm2444_vm9 = vcmp.le.f32.partialorder %v2443_v34, 0.7853982 }
 0x2c1   :  { %v2539_v35 = vadd.s32 1, %v2535_v14  ;;  %v2415_v23 = vsel %vm4616_vm2, 0, %v2413_v1  ;;  %vm2586_vm15 = vweird.f32 %v4392_v6 }
 0x2c2   :  { %v2410_v13 = vxor.u32 2147483648, %v2409_v30  ;;  %v2432_v15 = vadd.s32 3, %v2415_v23 }
 0x2c3   :  { %v2540_v25 = vsel %vm2538_vm3, %v2539_v35, %v2535_v14 }
 0x2c4   :  { %v2411_v31 = vsel %vm2290_vm1, %v2410_v13, %v2409_v30  ;;  %v2541_v16 = vadd.s32 %v2540_v25, %v2536_v9  ;;  %v2433_v52 = vand.u32 3, %v2432_v15 }
 0x2c5   :  { %v2414_v8 = vsel %vm4616_vm2, %v4331_v11, %v2411_v31 }
 0x2c6   :  { %v2416_v40 = vmul.f32 %v2414_v8, %v2414_v8  ;;  %v2542_v36 = vadd.s32 536870912, %v2541_v16  ;;  %vm2435_vm6 = vcmp.eq.s32.totalorder %v2433_v52, 0  ;;  %vm2438_vm7 = vcmp.eq.s32.totalorder %v2433_v52, 2 }
 0x2c7   :  { %vm2434_vm10 = vcmp.lt.s32.totalorder %v2433_v52, 2 }
 0x2c8   :  { %v2417_v19 = vmul.f32 -0.001358992, %v2416_v40  ;;  %v2424_v47 = vmul.f32 -0.00019511016, %v2416_v40  ;;  %v2543_v63 = vshrl.u32 %v2542_v36, 30 }
 0x2ca   :  { %v2418_v61 = vadd.f32 0.041655596, %v2417_v19  ;;  %v2425_v62 = vadd.f32 0.008332121, %v2424_v47  ;;  %v2544_v59 = vshll.u32 %v2543_v63, 30  ;;  %v2567_v38 = vsub.s32 4, %v2543_v63 }
 0x2cc   :  { %v2419_v51 = vmul.f32 %v2418_v61, %v2416_v40  ;;  %v2426_v49 = vmul.f32 %v2425_v62, %v2416_v40  ;;  %v2545_v28 = vsub.s32 %v2541_v16, %v2544_v59  ;;  %v2568_v14 = vsel %vm2445_vm11, %v2567_v38, %v2543_v63 }
 0x2cd   :  { %v2570_v3 = vsel %vm2444_vm9, 0, %v2568_v14 }
 0x2ce   :  { %v2420_v29 = vadd.f32 -0.4999988, %v2419_v51  ;;  %v2427_v0 = vadd.f32 -0.16666654, %v2426_v49  ;;  %vm2546_vm4 = vcmp.lt.s32.totalorder %v2545_v28, 0  ;;  %v2547_v33 = vsub.s32 0, %v2545_v28 }
 0x2cf   :  { %v2587_v25 = vadd.s32 3, %v2570_v3 }
 0x2d0   :  { %v2421_v54 = vmul.f32 %v2420_v29, %v2416_v40  ;;  %v2428_v44 = vmul.f32 %v2427_v0, %v2416_v40  ;;  %v2548_v53 = vsel %vm2546_vm4, %v2547_v33, %v2545_v28 }
 0x2d1   :  { %v2549_v60 = vclz %v2548_v53  ;;  %v2588_v47 = vand.u32 3, %v2587_v25 }
 0x2d2   :  { %v2422_v57 = vadd.f32 1.0, %v2421_v54  ;;  %v2429_v42 = vadd.f32 1.0, %v2428_v44 }
 0x2d3   :  { %v2670_v55 = vadd.s32 4294967294, %v2549_v60  ;;  %vm2590_vm12 = vcmp.eq.s32.totalorder %v2588_v47, 0  ;;  %vm2593_vm14 = vcmp.eq.s32.totalorder %v2588_v47, 2  ;;  %vm2589_vm13 = vcmp.lt.s32.totalorder %v2588_v47, 2 }
 0x2d4   :  { %v2430_v46 = vmul.f32 %v2429_v42, %v2414_v8  ;;  %v2439_v22 = vxor.u32 2147483648, %v2422_v57 }
 0x2d5   :  { %vm2671_vm8 = vcmp.lt.s32.totalorder %v2670_v55, 0 }
 0x2d6   :  { %v2436_v17 = vxor.u32 2147483648, %v2430_v46  ;;  %v2440_v10 = vsel %vm2438_vm7, %v2439_v22, %v2430_v46  ;;  %v2552_v12 = vsel %vm2671_vm8, 0, %v2670_v55 }
 0x2d7   :  { %v2553_v5 = vsub.s32 32, %v2552_v12  ;;  %v2557_v26 = vsub.s32 4294967266, %v2552_v12  ;;  %v2554_v39 = vshll.u32 %v2545_v28, %v2552_v12 }
 0x2d8   :  { %v2437_v37 = vsel %vm2435_vm6, %v2422_v57, %v2436_v17 }
 0x2d9   :  { %v2441_v58 = vsel %vm2434_vm10, %v2437_v37, %v2440_v10  ;;  %v2555_v41 = vshrl.u32 %v2537_v27, %v2553_v5  ;;  %v2558_v48 = vadd.s32 127, %v2557_v26 }
 0x2da   :  { %v2442_v50 = vsel %vm2431_vm5, nan, %v2441_v58 }
 0x2db   :  { %2604 = vst [vmem:[#allocation2 + $0x70] sm:$0xff] %v2442_v50  ;;  %v2556_v56 = vor.u32 %v2555_v41, %v2554_v39  ;;  %v2559_v43 = vshll.u32 %v2558_v48, 23 }
 0x2dd   :  { %v2560_v18 = vor.u32 4788187, %v2559_v43  ;;  %v2563_v24 = vcvt.s32.f32 %v2556_v56 }
 0x2df   :  { %v2561_v11 = vand.u32 2147483647, %v2560_v18 }
 0x2e1   :  { %v2564_v21 = vmul.f32 %v2563_v24, %v2561_v11 }
 0x2e3   :  { %v2565_v45 = vxor.u32 2147483648, %v2564_v21 }
 0x2e5   :  { %v2566_v20 = vsel %vm2445_vm11, %v2565_v45, %v2564_v21 }
 0x2e6   :  { %v2569_v32 = vsel %vm2444_vm9, %v4392_v6, %v2566_v20 }
 0x2e7   :  { %v2571_v30 = vmul.f32 %v2569_v32, %v2569_v32 }
 0x2e9   :  { %v2572_v4 = vmul.f32 -0.001358992, %v2571_v30  ;;  %v2579_v2 = vmul.f32 -0.00019511016, %v2571_v30 }
 0x2eb   :  { %v2573_v13 = vadd.f32 0.041655596, %v2572_v4  ;;  %v2580_v35 = vadd.f32 0.008332121, %v2579_v2 }
 0x2ed   :  { %v2574_v31 = vmul.f32 %v2573_v13, %v2571_v30  ;;  %v2581_v9 = vmul.f32 %v2580_v35, %v2571_v30 }
 0x2ef   :  { %v2575_v7 = vadd.f32 -0.4999988, %v2574_v31  ;;  %v2582_v8 = vadd.f32 -0.16666654, %v2581_v9 }
 0x2f1   :  { %v2576_v40 = vmul.f32 %v2575_v7, %v2571_v30  ;;  %v2583_v16 = vmul.f32 %v2582_v8, %v2571_v30 }
 0x2f3   :  { %v2577_v19 = vadd.f32 1.0, %v2576_v40  ;;  %v2584_v34 = vadd.f32 1.0, %v2583_v16 }
 0x2f5   :  { %v2585_v36 = vmul.f32 %v2584_v34, %v2569_v32  ;;  %v2594_v1 = vxor.u32 2147483648, %v2577_v19 }
 0x2f7   :  { %v2591_v61 = vxor.u32 2147483648, %v2585_v36  ;;  %v2595_v63 = vsel %vm2593_vm14, %v2594_v1, %v2585_v36 }
 0x2f9   :  { %v2592_v62 = vsel %vm2590_vm12, %v2577_v19, %v2591_v61 }
 0x2fa   :  { %v2596_v23 = vsel %vm2589_vm13, %v2592_v62, %v2595_v63 }
 0x2fb   :  { %v2597_v51 = vsel %vm2586_vm15, nan, %v2596_v23 }
 0x2fc   :  { %2605 = vst [vmem:[#allocation2 + $0x78] sm:$0xff] %v2597_v51 }
 0x2fd   :  { %2618 = dma.vmem_to_hbm [thread:$0]  %s2611_s3, 2048, %s2613_s9, [#allocation3], %s2719_s10, %s2719_s10, %s2720_s11  }
 0x2fe   :  { %2709 = dma.done.wait [#allocation3], 2048  }
 0x2ff   :  { %2710 = vsyncadd [#allocation3], 4294965248 }
 0x300   :  { %2623 = vsyncpa [#allocation3], 1 }

</bundles_post_ra>
